<compile_context>
chip_gen: v6e
topology: v6e:2x2x1
jax: 0.10.0
libtpu: 0.0.40
codegen_flags: <defaults>
</compile_context>

<pallas_src>
import functools
import numpy as np
import jax
import jax.numpy as jnp
from jax.experimental import pallas as pl
from jax.experimental.pallas import tpu as pltpu

DIM = 64                 # util.DIM (must be divisible by nhead=16)
NHEAD = 16
HEAD_DIM = DIM // NHEAD
FF = 2048                # torch.nn.TransformerEncoderLayer default dim_feedforward
FF_CHUNK = 512           # FF hidden processed in 4 chunks of 512
NLAYERS = 10
LN_EPS = 1e-5


def _layernorm(z, g, b):
    mu = jnp.mean(z, axis=-1, keepdims=True)
    zc = z - mu
    var = jnp.mean(zc * zc, axis=-1, keepdims=True)
    return zc * jax.lax.rsqrt(var + LN_EPS) * g + b


# ---------------------------------------------------------------------------
# Fused whole-stack kernel: one grid step == one encoder layer
# ---------------------------------------------------------------------------

def _stack_kernel(x_ref, pe_ref,
                  wqkv_ref, bqkv_ref, wo_ref, bo_ref,
                  ln1g_ref, ln1b_ref,
                  w1_ref, b1_ref, w2_ref, b2_ref,
                  ln2g_ref, ln2b_ref,
                  o_ref,
                  h_ref,
                  *, s_len, bsz):
    l = pl.program_id(0)

    @pl.when(l == 0)
    def _():
        # PositionalEncoding: x + pe (dropout is eval-mode identity)
        h_ref[...] = x_ref[...] + pe_ref[...]

    h = h_ref[...]                                   # (N, D) f32, rows = b*s_len + s
    h_bf = h.astype(jnp.bfloat16)

    # ---------------- self-attention block (post-LN, torch defaults) ----------------
    qkv = jnp.dot(h_bf, wqkv_ref[0],
                  preferred_element_type=jnp.float32) + bqkv_ref[0]   # (N, 3D) f32
    q = qkv[:, :DIM]
    k = qkv[:, DIM:2 * DIM]
    v = qkv[:, 2 * DIM:]
    scale = 1.0 / np.sqrt(HEAD_DIM)

    wo = wo_ref[0]                                   # (D, D) bf16, rows grouped by head
    attn_rows = []
    for b in range(bsz):                             # static: per-batch row block
        r0 = b * s_len
        acc_b = jnp.zeros((s_len, DIM), jnp.float32)
        for hh in range(NHEAD):                      # static: tiny heads (hd = 4)
            c0 = hh * HEAD_DIM
            qh = q[r0:r0 + s_len, c0:c0 + HEAD_DIM].astype(jnp.bfloat16)   # (S, hd)
            kh = k[r0:r0 + s_len, c0:c0 + HEAD_DIM].astype(jnp.bfloat16)
            vh = v[r0:r0 + s_len, c0:c0 + HEAD_DIM].astype(jnp.bfloat16)
            sc = jax.lax.dot_general(qh, kh, (((1,), (1,)), ((), ())),
                                     preferred_element_type=jnp.float32) * scale
            mx = jnp.max(sc, axis=-1, keepdims=True)
            p = jnp.exp(sc - mx)
            p = p / jnp.sum(p, axis=-1, keepdims=True)
            ctx_h = jnp.dot(p.astype(jnp.bfloat16), vh,
                            preferred_element_type=jnp.float32)           # (S, hd)
            # Fold head re-assembly into the output projection:
            #   attn_b += ctx_h @ Wo^T[rows of this head, :]
            acc_b = acc_b + jnp.dot(ctx_h.astype(jnp.bfloat16),
                                    wo[c0:c0 + HEAD_DIM, :],
                                    preferred_element_type=jnp.float32)
        attn_rows.append(acc_b)
    attn = jnp.concatenate(attn_rows, axis=0) + bo_ref[0]                  # (N, D)

    y = _layernorm(h + attn, ln1g_ref[0], ln1b_ref[0])

    # ---------------- feed-forward block, chunked over the 2048 hidden ----------------
    y_bf = y.astype(jnp.bfloat16)
    ff = jnp.zeros((bsz * s_len, DIM), jnp.float32)
    for c in range(FF // FF_CHUNK):                  # static: 4 chunks of 512
        c0 = c * FF_CHUNK
        hc = jnp.dot(y_bf, w1_ref[0, :, c0:c0 + FF_CHUNK],
                     preferred_element_type=jnp.float32) + b1_ref[0, :, c0:c0 + FF_CHUNK]
        hc = jnp.maximum(hc, 0.0).astype(jnp.bfloat16)
        ff = ff + jnp.dot(hc, w2_ref[0, c0:c0 + FF_CHUNK, :],
                          preferred_element_type=jnp.float32)
    ff = ff + b2_ref[0]

    h_ref[...] = _layernorm(y + ff, ln2g_ref[0], ln2b_ref[0])

    @pl.when(l == NLAYERS - 1)
    def _():
        o_ref[...] = h_ref[...]


def midi_transformer_forward(x, pe, packed):
    """x: (S, B, DIM) f32 (PyTorch seq-first layout). Returns (S, B, DIM) f32."""
    s_len, bsz, d = x.shape
    n = s_len * bsz

    # batch-major flatten: row = b * s_len + s
    x2d = jnp.transpose(x, (1, 0, 2)).reshape(n, d)
    pe2d = jnp.broadcast_to(pe[:s_len][None, :, :], (bsz, s_len, d)).reshape(n, d)

    kernel = functools.partial(_stack_kernel, s_len=s_len, bsz=bsz)

    grid_spec = pltpu.PrefetchScalarGridSpec(
        num_scalar_prefetch=0,
        grid=(NLAYERS,),
        in_specs=[
            pl.BlockSpec((n, d), lambda l: (0, 0)),              # x (resident)
            pl.BlockSpec((n, d), lambda l: (0, 0)),              # pe (resident)
            pl.BlockSpec((1, d, 3 * d), lambda l: (l, 0, 0)),    # wqkv^T  (bf16, streamed)
            pl.BlockSpec((1, 1, 3 * d), lambda l: (l, 0, 0)),    # bqkv
            pl.BlockSpec((1, d, d), lambda l: (l, 0, 0)),        # wo^T    (bf16)
            pl.BlockSpec((1, 1, d), lambda l: (l, 0, 0)),        # bo
            pl.BlockSpec((1, 1, d), lambda l: (l, 0, 0)),        # ln1_g
            pl.BlockSpec((1, 1, d), lambda l: (l, 0, 0)),        # ln1_b
            pl.BlockSpec((1, d, FF), lambda l: (l, 0, 0)),       # w1^T    (bf16)
            pl.BlockSpec((1, 1, FF), lambda l: (l, 0, 0)),       # b1
            pl.BlockSpec((1, FF, d), lambda l: (l, 0, 0)),       # w2^T    (bf16)
            pl.BlockSpec((1, 1, d), lambda l: (l, 0, 0)),        # b2
            pl.BlockSpec((1, 1, d), lambda l: (l, 0, 0)),        # ln2_g
            pl.BlockSpec((1, 1, d), lambda l: (l, 0, 0)),        # ln2_b
        ],
        out_specs=pl.BlockSpec((n, d), lambda l: (0, 0)),
        scratch_shapes=[pltpu.VMEM((n, d), jnp.float32)],        # persistent activation h
    )

    out2d = pl.pallas_call(
        kernel,
        out_shape=jax.ShapeDtypeStruct((n, d), jnp.float32),
        grid_spec=grid_spec,
        compiler_params=pltpu.CompilerParams(
            dimension_semantics=("arbitrary",)),
    )(x2d, pe2d,
      packed['wqkv_t'], packed['bqkv'], packed['wo_t'], packed['bo'],
      packed['ln1_g'], packed['ln1_b'],
      packed['w1_t'], packed['b1'], packed['w2_t'], packed['b2'],
      packed['ln2_g'], packed['ln2_b'])

    return out2d.reshape(bsz, s_len, d).transpose(1, 0, 2)


# ---------------------------------------------------------------------------
# Parameter construction
# ---------------------------------------------------------------------------

def make_pe(max_len, d_model):
    position = np.arange(max_len, dtype=np.float32)[:, None]
    div_term = np.exp(np.arange(0, d_model, 2, dtype=np.float32)
                      * (-np.log(10000.0) / d_model))
    pe = np.zeros((max_len, d_model), np.float32)
    pe[:, 0::2] = np.sin(position * div_term)
    pe[:, 1::2] = np.cos(position * div_term)
    return jnp.asarray(pe)


def init_params(key):
    """Per-layer f32 parameters in the PyTorch nn.Linear (Dout, Din) convention."""
    layers = []
    for lk in jax.random.split(key, NLAYERS):
        k1, k2, k3, k4 = jax.random.split(lk, 4)
        layers.append(dict(
            wqkv=0.02 * jax.random.normal(k1, (3 * DIM, DIM), jnp.float32),
            bqkv=jnp.zeros((3 * DIM,), jnp.float32),
            wo=0.02 * jax.random.normal(k2, (DIM, DIM), jnp.float32),
            bo=jnp.zeros((DIM,), jnp.float32),
            ln1_g=jnp.ones((DIM,), jnp.float32),
            ln1_b=jnp.zeros((DIM,), jnp.float32),
            w1=0.02 * jax.random.normal(k3, (FF, DIM), jnp.float32),
            b1=jnp.zeros((FF,), jnp.float32),
            w2=0.02 * jax.random.normal(k4, (DIM, FF), jnp.float32),
            b2=jnp.zeros((DIM,), jnp.float32),
            ln2_g=jnp.ones((DIM,), jnp.float32),
            ln2_b=jnp.zeros((DIM,), jnp.float32),
        ))
    return layers


def pack_params(layers):
    """Stack params with a leading NLAYERS axis, pre-transpose weights to (Din, Dout),
    cast matmul weights to bf16, pre-reshape biases / LN params to (1, Dout)."""
    def stack(fn):
        return jnp.stack([fn(p) for p in layers], axis=0)
    return dict(
        wqkv_t=stack(lambda p: p['wqkv'].T.astype(jnp.bfloat16)),   # (L, D, 3D)
        bqkv=stack(lambda p: p['bqkv'].reshape(1, -1)),             # (L, 1, 3D)
        wo_t=stack(lambda p: p['wo'].T.astype(jnp.bfloat16)),       # (L, D, D)
        bo=stack(lambda p: p['bo'].reshape(1, -1)),
        ln1_g=stack(lambda p: p['ln1_g'].reshape(1, -1)),
        ln1_b=stack(lambda p: p['ln1_b'].reshape(1, -1)),
        w1_t=stack(lambda p: p['w1'].T.astype(jnp.bfloat16)),       # (L, D, FF)
        b1=stack(lambda p: p['b1'].reshape(1, -1)),                 # (L, 1, FF)
        w2_t=stack(lambda p: p['w2'].T.astype(jnp.bfloat16)),       # (L, FF, D)
        b2=stack(lambda p: p['b2'].reshape(1, -1)),
        ln2_g=stack(lambda p: p['ln2_g'].reshape(1, -1)),
        ln2_b=stack(lambda p: p['ln2_b'].reshape(1, -1)),
    )


# ---------------------------------------------------------------------------
# Pure-JAX references (f32 semantics, and a bf16-matmul mimic of the kernel)
# ---------------------------------------------------------------------------

def _ln_ref(z, g, b):
    mu = jnp.mean(z, axis=-1, keepdims=True)
    var = jnp.mean((z - mu) ** 2, axis=-1, keepdims=True)
    return (z - mu) * jax.lax.rsqrt(var + LN_EPS) * g + b


def ref_forward(x, pe, layers, use_bf16=False):
    s_len, bsz, d = x.shape

    def mm(a, w):  # a @ w.T (PyTorch Linear); optionally mirror the kernel's bf16 MXU operands
        wt = w.T
        if use_bf16:
            a = a.astype(jnp.bfloat16)
            wt = wt.astype(jnp.bfloat16)
        return jnp.dot(a, wt, preferred_element_type=jnp.float32)

    h = (x + pe[:s_len, None, :]).reshape(s_len * bsz, d)
    for p in layers:
        qkv = mm(h, p['wqkv']) + p['bqkv']
        q, k, v = qkv[:, :d], qkv[:, d:2 * d], qkv[:, 2 * d:]
        qh = q.reshape(s_len, bsz, NHEAD, HEAD_DIM).transpose(1, 2, 0, 3)
        kh = k.reshape(s_len, bsz, NHEAD, HEAD_DIM).transpose(1, 2, 0, 3)
        vh = v.reshape(s_len, bsz, NHEAD, HEAD_DIM).transpose(1, 2, 0, 3)
        if use_bf16:
            qh = qh.astype(jnp.bfloat16)
            kh = kh.astype(jnp.bfloat16)
            vh = vh.astype(jnp.bfloat16)
        sc = jnp.einsum('bhsd,bhtd->bhst', qh, kh,
                        preferred_element_type=jnp.float32) / np.sqrt(HEAD_DIM)
        a = jax.nn.softmax(sc, axis=-1)
        if use_bf16:
            a = a.astype(jnp.bfloat16)
        ctx = jnp.einsum('bhst,bhtd->bhsd', a, vh, preferred_element_type=jnp.float32)
        ctx = ctx.transpose(2, 0, 1, 3).reshape(s_len * bsz, d)
        attn_out = mm(ctx, p['wo']) + p['bo']
        y = _ln_ref(h + attn_out, p['ln1_g'], p['ln1_b'])
        ffh = jnp.maximum(mm(y, p['w1']) + p['b1'], 0.0)
        ff = mm(ffh, p['w2']) + p['b2']
        h = _ln_ref(y + ff, p['ln2_g'], p['ln2_b'])
    return h.reshape(s_len, bsz, d)


if __name__ == "__main__":
    key = jax.random.PRNGKey(0)
    kx, kp = jax.random.split(key)

    S, B = 8, 2          # small shapes: seq=8, batch=2, DIM=64
    K_MAXLEN = 16        # `k` argument of MidiTransformer (PositionalEncoding max_len)

    x = jax.random.normal(kx, (S, B, DIM), jnp.float32)
    pe = make_pe(K_MAXLEN, DIM)
    layers = init_params(kp)
    packed = pack_params(layers)

    fwd = jax.jit(midi_transformer_forward)
    out = jax.block_until_ready(fwd(x, pe, packed))

    assert out.shape == (S, B, DIM)
    assert bool(jnp.all(jnp.isfinite(out)))

    out_np = np.asarray(out)
    ref_bf = np.asarray(ref_forward(x, pe, layers, use_bf16=True))    # mirrors kernel dtypes
    ref_fp = np.asarray(ref_forward(x, pe, layers, use_bf16=False))   # full-f32 semantics
    assert np.allclose(out_np, ref_bf, atol=2e-3, rtol=0.0), float(np.max(np.abs(out_np - ref_bf)))
    assert np.allclose(out_np, ref_fp, atol=5e-2, rtol=0.0), float(np.max(np.abs(out_np - ref_fp)))

    print("KERNEL_OK")
</pallas_src>

<mosaic_0001>
module attributes {stable_mosaic.version = 11 : i64} {
  func.func @_stack_kernel(%arg0: i32, %arg1: memref<16x64xf32, #tpu.memory_space<vmem>>, %arg2: memref<16x64xf32, #tpu.memory_space<vmem>>, %arg3: memref<1x64x192xbf16, #tpu.memory_space<vmem>>, %arg4: memref<1x1x192xf32, #tpu.memory_space<vmem>>, %arg5: memref<1x64x64xbf16, #tpu.memory_space<vmem>>, %arg6: memref<1x1x64xf32, #tpu.memory_space<vmem>>, %arg7: memref<1x1x64xf32, #tpu.memory_space<vmem>>, %arg8: memref<1x1x64xf32, #tpu.memory_space<vmem>>, %arg9: memref<1x64x2048xbf16, #tpu.memory_space<vmem>>, %arg10: memref<1x1x2048xf32, #tpu.memory_space<vmem>>, %arg11: memref<1x2048x64xbf16, #tpu.memory_space<vmem>>, %arg12: memref<1x1x64xf32, #tpu.memory_space<vmem>>, %arg13: memref<1x1x64xf32, #tpu.memory_space<vmem>>, %arg14: memref<1x1x64xf32, #tpu.memory_space<vmem>>, %arg15: memref<16x64xf32, #tpu.memory_space<vmem>>, %arg16: memref<16x64xf32, #tpu.memory_space<vmem>>) attributes {dimension_semantics = [#tpu.dimension_semantics<arbitrary>], iteration_bounds = array<i64: 10>, scalar_prefetch = 0 : i64, scratch_operands = 1 : i64, tpu.core_type = #tpu.core_type<tc>, window_params = [{pipeline_mode = #tpu.pipeline_mode<synchronous>, transform_indices = @transform_0, window_bounds = array<i64: 16, 64>}, {pipeline_mode = #tpu.pipeline_mode<synchronous>, transform_indices = @transform_1, window_bounds = array<i64: 16, 64>}, {transform_indices = @transform_2, window_bounds = array<i64: 1, 64, 192>}, {transform_indices = @transform_3, window_bounds = array<i64: 1, 1, 192>}, {transform_indices = @transform_4, window_bounds = array<i64: 1, 64, 64>}, {transform_indices = @transform_5, window_bounds = array<i64: 1, 1, 64>}, {transform_indices = @transform_6, window_bounds = array<i64: 1, 1, 64>}, {transform_indices = @transform_7, window_bounds = array<i64: 1, 1, 64>}, {transform_indices = @transform_8, window_bounds = array<i64: 1, 64, 2048>}, {transform_indices = @transform_9, window_bounds = array<i64: 1, 1, 2048>}, {transform_indices = @transform_10, window_bounds = array<i64: 1, 2048, 64>}, {transform_indices = @transform_11, window_bounds = array<i64: 1, 1, 64>}, {transform_indices = @transform_12, window_bounds = array<i64: 1, 1, 64>}, {transform_indices = @transform_13, window_bounds = array<i64: 1, 1, 64>}, {pipeline_mode = #tpu.pipeline_mode<synchronous>, transform_indices = @transform_14, window_bounds = array<i64: 16, 64>}]} {
    %c0_i32 = arith.constant 0 : i32
    %0 = arith.cmpi eq, %arg0, %c0_i32 : i32
    %1 = arith.extui %0 : i1 to i32
    %c0_i32_0 = arith.constant 0 : i32
    %2 = arith.cmpi ne, %1, %c0_i32_0 : i32
    scf.if %2 {
      %c0_282 = arith.constant 0 : index
      %c0_283 = arith.constant 0 : index
      %908 = vector.load %arg1[%c0_282, %c0_283] : memref<16x64xf32, #tpu.memory_space<vmem>>, vector<16x64xf32>
      %c0_284 = arith.constant 0 : index
      %c0_285 = arith.constant 0 : index
      %909 = vector.load %arg2[%c0_284, %c0_285] : memref<16x64xf32, #tpu.memory_space<vmem>>, vector<16x64xf32>
      %910 = arith.addf %908, %909 : vector<16x64xf32>
      %c0_286 = arith.constant 0 : index
      %c0_287 = arith.constant 0 : index
      %911 = vector.load %arg16[%c0_286, %c0_287] : memref<16x64xf32, #tpu.memory_space<vmem>>, vector<16x64xf32>
      tpu.vector_store %arg16[%c0_286, %c0_287], %910 {strides = array<i32>} : memref<16x64xf32, #tpu.memory_space<vmem>>, vector<16x64xf32>,
    } else {
    }
    %c0 = arith.constant 0 : index
    %c0_1 = arith.constant 0 : index
    %3 = vector.load %arg16[%c0, %c0_1] : memref<16x64xf32, #tpu.memory_space<vmem>>, vector<16x64xf32>
    %4 = arith.truncf %3 : vector<16x64xf32> to vector<16x64xbf16>
    %c0_2 = arith.constant 0 : index
    %c0_3 = arith.constant 0 : index
    %c0_4 = arith.constant 0 : index
    %5 = vector.load %arg3[%c0_2, %c0_3, %c0_4] : memref<1x64x192xbf16, #tpu.memory_space<vmem>>, vector<1x64x192xbf16>
    %6 = vector.shape_cast %5 : vector<1x64x192xbf16> to vector<64x192xbf16>
    %cst = arith.constant dense<0.000000e+00> : vector<16x192xf32>
    %7 = tpu.matmul %4, %6, %cst {dimension_numbers = #tpu.dot_dimension_numbers<[1], [0], [0], [1], [0, 0, 1, 1], [], []>} : vector<16x64xbf16>, vector<64x192xbf16>, vector<16x192xf32> -> vector<16x192xf32>
    %c0_5 = arith.constant 0 : index
    %c0_6 = arith.constant 0 : index
    %c0_7 = arith.constant 0 : index
    %8 = vector.load %arg4[%c0_5, %c0_6, %c0_7] : memref<1x1x192xf32, #tpu.memory_space<vmem>>, vector<1x1x192xf32>
    %9 = vector.shape_cast %8 : vector<1x1x192xf32> to vector<1x192xf32>
    %10 = vector.broadcast %9 : vector<1x192xf32> to vector<16x192xf32>
    %11 = arith.addf %7, %10 : vector<16x192xf32>
    %12 = vector.extract_strided_slice %11 {offsets = [0, 0], sizes = [16, 64], strides = [1, 1]} : vector<16x192xf32> to vector<16x64xf32>
    %13 = vector.extract_strided_slice %11 {offsets = [0, 64], sizes = [16, 64], strides = [1, 1]} : vector<16x192xf32> to vector<16x64xf32>
    %14 = vector.extract_strided_slice %11 {offsets = [0, 128], sizes = [16, 64], strides = [1, 1]} : vector<16x192xf32> to vector<16x64xf32>
    %c0_8 = arith.constant 0 : index
    %c0_9 = arith.constant 0 : index
    %c0_10 = arith.constant 0 : index
    %15 = vector.load %arg5[%c0_8, %c0_9, %c0_10] : memref<1x64x64xbf16, #tpu.memory_space<vmem>>, vector<1x64x64xbf16>
    %16 = vector.shape_cast %15 : vector<1x64x64xbf16> to vector<64x64xbf16>
    %cst_11 = arith.constant 0.000000e+00 : f32
    %17 = vector.broadcast %cst_11 : f32 to vector<8x64xf32>
    %18 = vector.extract_strided_slice %12 {offsets = [0, 0], sizes = [8, 4], strides = [1, 1]} : vector<16x64xf32> to vector<8x4xf32>
    %19 = arith.truncf %18 : vector<8x4xf32> to vector<8x4xbf16>
    %20 = vector.extract_strided_slice %13 {offsets = [0, 0], sizes = [8, 4], strides = [1, 1]} : vector<16x64xf32> to vector<8x4xf32>
    %21 = arith.truncf %20 : vector<8x4xf32> to vector<8x4xbf16>
    %22 = vector.extract_strided_slice %14 {offsets = [0, 0], sizes = [8, 4], strides = [1, 1]} : vector<16x64xf32> to vector<8x4xf32>
    %23 = arith.truncf %22 : vector<8x4xf32> to vector<8x4xbf16>
    %cst_12 = arith.constant dense<0.000000e+00> : vector<8x8xf32>
    %24 = tpu.matmul %19, %21, %cst_12 {dimension_numbers = #tpu.dot_dimension_numbers<[1], [1], [0], [0], [0, 0, 1, 0], [], []>} : vector<8x4xbf16>, vector<8x4xbf16>, vector<8x8xf32> -> vector<8x8xf32>
    %cst_13 = arith.constant 5.000000e-01 : f32
    %25 = vector.broadcast %cst_13 : f32 to vector<8x8xf32>
    %26 = arith.mulf %24, %25 : vector<8x8xf32>
    %cst_14 = arith.constant dense<0xFF800000> : vector<8xf32>
    %27 = vector.multi_reduction <maximumf>, %26, %cst_14 [1] : vector<8x8xf32> to vector<8xf32>
    %28 = vector.shape_cast %27 : vector<8xf32> to vector<8x1xf32>
    %29 = vector.broadcast %28 : vector<8x1xf32> to vector<8x8xf32>
    %30 = arith.subf %26, %29 : vector<8x8xf32>
    %31 = math.exp %30 : vector<8x8xf32>
    %cst_15 = arith.constant dense<0.000000e+00> : vector<8xf32>
    %32 = vector.multi_reduction <add>, %31, %cst_15 [1] : vector<8x8xf32> to vector<8xf32>
    %33 = vector.shape_cast %32 : vector<8xf32> to vector<8x1xf32>
    %34 = vector.broadcast %33 : vector<8x1xf32> to vector<8x8xf32>
    %35 = arith.divf %31, %34 : vector<8x8xf32>
    %36 = arith.truncf %35 : vector<8x8xf32> to vector<8x8xbf16>
    %cst_16 = arith.constant dense<0.000000e+00> : vector<8x4xf32>
    %37 = tpu.matmul %36, %23, %cst_16 {dimension_numbers = #tpu.dot_dimension_numbers<[1], [0], [0], [1], [0, 0, 1, 1], [], []>} : vector<8x8xbf16>, vector<8x4xbf16>, vector<8x4xf32> -> vector<8x4xf32>
    %38 = arith.truncf %37 : vector<8x4xf32> to vector<8x4xbf16>
    %39 = vector.extract_strided_slice %16 {offsets = [0, 0], sizes = [4, 64], strides = [1, 1]} : vector<64x64xbf16> to vector<4x64xbf16>
    %cst_17 = arith.constant dense<0.000000e+00> : vector<8x64xf32>
    %40 = tpu.matmul %38, %39, %cst_17 {dimension_numbers = #tpu.dot_dimension_numbers<[1], [0], [0], [1], [0, 0, 1, 1], [], []>} : vector<8x4xbf16>, vector<4x64xbf16>, vector<8x64xf32> -> vector<8x64xf32>
    %41 = arith.addf %17, %40 : vector<8x64xf32>
    %42 = vector.extract_strided_slice %12 {offsets = [0, 4], sizes = [8, 4], strides = [1, 1]} : vector<16x64xf32> to vector<8x4xf32>
    %43 = arith.truncf %42 : vector<8x4xf32> to vector<8x4xbf16>
    %44 = vector.extract_strided_slice %13 {offsets = [0, 4], sizes = [8, 4], strides = [1, 1]} : vector<16x64xf32> to vector<8x4xf32>
    %45 = arith.truncf %44 : vector<8x4xf32> to vector<8x4xbf16>
    %46 = vector.extract_strided_slice %14 {offsets = [0, 4], sizes = [8, 4], strides = [1, 1]} : vector<16x64xf32> to vector<8x4xf32>
    %47 = arith.truncf %46 : vector<8x4xf32> to vector<8x4xbf16>
    %cst_18 = arith.constant dense<0.000000e+00> : vector<8x8xf32>
    %48 = tpu.matmul %43, %45, %cst_18 {dimension_numbers = #tpu.dot_dimension_numbers<[1], [1], [0], [0], [0, 0, 1, 0], [], []>} : vector<8x4xbf16>, vector<8x4xbf16>, vector<8x8xf32> -> vector<8x8xf32>
    %cst_19 = arith.constant 5.000000e-01 : f32
    %49 = vector.broadcast %cst_19 : f32 to vector<8x8xf32>
    %50 = arith.mulf %48, %49 : vector<8x8xf32>
    %cst_20 = arith.constant dense<0xFF800000> : vector<8xf32>
    %51 = vector.multi_reduction <maximumf>, %50, %cst_20 [1] : vector<8x8xf32> to vector<8xf32>
    %52 = vector.shape_cast %51 : vector<8xf32> to vector<8x1xf32>
    %53 = vector.broadcast %52 : vector<8x1xf32> to vector<8x8xf32>
    %54 = arith.subf %50, %53 : vector<8x8xf32>
    %55 = math.exp %54 : vector<8x8xf32>
    %cst_21 = arith.constant dense<0.000000e+00> : vector<8xf32>
    %56 = vector.multi_reduction <add>, %55, %cst_21 [1] : vector<8x8xf32> to vector<8xf32>
    %57 = vector.shape_cast %56 : vector<8xf32> to vector<8x1xf32>
    %58 = vector.broadcast %57 : vector<8x1xf32> to vector<8x8xf32>
    %59 = arith.divf %55, %58 : vector<8x8xf32>
    %60 = arith.truncf %59 : vector<8x8xf32> to vector<8x8xbf16>
    %cst_22 = arith.constant dense<0.000000e+00> : vector<8x4xf32>
    %61 = tpu.matmul %60, %47, %cst_22 {dimension_numbers = #tpu.dot_dimension_numbers<[1], [0], [0], [1], [0, 0, 1, 1], [], []>} : vector<8x8xbf16>, vector<8x4xbf16>, vector<8x4xf32> -> vector<8x4xf32>
    %62 = arith.truncf %61 : vector<8x4xf32> to vector<8x4xbf16>
    %63 = vector.extract_strided_slice %16 {offsets = [4, 0], sizes = [4, 64], strides = [1, 1]} : vector<64x64xbf16> to vector<4x64xbf16>
    %cst_23 = arith.constant dense<0.000000e+00> : vector<8x64xf32>
    %64 = tpu.matmul %62, %63, %cst_23 {dimension_numbers = #tpu.dot_dimension_numbers<[1], [0], [0], [1], [0, 0, 1, 1], [], []>} : vector<8x4xbf16>, vector<4x64xbf16>, vector<8x64xf32> -> vector<8x64xf32>
    %65 = arith.addf %41, %64 : vector<8x64xf32>
    %66 = vector.extract_strided_slice %12 {offsets = [0, 8], sizes = [8, 4], strides = [1, 1]} : vector<16x64xf32> to vector<8x4xf32>
    %67 = arith.truncf %66 : vector<8x4xf32> to vector<8x4xbf16>
    %68 = vector.extract_strided_slice %13 {offsets = [0, 8], sizes = [8, 4], strides = [1, 1]} : vector<16x64xf32> to vector<8x4xf32>
    %69 = arith.truncf %68 : vector<8x4xf32> to vector<8x4xbf16>
    %70 = vector.extract_strided_slice %14 {offsets = [0, 8], sizes = [8, 4], strides = [1, 1]} : vector<16x64xf32> to vector<8x4xf32>
    %71 = arith.truncf %70 : vector<8x4xf32> to vector<8x4xbf16>
    %cst_24 = arith.constant dense<0.000000e+00> : vector<8x8xf32>
    %72 = tpu.matmul %67, %69, %cst_24 {dimension_numbers = #tpu.dot_dimension_numbers<[1], [1], [0], [0], [0, 0, 1, 0], [], []>} : vector<8x4xbf16>, vector<8x4xbf16>, vector<8x8xf32> -> vector<8x8xf32>
    %cst_25 = arith.constant 5.000000e-01 : f32
    %73 = vector.broadcast %cst_25 : f32 to vector<8x8xf32>
    %74 = arith.mulf %72, %73 : vector<8x8xf32>
    %cst_26 = arith.constant dense<0xFF800000> : vector<8xf32>
    %75 = vector.multi_reduction <maximumf>, %74, %cst_26 [1] : vector<8x8xf32> to vector<8xf32>
    %76 = vector.shape_cast %75 : vector<8xf32> to vector<8x1xf32>
    %77 = vector.broadcast %76 : vector<8x1xf32> to vector<8x8xf32>
    %78 = arith.subf %74, %77 : vector<8x8xf32>
    %79 = math.exp %78 : vector<8x8xf32>
    %cst_27 = arith.constant dense<0.000000e+00> : vector<8xf32>
    %80 = vector.multi_reduction <add>, %79, %cst_27 [1] : vector<8x8xf32> to vector<8xf32>
    %81 = vector.shape_cast %80 : vector<8xf32> to vector<8x1xf32>
    %82 = vector.broadcast %81 : vector<8x1xf32> to vector<8x8xf32>
    %83 = arith.divf %79, %82 : vector<8x8xf32>
    %84 = arith.truncf %83 : vector<8x8xf32> to vector<8x8xbf16>
    %cst_28 = arith.constant dense<0.000000e+00> : vector<8x4xf32>
    %85 = tpu.matmul %84, %71, %cst_28 {dimension_numbers = #tpu.dot_dimension_numbers<[1], [0], [0], [1], [0, 0, 1, 1], [], []>} : vector<8x8xbf16>, vector<8x4xbf16>, vector<8x4xf32> -> vector<8x4xf32>
    %86 = arith.truncf %85 : vector<8x4xf32> to vector<8x4xbf16>
    %87 = vector.extract_strided_slice %16 {offsets = [8, 0], sizes = [4, 64], strides = [1, 1]} : vector<64x64xbf16> to vector<4x64xbf16>
    %cst_29 = arith.constant dense<0.000000e+00> : vector<8x64xf32>
    %88 = tpu.matmul %86, %87, %cst_29 {dimension_numbers = #tpu.dot_dimension_numbers<[1], [0], [0], [1], [0, 0, 1, 1], [], []>} : vector<8x4xbf16>, vector<4x64xbf16>, vector<8x64xf32> -> vector<8x64xf32>
    %89 = arith.addf %65, %88 : vector<8x64xf32>
    %90 = vector.extract_strided_slice %12 {offsets = [0, 12], sizes = [8, 4], strides = [1, 1]} : vector<16x64xf32> to vector<8x4xf32>
    %91 = arith.truncf %90 : vector<8x4xf32> to vector<8x4xbf16>
    %92 = vector.extract_strided_slice %13 {offsets = [0, 12], sizes = [8, 4], strides = [1, 1]} : vector<16x64xf32> to vector<8x4xf32>
    %93 = arith.truncf %92 : vector<8x4xf32> to vector<8x4xbf16>
    %94 = vector.extract_strided_slice %14 {offsets = [0, 12], sizes = [8, 4], strides = [1, 1]} : vector<16x64xf32> to vector<8x4xf32>
    %95 = arith.truncf %94 : vector<8x4xf32> to vector<8x4xbf16>
    %cst_30 = arith.constant dense<0.000000e+00> : vector<8x8xf32>
    %96 = tpu.matmul %91, %93, %cst_30 {dimension_numbers = #tpu.dot_dimension_numbers<[1], [1], [0], [0], [0, 0, 1, 0], [], []>} : vector<8x4xbf16>, vector<8x4xbf16>, vector<8x8xf32> -> vector<8x8xf32>
    %cst_31 = arith.constant 5.000000e-01 : f32
    %97 = vector.broadcast %cst_31 : f32 to vector<8x8xf32>
    %98 = arith.mulf %96, %97 : vector<8x8xf32>
    %cst_32 = arith.constant dense<0xFF800000> : vector<8xf32>
    %99 = vector.multi_reduction <maximumf>, %98, %cst_32 [1] : vector<8x8xf32> to vector<8xf32>
    %100 = vector.shape_cast %99 : vector<8xf32> to vector<8x1xf32>
    %101 = vector.broadcast %100 : vector<8x1xf32> to vector<8x8xf32>
    %102 = arith.subf %98, %101 : vector<8x8xf32>
    %103 = math.exp %102 : vector<8x8xf32>
    %cst_33 = arith.constant dense<0.000000e+00> : vector<8xf32>
    %104 = vector.multi_reduction <add>, %103, %cst_33 [1] : vector<8x8xf32> to vector<8xf32>
    %105 = vector.shape_cast %104 : vector<8xf32> to vector<8x1xf32>
    %106 = vector.broadcast %105 : vector<8x1xf32> to vector<8x8xf32>
    %107 = arith.divf %103, %106 : vector<8x8xf32>
    %108 = arith.truncf %107 : vector<8x8xf32> to vector<8x8xbf16>
    %cst_34 = arith.constant dense<0.000000e+00> : vector<8x4xf32>
    %109 = tpu.matmul %108, %95, %cst_34 {dimension_numbers = #tpu.dot_dimension_numbers<[1], [0], [0], [1], [0, 0, 1, 1], [], []>} : vector<8x8xbf16>, vector<8x4xbf16>, vector<8x4xf32> -> vector<8x4xf32>
    %110 = arith.truncf %109 : vector<8x4xf32> to vector<8x4xbf16>
    %111 = vector.extract_strided_slice %16 {offsets = [12, 0], sizes = [4, 64], strides = [1, 1]} : vector<64x64xbf16> to vector<4x64xbf16>
    %cst_35 = arith.constant dense<0.000000e+00> : vector<8x64xf32>
    %112 = tpu.matmul %110, %111, %cst_35 {dimension_numbers = #tpu.dot_dimension_numbers<[1], [0], [0], [1], [0, 0, 1, 1], [], []>} : vector<8x4xbf16>, vector<4x64xbf16>, vector<8x64xf32> -> vector<8x64xf32>
    %113 = arith.addf %89, %112 : vector<8x64xf32>
    %114 = vector.extract_strided_slice %12 {offsets = [0, 16], sizes = [8, 4], strides = [1, 1]} : vector<16x64xf32> to vector<8x4xf32>
    %115 = arith.truncf %114 : vector<8x4xf32> to vector<8x4xbf16>
    %116 = vector.extract_strided_slice %13 {offsets = [0, 16], sizes = [8, 4], strides = [1, 1]} : vector<16x64xf32> to vector<8x4xf32>
    %117 = arith.truncf %116 : vector<8x4xf32> to vector<8x4xbf16>
    %118 = vector.extract_strided_slice %14 {offsets = [0, 16], sizes = [8, 4], strides = [1, 1]} : vector<16x64xf32> to vector<8x4xf32>
    %119 = arith.truncf %118 : vector<8x4xf32> to vector<8x4xbf16>
    %cst_36 = arith.constant dense<0.000000e+00> : vector<8x8xf32>
    %120 = tpu.matmul %115, %117, %cst_36 {dimension_numbers = #tpu.dot_dimension_numbers<[1], [1], [0], [0], [0, 0, 1, 0], [], []>} : vector<8x4xbf16>, vector<8x4xbf16>, vector<8x8xf32> -> vector<8x8xf32>
    %cst_37 = arith.constant 5.000000e-01 : f32
    %121 = vector.broadcast %cst_37 : f32 to vector<8x8xf32>
    %122 = arith.mulf %120, %121 : vector<8x8xf32>
    %cst_38 = arith.constant dense<0xFF800000> : vector<8xf32>
    %123 = vector.multi_reduction <maximumf>, %122, %cst_38 [1] : vector<8x8xf32> to vector<8xf32>
    %124 = vector.shape_cast %123 : vector<8xf32> to vector<8x1xf32>
    %125 = vector.broadcast %124 : vector<8x1xf32> to vector<8x8xf32>
    %126 = arith.subf %122, %125 : vector<8x8xf32>
    %127 = math.exp %126 : vector<8x8xf32>
    %cst_39 = arith.constant dense<0.000000e+00> : vector<8xf32>
    %128 = vector.multi_reduction <add>, %127, %cst_39 [1] : vector<8x8xf32> to vector<8xf32>
    %129 = vector.shape_cast %128 : vector<8xf32> to vector<8x1xf32>
    %130 = vector.broadcast %129 : vector<8x1xf32> to vector<8x8xf32>
    %131 = arith.divf %127, %130 : vector<8x8xf32>
    %132 = arith.truncf %131 : vector<8x8xf32> to vector<8x8xbf16>
    %cst_40 = arith.constant dense<0.000000e+00> : vector<8x4xf32>
    %133 = tpu.matmul %132, %119, %cst_40 {dimension_numbers = #tpu.dot_dimension_numbers<[1], [0], [0], [1], [0, 0, 1, 1], [], []>} : vector<8x8xbf16>, vector<8x4xbf16>, vector<8x4xf32> -> vector<8x4xf32>
    %134 = arith.truncf %133 : vector<8x4xf32> to vector<8x4xbf16>
    %135 = vector.extract_strided_slice %16 {offsets = [16, 0], sizes = [4, 64], strides = [1, 1]} : vector<64x64xbf16> to vector<4x64xbf16>
    %cst_41 = arith.constant dense<0.000000e+00> : vector<8x64xf32>
    %136 = tpu.matmul %134, %135, %cst_41 {dimension_numbers = #tpu.dot_dimension_numbers<[1], [0], [0], [1], [0, 0, 1, 1], [], []>} : vector<8x4xbf16>, vector<4x64xbf16>, vector<8x64xf32> -> vector<8x64xf32>
    %137 = arith.addf %113, %136 : vector<8x64xf32>
    %138 = vector.extract_strided_slice %12 {offsets = [0, 20], sizes = [8, 4], strides = [1, 1]} : vector<16x64xf32> to vector<8x4xf32>
    %139 = arith.truncf %138 : vector<8x4xf32> to vector<8x4xbf16>
    %140 = vector.extract_strided_slice %13 {offsets = [0, 20], sizes = [8, 4], strides = [1, 1]} : vector<16x64xf32> to vector<8x4xf32>
    %141 = arith.truncf %140 : vector<8x4xf32> to vector<8x4xbf16>
    %142 = vector.extract_strided_slice %14 {offsets = [0, 20], sizes = [8, 4], strides = [1, 1]} : vector<16x64xf32> to vector<8x4xf32>
    %143 = arith.truncf %142 : vector<8x4xf32> to vector<8x4xbf16>
    %cst_42 = arith.constant dense<0.000000e+00> : vector<8x8xf32>
    %144 = tpu.matmul %139, %141, %cst_42 {dimension_numbers = #tpu.dot_dimension_numbers<[1], [1], [0], [0], [0, 0, 1, 0], [], []>} : vector<8x4xbf16>, vector<8x4xbf16>, vector<8x8xf32> -> vector<8x8xf32>
    %cst_43 = arith.constant 5.000000e-01 : f32
    %145 = vector.broadcast %cst_43 : f32 to vector<8x8xf32>
    %146 = arith.mulf %144, %145 : vector<8x8xf32>
    %cst_44 = arith.constant dense<0xFF800000> : vector<8xf32>
    %147 = vector.multi_reduction <maximumf>, %146, %cst_44 [1] : vector<8x8xf32> to vector<8xf32>
    %148 = vector.shape_cast %147 : vector<8xf32> to vector<8x1xf32>
    %149 = vector.broadcast %148 : vector<8x1xf32> to vector<8x8xf32>
    %150 = arith.subf %146, %149 : vector<8x8xf32>
    %151 = math.exp %150 : vector<8x8xf32>
    %cst_45 = arith.constant dense<0.000000e+00> : vector<8xf32>
    %152 = vector.multi_reduction <add>, %151, %cst_45 [1] : vector<8x8xf32> to vector<8xf32>
    %153 = vector.shape_cast %152 : vector<8xf32> to vector<8x1xf32>
    %154 = vector.broadcast %153 : vector<8x1xf32> to vector<8x8xf32>
    %155 = arith.divf %151, %154 : vector<8x8xf32>
    %156 = arith.truncf %155 : vector<8x8xf32> to vector<8x8xbf16>
    %cst_46 = arith.constant dense<0.000000e+00> : vector<8x4xf32>
    %157 = tpu.matmul %156, %143, %cst_46 {dimension_numbers = #tpu.dot_dimension_numbers<[1], [0], [0], [1], [0, 0, 1, 1], [], []>} : vector<8x8xbf16>, vector<8x4xbf16>, vector<8x4xf32> -> vector<8x4xf32>
    %158 = arith.truncf %157 : vector<8x4xf32> to vector<8x4xbf16>
    %159 = vector.extract_strided_slice %16 {offsets = [20, 0], sizes = [4, 64], strides = [1, 1]} : vector<64x64xbf16> to vector<4x64xbf16>
    %cst_47 = arith.constant dense<0.000000e+00> : vector<8x64xf32>
    %160 = tpu.matmul %158, %159, %cst_47 {dimension_numbers = #tpu.dot_dimension_numbers<[1], [0], [0], [1], [0, 0, 1, 1], [], []>} : vector<8x4xbf16>, vector<4x64xbf16>, vector<8x64xf32> -> vector<8x64xf32>
    %161 = arith.addf %137, %160 : vector<8x64xf32>
    %162 = vector.extract_strided_slice %12 {offsets = [0, 24], sizes = [8, 4], strides = [1, 1]} : vector<16x64xf32> to vector<8x4xf32>
    %163 = arith.truncf %162 : vector<8x4xf32> to vector<8x4xbf16>
    %164 = vector.extract_strided_slice %13 {offsets = [0, 24], sizes = [8, 4], strides = [1, 1]} : vector<16x64xf32> to vector<8x4xf32>
    %165 = arith.truncf %164 : vector<8x4xf32> to vector<8x4xbf16>
    %166 = vector.extract_strided_slice %14 {offsets = [0, 24], sizes = [8, 4], strides = [1, 1]} : vector<16x64xf32> to vector<8x4xf32>
    %167 = arith.truncf %166 : vector<8x4xf32> to vector<8x4xbf16>
    %cst_48 = arith.constant dense<0.000000e+00> : vector<8x8xf32>
    %168 = tpu.matmul %163, %165, %cst_48 {dimension_numbers = #tpu.dot_dimension_numbers<[1], [1], [0], [0], [0, 0, 1, 0], [], []>} : vector<8x4xbf16>, vector<8x4xbf16>, vector<8x8xf32> -> vector<8x8xf32>
    %cst_49 = arith.constant 5.000000e-01 : f32
    %169 = vector.broadcast %cst_49 : f32 to vector<8x8xf32>
    %170 = arith.mulf %168, %169 : vector<8x8xf32>
    %cst_50 = arith.constant dense<0xFF800000> : vector<8xf32>
    %171 = vector.multi_reduction <maximumf>, %170, %cst_50 [1] : vector<8x8xf32> to vector<8xf32>
    %172 = vector.shape_cast %171 : vector<8xf32> to vector<8x1xf32>
    %173 = vector.broadcast %172 : vector<8x1xf32> to vector<8x8xf32>
    %174 = arith.subf %170, %173 : vector<8x8xf32>
    %175 = math.exp %174 : vector<8x8xf32>
    %cst_51 = arith.constant dense<0.000000e+00> : vector<8xf32>
    %176 = vector.multi_reduction <add>, %175, %cst_51 [1] : vector<8x8xf32> to vector<8xf32>
    %177 = vector.shape_cast %176 : vector<8xf32> to vector<8x1xf32>
    %178 = vector.broadcast %177 : vector<8x1xf32> to vector<8x8xf32>
    %179 = arith.divf %175, %178 : vector<8x8xf32>
    %180 = arith.truncf %179 : vector<8x8xf32> to vector<8x8xbf16>
    %cst_52 = arith.constant dense<0.000000e+00> : vector<8x4xf32>
    %181 = tpu.matmul %180, %167, %cst_52 {dimension_numbers = #tpu.dot_dimension_numbers<[1], [0], [0], [1], [0, 0, 1, 1], [], []>} : vector<8x8xbf16>, vector<8x4xbf16>, vector<8x4xf32> -> vector<8x4xf32>
    %182 = arith.truncf %181 : vector<8x4xf32> to vector<8x4xbf16>
    %183 = vector.extract_strided_slice %16 {offsets = [24, 0], sizes = [4, 64], strides = [1, 1]} : vector<64x64xbf16> to vector<4x64xbf16>
    %cst_53 = arith.constant dense<0.000000e+00> : vector<8x64xf32>
    %184 = tpu.matmul %182, %183, %cst_53 {dimension_numbers = #tpu.dot_dimension_numbers<[1], [0], [0], [1], [0, 0, 1, 1], [], []>} : vector<8x4xbf16>, vector<4x64xbf16>, vector<8x64xf32> -> vector<8x64xf32>
    %185 = arith.addf %161, %184 : vector<8x64xf32>
    %186 = vector.extract_strided_slice %12 {offsets = [0, 28], sizes = [8, 4], strides = [1, 1]} : vector<16x64xf32> to vector<8x4xf32>
    %187 = arith.truncf %186 : vector<8x4xf32> to vector<8x4xbf16>
    %188 = vector.extract_strided_slice %13 {offsets = [0, 28], sizes = [8, 4], strides = [1, 1]} : vector<16x64xf32> to vector<8x4xf32>
    %189 = arith.truncf %188 : vector<8x4xf32> to vector<8x4xbf16>
    %190 = vector.extract_strided_slice %14 {offsets = [0, 28], sizes = [8, 4], strides = [1, 1]} : vector<16x64xf32> to vector<8x4xf32>
    %191 = arith.truncf %190 : vector<8x4xf32> to vector<8x4xbf16>
    %cst_54 = arith.constant dense<0.000000e+00> : vector<8x8xf32>
    %192 = tpu.matmul %187, %189, %cst_54 {dimension_numbers = #tpu.dot_dimension_numbers<[1], [1], [0], [0], [0, 0, 1, 0], [], []>} : vector<8x4xbf16>, vector<8x4xbf16>, vector<8x8xf32> -> vector<8x8xf32>
    %cst_55 = arith.constant 5.000000e-01 : f32
    %193 = vector.broadcast %cst_55 : f32 to vector<8x8xf32>
    %194 = arith.mulf %192, %193 : vector<8x8xf32>
    %cst_56 = arith.constant dense<0xFF800000> : vector<8xf32>
    %195 = vector.multi_reduction <maximumf>, %194, %cst_56 [1] : vector<8x8xf32> to vector<8xf32>
    %196 = vector.shape_cast %195 : vector<8xf32> to vector<8x1xf32>
    %197 = vector.broadcast %196 : vector<8x1xf32> to vector<8x8xf32>
    %198 = arith.subf %194, %197 : vector<8x8xf32>
    %199 = math.exp %198 : vector<8x8xf32>
    %cst_57 = arith.constant dense<0.000000e+00> : vector<8xf32>
    %200 = vector.multi_reduction <add>, %199, %cst_57 [1] : vector<8x8xf32> to vector<8xf32>
    %201 = vector.shape_cast %200 : vector<8xf32> to vector<8x1xf32>
    %202 = vector.broadcast %201 : vector<8x1xf32> to vector<8x8xf32>
    %203 = arith.divf %199, %202 : vector<8x8xf32>
    %204 = arith.truncf %203 : vector<8x8xf32> to vector<8x8xbf16>
    %cst_58 = arith.constant dense<0.000000e+00> : vector<8x4xf32>
    %205 = tpu.matmul %204, %191, %cst_58 {dimension_numbers = #tpu.dot_dimension_numbers<[1], [0], [0], [1], [0, 0, 1, 1], [], []>} : vector<8x8xbf16>, vector<8x4xbf16>, vector<8x4xf32> -> vector<8x4xf32>
    %206 = arith.truncf %205 : vector<8x4xf32> to vector<8x4xbf16>
    %207 = vector.extract_strided_slice %16 {offsets = [28, 0], sizes = [4, 64], strides = [1, 1]} : vector<64x64xbf16> to vector<4x64xbf16>
    %cst_59 = arith.constant dense<0.000000e+00> : vector<8x64xf32>
    %208 = tpu.matmul %206, %207, %cst_59 {dimension_numbers = #tpu.dot_dimension_numbers<[1], [0], [0], [1], [0, 0, 1, 1], [], []>} : vector<8x4xbf16>, vector<4x64xbf16>, vector<8x64xf32> -> vector<8x64xf32>
    %209 = arith.addf %185, %208 : vector<8x64xf32>
    %210 = vector.extract_strided_slice %12 {offsets = [0, 32], sizes = [8, 4], strides = [1, 1]} : vector<16x64xf32> to vector<8x4xf32>
    %211 = arith.truncf %210 : vector<8x4xf32> to vector<8x4xbf16>
    %212 = vector.extract_strided_slice %13 {offsets = [0, 32], sizes = [8, 4], strides = [1, 1]} : vector<16x64xf32> to vector<8x4xf32>
    %213 = arith.truncf %212 : vector<8x4xf32> to vector<8x4xbf16>
    %214 = vector.extract_strided_slice %14 {offsets = [0, 32], sizes = [8, 4], strides = [1, 1]} : vector<16x64xf32> to vector<8x4xf32>
    %215 = arith.truncf %214 : vector<8x4xf32> to vector<8x4xbf16>
    %cst_60 = arith.constant dense<0.000000e+00> : vector<8x8xf32>
    %216 = tpu.matmul %211, %213, %cst_60 {dimension_numbers = #tpu.dot_dimension_numbers<[1], [1], [0], [0], [0, 0, 1, 0], [], []>} : vector<8x4xbf16>, vector<8x4xbf16>, vector<8x8xf32> -> vector<8x8xf32>
    %cst_61 = arith.constant 5.000000e-01 : f32
    %217 = vector.broadcast %cst_61 : f32 to vector<8x8xf32>
    %218 = arith.mulf %216, %217 : vector<8x8xf32>
    %cst_62 = arith.constant dense<0xFF800000> : vector<8xf32>
    %219 = vector.multi_reduction <maximumf>, %218, %cst_62 [1] : vector<8x8xf32> to vector<8xf32>
    %220 = vector.shape_cast %219 : vector<8xf32> to vector<8x1xf32>
    %221 = vector.broadcast %220 : vector<8x1xf32> to vector<8x8xf32>
    %222 = arith.subf %218, %221 : vector<8x8xf32>
    %223 = math.exp %222 : vector<8x8xf32>
    %cst_63 = arith.constant dense<0.000000e+00> : vector<8xf32>
    %224 = vector.multi_reduction <add>, %223, %cst_63 [1] : vector<8x8xf32> to vector<8xf32>
    %225 = vector.shape_cast %224 : vector<8xf32> to vector<8x1xf32>
    %226 = vector.broadcast %225 : vector<8x1xf32> to vector<8x8xf32>
    %227 = arith.divf %223, %226 : vector<8x8xf32>
    %228 = arith.truncf %227 : vector<8x8xf32> to vector<8x8xbf16>
    %cst_64 = arith.constant dense<0.000000e+00> : vector<8x4xf32>
    %229 = tpu.matmul %228, %215, %cst_64 {dimension_numbers = #tpu.dot_dimension_numbers<[1], [0], [0], [1], [0, 0, 1, 1], [], []>} : vector<8x8xbf16>, vector<8x4xbf16>, vector<8x4xf32> -> vector<8x4xf32>
    %230 = arith.truncf %229 : vector<8x4xf32> to vector<8x4xbf16>
    %231 = vector.extract_strided_slice %16 {offsets = [32, 0], sizes = [4, 64], strides = [1, 1]} : vector<64x64xbf16> to vector<4x64xbf16>
    %cst_65 = arith.constant dense<0.000000e+00> : vector<8x64xf32>
    %232 = tpu.matmul %230, %231, %cst_65 {dimension_numbers = #tpu.dot_dimension_numbers<[1], [0], [0], [1], [0, 0, 1, 1], [], []>} : vector<8x4xbf16>, vector<4x64xbf16>, vector<8x64xf32> -> vector<8x64xf32>
    %233 = arith.addf %209, %232 : vector<8x64xf32>
    %234 = vector.extract_strided_slice %12 {offsets = [0, 36], sizes = [8, 4], strides = [1, 1]} : vector<16x64xf32> to vector<8x4xf32>
    %235 = arith.truncf %234 : vector<8x4xf32> to vector<8x4xbf16>
    %236 = vector.extract_strided_slice %13 {offsets = [0, 36], sizes = [8, 4], strides = [1, 1]} : vector<16x64xf32> to vector<8x4xf32>
    %237 = arith.truncf %236 : vector<8x4xf32> to vector<8x4xbf16>
    %238 = vector.extract_strided_slice %14 {offsets = [0, 36], sizes = [8, 4], strides = [1, 1]} : vector<16x64xf32> to vector<8x4xf32>
    %239 = arith.truncf %238 : vector<8x4xf32> to vector<8x4xbf16>
    %cst_66 = arith.constant dense<0.000000e+00> : vector<8x8xf32>
    %240 = tpu.matmul %235, %237, %cst_66 {dimension_numbers = #tpu.dot_dimension_numbers<[1], [1], [0], [0], [0, 0, 1, 0], [], []>} : vector<8x4xbf16>, vector<8x4xbf16>, vector<8x8xf32> -> vector<8x8xf32>
    %cst_67 = arith.constant 5.000000e-01 : f32
    %241 = vector.broadcast %cst_67 : f32 to vector<8x8xf32>
    %242 = arith.mulf %240, %241 : vector<8x8xf32>
    %cst_68 = arith.constant dense<0xFF800000> : vector<8xf32>
    %243 = vector.multi_reduction <maximumf>, %242, %cst_68 [1] : vector<8x8xf32> to vector<8xf32>
    %244 = vector.shape_cast %243 : vector<8xf32> to vector<8x1xf32>
    %245 = vector.broadcast %244 : vector<8x1xf32> to vector<8x8xf32>
    %246 = arith.subf %242, %245 : vector<8x8xf32>
    %247 = math.exp %246 : vector<8x8xf32>
    %cst_69 = arith.constant dense<0.000000e+00> : vector<8xf32>
    %248 = vector.multi_reduction <add>, %247, %cst_69 [1] : vector<8x8xf32> to vector<8xf32>
    %249 = vector.shape_cast %248 : vector<8xf32> to vector<8x1xf32>
    %250 = vector.broadcast %249 : vector<8x1xf32> to vector<8x8xf32>
    %251 = arith.divf %247, %250 : vector<8x8xf32>
    %252 = arith.truncf %251 : vector<8x8xf32> to vector<8x8xbf16>
    %cst_70 = arith.constant dense<0.000000e+00> : vector<8x4xf32>
    %253 = tpu.matmul %252, %239, %cst_70 {dimension_numbers = #tpu.dot_dimension_numbers<[1], [0], [0], [1], [0, 0, 1, 1], [], []>} : vector<8x8xbf16>, vector<8x4xbf16>, vector<8x4xf32> -> vector<8x4xf32>
    %254 = arith.truncf %253 : vector<8x4xf32> to vector<8x4xbf16>
    %255 = vector.extract_strided_slice %16 {offsets = [36, 0], sizes = [4, 64], strides = [1, 1]} : vector<64x64xbf16> to vector<4x64xbf16>
    %cst_71 = arith.constant dense<0.000000e+00> : vector<8x64xf32>
    %256 = tpu.matmul %254, %255, %cst_71 {dimension_numbers = #tpu.dot_dimension_numbers<[1], [0], [0], [1], [0, 0, 1, 1], [], []>} : vector<8x4xbf16>, vector<4x64xbf16>, vector<8x64xf32> -> vector<8x64xf32>
    %257 = arith.addf %233, %256 : vector<8x64xf32>
    %258 = vector.extract_strided_slice %12 {offsets = [0, 40], sizes = [8, 4], strides = [1, 1]} : vector<16x64xf32> to vector<8x4xf32>
    %259 = arith.truncf %258 : vector<8x4xf32> to vector<8x4xbf16>
    %260 = vector.extract_strided_slice %13 {offsets = [0, 40], sizes = [8, 4], strides = [1, 1]} : vector<16x64xf32> to vector<8x4xf32>
    %261 = arith.truncf %260 : vector<8x4xf32> to vector<8x4xbf16>
    %262 = vector.extract_strided_slice %14 {offsets = [0, 40], sizes = [8, 4], strides = [1, 1]} : vector<16x64xf32> to vector<8x4xf32>
    %263 = arith.truncf %262 : vector<8x4xf32> to vector<8x4xbf16>
    %cst_72 = arith.constant dense<0.000000e+00> : vector<8x8xf32>
    %264 = tpu.matmul %259, %261, %cst_72 {dimension_numbers = #tpu.dot_dimension_numbers<[1], [1], [0], [0], [0, 0, 1, 0], [], []>} : vector<8x4xbf16>, vector<8x4xbf16>, vector<8x8xf32> -> vector<8x8xf32>
    %cst_73 = arith.constant 5.000000e-01 : f32
    %265 = vector.broadcast %cst_73 : f32 to vector<8x8xf32>
    %266 = arith.mulf %264, %265 : vector<8x8xf32>
    %cst_74 = arith.constant dense<0xFF800000> : vector<8xf32>
    %267 = vector.multi_reduction <maximumf>, %266, %cst_74 [1] : vector<8x8xf32> to vector<8xf32>
    %268 = vector.shape_cast %267 : vector<8xf32> to vector<8x1xf32>
    %269 = vector.broadcast %268 : vector<8x1xf32> to vector<8x8xf32>
    %270 = arith.subf %266, %269 : vector<8x8xf32>
    %271 = math.exp %270 : vector<8x8xf32>
    %cst_75 = arith.constant dense<0.000000e+00> : vector<8xf32>
    %272 = vector.multi_reduction <add>, %271, %cst_75 [1] : vector<8x8xf32> to vector<8xf32>
    %273 = vector.shape_cast %272 : vector<8xf32> to vector<8x1xf32>
    %274 = vector.broadcast %273 : vector<8x1xf32> to vector<8x8xf32>
    %275 = arith.divf %271, %274 : vector<8x8xf32>
    %276 = arith.truncf %275 : vector<8x8xf32> to vector<8x8xbf16>
    %cst_76 = arith.constant dense<0.000000e+00> : vector<8x4xf32>
    %277 = tpu.matmul %276, %263, %cst_76 {dimension_numbers = #tpu.dot_dimension_numbers<[1], [0], [0], [1], [0, 0, 1, 1], [], []>} : vector<8x8xbf16>, vector<8x4xbf16>, vector<8x4xf32> -> vector<8x4xf32>
    %278 = arith.truncf %277 : vector<8x4xf32> to vector<8x4xbf16>
    %279 = vector.extract_strided_slice %16 {offsets = [40, 0], sizes = [4, 64], strides = [1, 1]} : vector<64x64xbf16> to vector<4x64xbf16>
    %cst_77 = arith.constant dense<0.000000e+00> : vector<8x64xf32>
    %280 = tpu.matmul %278, %279, %cst_77 {dimension_numbers = #tpu.dot_dimension_numbers<[1], [0], [0], [1], [0, 0, 1, 1], [], []>} : vector<8x4xbf16>, vector<4x64xbf16>, vector<8x64xf32> -> vector<8x64xf32>
    %281 = arith.addf %257, %280 : vector<8x64xf32>
    %282 = vector.extract_strided_slice %12 {offsets = [0, 44], sizes = [8, 4], strides = [1, 1]} : vector<16x64xf32> to vector<8x4xf32>
    %283 = arith.truncf %282 : vector<8x4xf32> to vector<8x4xbf16>
    %284 = vector.extract_strided_slice %13 {offsets = [0, 44], sizes = [8, 4], strides = [1, 1]} : vector<16x64xf32> to vector<8x4xf32>
    %285 = arith.truncf %284 : vector<8x4xf32> to vector<8x4xbf16>
    %286 = vector.extract_strided_slice %14 {offsets = [0, 44], sizes = [8, 4], strides = [1, 1]} : vector<16x64xf32> to vector<8x4xf32>
    %287 = arith.truncf %286 : vector<8x4xf32> to vector<8x4xbf16>
    %cst_78 = arith.constant dense<0.000000e+00> : vector<8x8xf32>
    %288 = tpu.matmul %283, %285, %cst_78 {dimension_numbers = #tpu.dot_dimension_numbers<[1], [1], [0], [0], [0, 0, 1, 0], [], []>} : vector<8x4xbf16>, vector<8x4xbf16>, vector<8x8xf32> -> vector<8x8xf32>
    %cst_79 = arith.constant 5.000000e-01 : f32
    %289 = vector.broadcast %cst_79 : f32 to vector<8x8xf32>
    %290 = arith.mulf %288, %289 : vector<8x8xf32>
    %cst_80 = arith.constant dense<0xFF800000> : vector<8xf32>
    %291 = vector.multi_reduction <maximumf>, %290, %cst_80 [1] : vector<8x8xf32> to vector<8xf32>
    %292 = vector.shape_cast %291 : vector<8xf32> to vector<8x1xf32>
    %293 = vector.broadcast %292 : vector<8x1xf32> to vector<8x8xf32>
    %294 = arith.subf %290, %293 : vector<8x8xf32>
    %295 = math.exp %294 : vector<8x8xf32>
    %cst_81 = arith.constant dense<0.000000e+00> : vector<8xf32>
    %296 = vector.multi_reduction <add>, %295, %cst_81 [1] : vector<8x8xf32> to vector<8xf32>
    %297 = vector.shape_cast %296 : vector<8xf32> to vector<8x1xf32>
    %298 = vector.broadcast %297 : vector<8x1xf32> to vector<8x8xf32>
    %299 = arith.divf %295, %298 : vector<8x8xf32>
    %300 = arith.truncf %299 : vector<8x8xf32> to vector<8x8xbf16>
    %cst_82 = arith.constant dense<0.000000e+00> : vector<8x4xf32>
    %301 = tpu.matmul %300, %287, %cst_82 {dimension_numbers = #tpu.dot_dimension_numbers<[1], [0], [0], [1], [0, 0, 1, 1], [], []>} : vector<8x8xbf16>, vector<8x4xbf16>, vector<8x4xf32> -> vector<8x4xf32>
    %302 = arith.truncf %301 : vector<8x4xf32> to vector<8x4xbf16>
    %303 = vector.extract_strided_slice %16 {offsets = [44, 0], sizes = [4, 64], strides = [1, 1]} : vector<64x64xbf16> to vector<4x64xbf16>
    %cst_83 = arith.constant dense<0.000000e+00> : vector<8x64xf32>
    %304 = tpu.matmul %302, %303, %cst_83 {dimension_numbers = #tpu.dot_dimension_numbers<[1], [0], [0], [1], [0, 0, 1, 1], [], []>} : vector<8x4xbf16>, vector<4x64xbf16>, vector<8x64xf32> -> vector<8x64xf32>
    %305 = arith.addf %281, %304 : vector<8x64xf32>
    %306 = vector.extract_strided_slice %12 {offsets = [0, 48], sizes = [8, 4], strides = [1, 1]} : vector<16x64xf32> to vector<8x4xf32>
    %307 = arith.truncf %306 : vector<8x4xf32> to vector<8x4xbf16>
    %308 = vector.extract_strided_slice %13 {offsets = [0, 48], sizes = [8, 4], strides = [1, 1]} : vector<16x64xf32> to vector<8x4xf32>
    %309 = arith.truncf %308 : vector<8x4xf32> to vector<8x4xbf16>
    %310 = vector.extract_strided_slice %14 {offsets = [0, 48], sizes = [8, 4], strides = [1, 1]} : vector<16x64xf32> to vector<8x4xf32>
    %311 = arith.truncf %310 : vector<8x4xf32> to vector<8x4xbf16>
    %cst_84 = arith.constant dense<0.000000e+00> : vector<8x8xf32>
    %312 = tpu.matmul %307, %309, %cst_84 {dimension_numbers = #tpu.dot_dimension_numbers<[1], [1], [0], [0], [0, 0, 1, 0], [], []>} : vector<8x4xbf16>, vector<8x4xbf16>, vector<8x8xf32> -> vector<8x8xf32>
    %cst_85 = arith.constant 5.000000e-01 : f32
    %313 = vector.broadcast %cst_85 : f32 to vector<8x8xf32>
    %314 = arith.mulf %312, %313 : vector<8x8xf32>
    %cst_86 = arith.constant dense<0xFF800000> : vector<8xf32>
    %315 = vector.multi_reduction <maximumf>, %314, %cst_86 [1] : vector<8x8xf32> to vector<8xf32>
    %316 = vector.shape_cast %315 : vector<8xf32> to vector<8x1xf32>
    %317 = vector.broadcast %316 : vector<8x1xf32> to vector<8x8xf32>
    %318 = arith.subf %314, %317 : vector<8x8xf32>
    %319 = math.exp %318 : vector<8x8xf32>
    %cst_87 = arith.constant dense<0.000000e+00> : vector<8xf32>
    %320 = vector.multi_reduction <add>, %319, %cst_87 [1] : vector<8x8xf32> to vector<8xf32>
    %321 = vector.shape_cast %320 : vector<8xf32> to vector<8x1xf32>
    %322 = vector.broadcast %321 : vector<8x1xf32> to vector<8x8xf32>
    %323 = arith.divf %319, %322 : vector<8x8xf32>
    %324 = arith.truncf %323 : vector<8x8xf32> to vector<8x8xbf16>
    %cst_88 = arith.constant dense<0.000000e+00> : vector<8x4xf32>
    %325 = tpu.matmul %324, %311, %cst_88 {dimension_numbers = #tpu.dot_dimension_numbers<[1], [0], [0], [1], [0, 0, 1, 1], [], []>} : vector<8x8xbf16>, vector<8x4xbf16>, vector<8x4xf32> -> vector<8x4xf32>
    %326 = arith.truncf %325 : vector<8x4xf32> to vector<8x4xbf16>
    %327 = vector.extract_strided_slice %16 {offsets = [48, 0], sizes = [4, 64], strides = [1, 1]} : vector<64x64xbf16> to vector<4x64xbf16>
    %cst_89 = arith.constant dense<0.000000e+00> : vector<8x64xf32>
    %328 = tpu.matmul %326, %327, %cst_89 {dimension_numbers = #tpu.dot_dimension_numbers<[1], [0], [0], [1], [0, 0, 1, 1], [], []>} : vector<8x4xbf16>, vector<4x64xbf16>, vector<8x64xf32> -> vector<8x64xf32>
    %329 = arith.addf %305, %328 : vector<8x64xf32>
    %330 = vector.extract_strided_slice %12 {offsets = [0, 52], sizes = [8, 4], strides = [1, 1]} : vector<16x64xf32> to vector<8x4xf32>
    %331 = arith.truncf %330 : vector<8x4xf32> to vector<8x4xbf16>
    %332 = vector.extract_strided_slice %13 {offsets = [0, 52], sizes = [8, 4], strides = [1, 1]} : vector<16x64xf32> to vector<8x4xf32>
    %333 = arith.truncf %332 : vector<8x4xf32> to vector<8x4xbf16>
    %334 = vector.extract_strided_slice %14 {offsets = [0, 52], sizes = [8, 4], strides = [1, 1]} : vector<16x64xf32> to vector<8x4xf32>
    %335 = arith.truncf %334 : vector<8x4xf32> to vector<8x4xbf16>
    %cst_90 = arith.constant dense<0.000000e+00> : vector<8x8xf32>
    %336 = tpu.matmul %331, %333, %cst_90 {dimension_numbers = #tpu.dot_dimension_numbers<[1], [1], [0], [0], [0, 0, 1, 0], [], []>} : vector<8x4xbf16>, vector<8x4xbf16>, vector<8x8xf32> -> vector<8x8xf32>
    %cst_91 = arith.constant 5.000000e-01 : f32
    %337 = vector.broadcast %cst_91 : f32 to vector<8x8xf32>
    %338 = arith.mulf %336, %337 : vector<8x8xf32>
    %cst_92 = arith.constant dense<0xFF800000> : vector<8xf32>
    %339 = vector.multi_reduction <maximumf>, %338, %cst_92 [1] : vector<8x8xf32> to vector<8xf32>
    %340 = vector.shape_cast %339 : vector<8xf32> to vector<8x1xf32>
    %341 = vector.broadcast %340 : vector<8x1xf32> to vector<8x8xf32>
    %342 = arith.subf %338, %341 : vector<8x8xf32>
    %343 = math.exp %342 : vector<8x8xf32>
    %cst_93 = arith.constant dense<0.000000e+00> : vector<8xf32>
    %344 = vector.multi_reduction <add>, %343, %cst_93 [1] : vector<8x8xf32> to vector<8xf32>
    %345 = vector.shape_cast %344 : vector<8xf32> to vector<8x1xf32>
    %346 = vector.broadcast %345 : vector<8x1xf32> to vector<8x8xf32>
    %347 = arith.divf %343, %346 : vector<8x8xf32>
    %348 = arith.truncf %347 : vector<8x8xf32> to vector<8x8xbf16>
    %cst_94 = arith.constant dense<0.000000e+00> : vector<8x4xf32>
    %349 = tpu.matmul %348, %335, %cst_94 {dimension_numbers = #tpu.dot_dimension_numbers<[1], [0], [0], [1], [0, 0, 1, 1], [], []>} : vector<8x8xbf16>, vector<8x4xbf16>, vector<8x4xf32> -> vector<8x4xf32>
    %350 = arith.truncf %349 : vector<8x4xf32> to vector<8x4xbf16>
    %351 = vector.extract_strided_slice %16 {offsets = [52, 0], sizes = [4, 64], strides = [1, 1]} : vector<64x64xbf16> to vector<4x64xbf16>
    %cst_95 = arith.constant dense<0.000000e+00> : vector<8x64xf32>
    %352 = tpu.matmul %350, %351, %cst_95 {dimension_numbers = #tpu.dot_dimension_numbers<[1], [0], [0], [1], [0, 0, 1, 1], [], []>} : vector<8x4xbf16>, vector<4x64xbf16>, vector<8x64xf32> -> vector<8x64xf32>
    %353 = arith.addf %329, %352 : vector<8x64xf32>
    %354 = vector.extract_strided_slice %12 {offsets = [0, 56], sizes = [8, 4], strides = [1, 1]} : vector<16x64xf32> to vector<8x4xf32>
    %355 = arith.truncf %354 : vector<8x4xf32> to vector<8x4xbf16>
    %356 = vector.extract_strided_slice %13 {offsets = [0, 56], sizes = [8, 4], strides = [1, 1]} : vector<16x64xf32> to vector<8x4xf32>
    %357 = arith.truncf %356 : vector<8x4xf32> to vector<8x4xbf16>
    %358 = vector.extract_strided_slice %14 {offsets = [0, 56], sizes = [8, 4], strides = [1, 1]} : vector<16x64xf32> to vector<8x4xf32>
    %359 = arith.truncf %358 : vector<8x4xf32> to vector<8x4xbf16>
    %cst_96 = arith.constant dense<0.000000e+00> : vector<8x8xf32>
    %360 = tpu.matmul %355, %357, %cst_96 {dimension_numbers = #tpu.dot_dimension_numbers<[1], [1], [0], [0], [0, 0, 1, 0], [], []>} : vector<8x4xbf16>, vector<8x4xbf16>, vector<8x8xf32> -> vector<8x8xf32>
    %cst_97 = arith.constant 5.000000e-01 : f32
    %361 = vector.broadcast %cst_97 : f32 to vector<8x8xf32>
    %362 = arith.mulf %360, %361 : vector<8x8xf32>
    %cst_98 = arith.constant dense<0xFF800000> : vector<8xf32>
    %363 = vector.multi_reduction <maximumf>, %362, %cst_98 [1] : vector<8x8xf32> to vector<8xf32>
    %364 = vector.shape_cast %363 : vector<8xf32> to vector<8x1xf32>
    %365 = vector.broadcast %364 : vector<8x1xf32> to vector<8x8xf32>
    %366 = arith.subf %362, %365 : vector<8x8xf32>
    %367 = math.exp %366 : vector<8x8xf32>
    %cst_99 = arith.constant dense<0.000000e+00> : vector<8xf32>
    %368 = vector.multi_reduction <add>, %367, %cst_99 [1] : vector<8x8xf32> to vector<8xf32>
    %369 = vector.shape_cast %368 : vector<8xf32> to vector<8x1xf32>
    %370 = vector.broadcast %369 : vector<8x1xf32> to vector<8x8xf32>
    %371 = arith.divf %367, %370 : vector<8x8xf32>
    %372 = arith.truncf %371 : vector<8x8xf32> to vector<8x8xbf16>
    %cst_100 = arith.constant dense<0.000000e+00> : vector<8x4xf32>
    %373 = tpu.matmul %372, %359, %cst_100 {dimension_numbers = #tpu.dot_dimension_numbers<[1], [0], [0], [1], [0, 0, 1, 1], [], []>} : vector<8x8xbf16>, vector<8x4xbf16>, vector<8x4xf32> -> vector<8x4xf32>
    %374 = arith.truncf %373 : vector<8x4xf32> to vector<8x4xbf16>
    %375 = vector.extract_strided_slice %16 {offsets = [56, 0], sizes = [4, 64], strides = [1, 1]} : vector<64x64xbf16> to vector<4x64xbf16>
    %cst_101 = arith.constant dense<0.000000e+00> : vector<8x64xf32>
    %376 = tpu.matmul %374, %375, %cst_101 {dimension_numbers = #tpu.dot_dimension_numbers<[1], [0], [0], [1], [0, 0, 1, 1], [], []>} : vector<8x4xbf16>, vector<4x64xbf16>, vector<8x64xf32> -> vector<8x64xf32>
    %377 = arith.addf %353, %376 : vector<8x64xf32>
    %378 = vector.extract_strided_slice %12 {offsets = [0, 60], sizes = [8, 4], strides = [1, 1]} : vector<16x64xf32> to vector<8x4xf32>
    %379 = arith.truncf %378 : vector<8x4xf32> to vector<8x4xbf16>
    %380 = vector.extract_strided_slice %13 {offsets = [0, 60], sizes = [8, 4], strides = [1, 1]} : vector<16x64xf32> to vector<8x4xf32>
    %381 = arith.truncf %380 : vector<8x4xf32> to vector<8x4xbf16>
    %382 = vector.extract_strided_slice %14 {offsets = [0, 60], sizes = [8, 4], strides = [1, 1]} : vector<16x64xf32> to vector<8x4xf32>
    %383 = arith.truncf %382 : vector<8x4xf32> to vector<8x4xbf16>
    %cst_102 = arith.constant dense<0.000000e+00> : vector<8x8xf32>
    %384 = tpu.matmul %379, %381, %cst_102 {dimension_numbers = #tpu.dot_dimension_numbers<[1], [1], [0], [0], [0, 0, 1, 0], [], []>} : vector<8x4xbf16>, vector<8x4xbf16>, vector<8x8xf32> -> vector<8x8xf32>
    %cst_103 = arith.constant 5.000000e-01 : f32
    %385 = vector.broadcast %cst_103 : f32 to vector<8x8xf32>
    %386 = arith.mulf %384, %385 : vector<8x8xf32>
    %cst_104 = arith.constant dense<0xFF800000> : vector<8xf32>
    %387 = vector.multi_reduction <maximumf>, %386, %cst_104 [1] : vector<8x8xf32> to vector<8xf32>
    %388 = vector.shape_cast %387 : vector<8xf32> to vector<8x1xf32>
    %389 = vector.broadcast %388 : vector<8x1xf32> to vector<8x8xf32>
    %390 = arith.subf %386, %389 : vector<8x8xf32>
    %391 = math.exp %390 : vector<8x8xf32>
    %cst_105 = arith.constant dense<0.000000e+00> : vector<8xf32>
    %392 = vector.multi_reduction <add>, %391, %cst_105 [1] : vector<8x8xf32> to vector<8xf32>
    %393 = vector.shape_cast %392 : vector<8xf32> to vector<8x1xf32>
    %394 = vector.broadcast %393 : vector<8x1xf32> to vector<8x8xf32>
    %395 = arith.divf %391, %394 : vector<8x8xf32>
    %396 = arith.truncf %395 : vector<8x8xf32> to vector<8x8xbf16>
    %cst_106 = arith.constant dense<0.000000e+00> : vector<8x4xf32>
    %397 = tpu.matmul %396, %383, %cst_106 {dimension_numbers = #tpu.dot_dimension_numbers<[1], [0], [0], [1], [0, 0, 1, 1], [], []>} : vector<8x8xbf16>, vector<8x4xbf16>, vector<8x4xf32> -> vector<8x4xf32>
    %398 = arith.truncf %397 : vector<8x4xf32> to vector<8x4xbf16>
    %399 = vector.extract_strided_slice %16 {offsets = [60, 0], sizes = [4, 64], strides = [1, 1]} : vector<64x64xbf16> to vector<4x64xbf16>
    %cst_107 = arith.constant dense<0.000000e+00> : vector<8x64xf32>
    %400 = tpu.matmul %398, %399, %cst_107 {dimension_numbers = #tpu.dot_dimension_numbers<[1], [0], [0], [1], [0, 0, 1, 1], [], []>} : vector<8x4xbf16>, vector<4x64xbf16>, vector<8x64xf32> -> vector<8x64xf32>
    %401 = arith.addf %377, %400 : vector<8x64xf32>
    %cst_108 = arith.constant 0.000000e+00 : f32
    %402 = vector.broadcast %cst_108 : f32 to vector<8x64xf32>
    %403 = vector.extract_strided_slice %12 {offsets = [8, 0], sizes = [8, 4], strides = [1, 1]} : vector<16x64xf32> to vector<8x4xf32>
    %404 = arith.truncf %403 : vector<8x4xf32> to vector<8x4xbf16>
    %405 = vector.extract_strided_slice %13 {offsets = [8, 0], sizes = [8, 4], strides = [1, 1]} : vector<16x64xf32> to vector<8x4xf32>
    %406 = arith.truncf %405 : vector<8x4xf32> to vector<8x4xbf16>
    %407 = vector.extract_strided_slice %14 {offsets = [8, 0], sizes = [8, 4], strides = [1, 1]} : vector<16x64xf32> to vector<8x4xf32>
    %408 = arith.truncf %407 : vector<8x4xf32> to vector<8x4xbf16>
    %cst_109 = arith.constant dense<0.000000e+00> : vector<8x8xf32>
    %409 = tpu.matmul %404, %406, %cst_109 {dimension_numbers = #tpu.dot_dimension_numbers<[1], [1], [0], [0], [0, 0, 1, 0], [], []>} : vector<8x4xbf16>, vector<8x4xbf16>, vector<8x8xf32> -> vector<8x8xf32>
    %cst_110 = arith.constant 5.000000e-01 : f32
    %410 = vector.broadcast %cst_110 : f32 to vector<8x8xf32>
    %411 = arith.mulf %409, %410 : vector<8x8xf32>
    %cst_111 = arith.constant dense<0xFF800000> : vector<8xf32>
    %412 = vector.multi_reduction <maximumf>, %411, %cst_111 [1] : vector<8x8xf32> to vector<8xf32>
    %413 = vector.shape_cast %412 : vector<8xf32> to vector<8x1xf32>
    %414 = vector.broadcast %413 : vector<8x1xf32> to vector<8x8xf32>
    %415 = arith.subf %411, %414 : vector<8x8xf32>
    %416 = math.exp %415 : vector<8x8xf32>
    %cst_112 = arith.constant dense<0.000000e+00> : vector<8xf32>
    %417 = vector.multi_reduction <add>, %416, %cst_112 [1] : vector<8x8xf32> to vector<8xf32>
    %418 = vector.shape_cast %417 : vector<8xf32> to vector<8x1xf32>
    %419 = vector.broadcast %418 : vector<8x1xf32> to vector<8x8xf32>
    %420 = arith.divf %416, %419 : vector<8x8xf32>
    %421 = arith.truncf %420 : vector<8x8xf32> to vector<8x8xbf16>
    %cst_113 = arith.constant dense<0.000000e+00> : vector<8x4xf32>
    %422 = tpu.matmul %421, %408, %cst_113 {dimension_numbers = #tpu.dot_dimension_numbers<[1], [0], [0], [1], [0, 0, 1, 1], [], []>} : vector<8x8xbf16>, vector<8x4xbf16>, vector<8x4xf32> -> vector<8x4xf32>
    %423 = arith.truncf %422 : vector<8x4xf32> to vector<8x4xbf16>
    %424 = vector.extract_strided_slice %16 {offsets = [0, 0], sizes = [4, 64], strides = [1, 1]} : vector<64x64xbf16> to vector<4x64xbf16>
    %cst_114 = arith.constant dense<0.000000e+00> : vector<8x64xf32>
    %425 = tpu.matmul %423, %424, %cst_114 {dimension_numbers = #tpu.dot_dimension_numbers<[1], [0], [0], [1], [0, 0, 1, 1], [], []>} : vector<8x4xbf16>, vector<4x64xbf16>, vector<8x64xf32> -> vector<8x64xf32>
    %426 = arith.addf %402, %425 : vector<8x64xf32>
    %427 = vector.extract_strided_slice %12 {offsets = [8, 4], sizes = [8, 4], strides = [1, 1]} : vector<16x64xf32> to vector<8x4xf32>
    %428 = arith.truncf %427 : vector<8x4xf32> to vector<8x4xbf16>
    %429 = vector.extract_strided_slice %13 {offsets = [8, 4], sizes = [8, 4], strides = [1, 1]} : vector<16x64xf32> to vector<8x4xf32>
    %430 = arith.truncf %429 : vector<8x4xf32> to vector<8x4xbf16>
    %431 = vector.extract_strided_slice %14 {offsets = [8, 4], sizes = [8, 4], strides = [1, 1]} : vector<16x64xf32> to vector<8x4xf32>
    %432 = arith.truncf %431 : vector<8x4xf32> to vector<8x4xbf16>
    %cst_115 = arith.constant dense<0.000000e+00> : vector<8x8xf32>
    %433 = tpu.matmul %428, %430, %cst_115 {dimension_numbers = #tpu.dot_dimension_numbers<[1], [1], [0], [0], [0, 0, 1, 0], [], []>} : vector<8x4xbf16>, vector<8x4xbf16>, vector<8x8xf32> -> vector<8x8xf32>
    %cst_116 = arith.constant 5.000000e-01 : f32
    %434 = vector.broadcast %cst_116 : f32 to vector<8x8xf32>
    %435 = arith.mulf %433, %434 : vector<8x8xf32>
    %cst_117 = arith.constant dense<0xFF800000> : vector<8xf32>
    %436 = vector.multi_reduction <maximumf>, %435, %cst_117 [1] : vector<8x8xf32> to vector<8xf32>
    %437 = vector.shape_cast %436 : vector<8xf32> to vector<8x1xf32>
    %438 = vector.broadcast %437 : vector<8x1xf32> to vector<8x8xf32>
    %439 = arith.subf %435, %438 : vector<8x8xf32>
    %440 = math.exp %439 : vector<8x8xf32>
    %cst_118 = arith.constant dense<0.000000e+00> : vector<8xf32>
    %441 = vector.multi_reduction <add>, %440, %cst_118 [1] : vector<8x8xf32> to vector<8xf32>
    %442 = vector.shape_cast %441 : vector<8xf32> to vector<8x1xf32>
    %443 = vector.broadcast %442 : vector<8x1xf32> to vector<8x8xf32>
    %444 = arith.divf %440, %443 : vector<8x8xf32>
    %445 = arith.truncf %444 : vector<8x8xf32> to vector<8x8xbf16>
    %cst_119 = arith.constant dense<0.000000e+00> : vector<8x4xf32>
    %446 = tpu.matmul %445, %432, %cst_119 {dimension_numbers = #tpu.dot_dimension_numbers<[1], [0], [0], [1], [0, 0, 1, 1], [], []>} : vector<8x8xbf16>, vector<8x4xbf16>, vector<8x4xf32> -> vector<8x4xf32>
    %447 = arith.truncf %446 : vector<8x4xf32> to vector<8x4xbf16>
    %448 = vector.extract_strided_slice %16 {offsets = [4, 0], sizes = [4, 64], strides = [1, 1]} : vector<64x64xbf16> to vector<4x64xbf16>
    %cst_120 = arith.constant dense<0.000000e+00> : vector<8x64xf32>
    %449 = tpu.matmul %447, %448, %cst_120 {dimension_numbers = #tpu.dot_dimension_numbers<[1], [0], [0], [1], [0, 0, 1, 1], [], []>} : vector<8x4xbf16>, vector<4x64xbf16>, vector<8x64xf32> -> vector<8x64xf32>
    %450 = arith.addf %426, %449 : vector<8x64xf32>
    %451 = vector.extract_strided_slice %12 {offsets = [8, 8], sizes = [8, 4], strides = [1, 1]} : vector<16x64xf32> to vector<8x4xf32>
    %452 = arith.truncf %451 : vector<8x4xf32> to vector<8x4xbf16>
    %453 = vector.extract_strided_slice %13 {offsets = [8, 8], sizes = [8, 4], strides = [1, 1]} : vector<16x64xf32> to vector<8x4xf32>
    %454 = arith.truncf %453 : vector<8x4xf32> to vector<8x4xbf16>
    %455 = vector.extract_strided_slice %14 {offsets = [8, 8], sizes = [8, 4], strides = [1, 1]} : vector<16x64xf32> to vector<8x4xf32>
    %456 = arith.truncf %455 : vector<8x4xf32> to vector<8x4xbf16>
    %cst_121 = arith.constant dense<0.000000e+00> : vector<8x8xf32>
    %457 = tpu.matmul %452, %454, %cst_121 {dimension_numbers = #tpu.dot_dimension_numbers<[1], [1], [0], [0], [0, 0, 1, 0], [], []>} : vector<8x4xbf16>, vector<8x4xbf16>, vector<8x8xf32> -> vector<8x8xf32>
    %cst_122 = arith.constant 5.000000e-01 : f32
    %458 = vector.broadcast %cst_122 : f32 to vector<8x8xf32>
    %459 = arith.mulf %457, %458 : vector<8x8xf32>
    %cst_123 = arith.constant dense<0xFF800000> : vector<8xf32>
    %460 = vector.multi_reduction <maximumf>, %459, %cst_123 [1] : vector<8x8xf32> to vector<8xf32>
    %461 = vector.shape_cast %460 : vector<8xf32> to vector<8x1xf32>
    %462 = vector.broadcast %461 : vector<8x1xf32> to vector<8x8xf32>
    %463 = arith.subf %459, %462 : vector<8x8xf32>
    %464 = math.exp %463 : vector<8x8xf32>
    %cst_124 = arith.constant dense<0.000000e+00> : vector<8xf32>
    %465 = vector.multi_reduction <add>, %464, %cst_124 [1] : vector<8x8xf32> to vector<8xf32>
    %466 = vector.shape_cast %465 : vector<8xf32> to vector<8x1xf32>
    %467 = vector.broadcast %466 : vector<8x1xf32> to vector<8x8xf32>
    %468 = arith.divf %464, %467 : vector<8x8xf32>
    %469 = arith.truncf %468 : vector<8x8xf32> to vector<8x8xbf16>
    %cst_125 = arith.constant dense<0.000000e+00> : vector<8x4xf32>
    %470 = tpu.matmul %469, %456, %cst_125 {dimension_numbers = #tpu.dot_dimension_numbers<[1], [0], [0], [1], [0, 0, 1, 1], [], []>} : vector<8x8xbf16>, vector<8x4xbf16>, vector<8x4xf32> -> vector<8x4xf32>
    %471 = arith.truncf %470 : vector<8x4xf32> to vector<8x4xbf16>
    %472 = vector.extract_strided_slice %16 {offsets = [8, 0], sizes = [4, 64], strides = [1, 1]} : vector<64x64xbf16> to vector<4x64xbf16>
    %cst_126 = arith.constant dense<0.000000e+00> : vector<8x64xf32>
    %473 = tpu.matmul %471, %472, %cst_126 {dimension_numbers = #tpu.dot_dimension_numbers<[1], [0], [0], [1], [0, 0, 1, 1], [], []>} : vector<8x4xbf16>, vector<4x64xbf16>, vector<8x64xf32> -> vector<8x64xf32>
    %474 = arith.addf %450, %473 : vector<8x64xf32>
    %475 = vector.extract_strided_slice %12 {offsets = [8, 12], sizes = [8, 4], strides = [1, 1]} : vector<16x64xf32> to vector<8x4xf32>
    %476 = arith.truncf %475 : vector<8x4xf32> to vector<8x4xbf16>
    %477 = vector.extract_strided_slice %13 {offsets = [8, 12], sizes = [8, 4], strides = [1, 1]} : vector<16x64xf32> to vector<8x4xf32>
    %478 = arith.truncf %477 : vector<8x4xf32> to vector<8x4xbf16>
    %479 = vector.extract_strided_slice %14 {offsets = [8, 12], sizes = [8, 4], strides = [1, 1]} : vector<16x64xf32> to vector<8x4xf32>
    %480 = arith.truncf %479 : vector<8x4xf32> to vector<8x4xbf16>
    %cst_127 = arith.constant dense<0.000000e+00> : vector<8x8xf32>
    %481 = tpu.matmul %476, %478, %cst_127 {dimension_numbers = #tpu.dot_dimension_numbers<[1], [1], [0], [0], [0, 0, 1, 0], [], []>} : vector<8x4xbf16>, vector<8x4xbf16>, vector<8x8xf32> -> vector<8x8xf32>
    %cst_128 = arith.constant 5.000000e-01 : f32
    %482 = vector.broadcast %cst_128 : f32 to vector<8x8xf32>
    %483 = arith.mulf %481, %482 : vector<8x8xf32>
    %cst_129 = arith.constant dense<0xFF800000> : vector<8xf32>
    %484 = vector.multi_reduction <maximumf>, %483, %cst_129 [1] : vector<8x8xf32> to vector<8xf32>
    %485 = vector.shape_cast %484 : vector<8xf32> to vector<8x1xf32>
    %486 = vector.broadcast %485 : vector<8x1xf32> to vector<8x8xf32>
    %487 = arith.subf %483, %486 : vector<8x8xf32>
    %488 = math.exp %487 : vector<8x8xf32>
    %cst_130 = arith.constant dense<0.000000e+00> : vector<8xf32>
    %489 = vector.multi_reduction <add>, %488, %cst_130 [1] : vector<8x8xf32> to vector<8xf32>
    %490 = vector.shape_cast %489 : vector<8xf32> to vector<8x1xf32>
    %491 = vector.broadcast %490 : vector<8x1xf32> to vector<8x8xf32>
    %492 = arith.divf %488, %491 : vector<8x8xf32>
    %493 = arith.truncf %492 : vector<8x8xf32> to vector<8x8xbf16>
    %cst_131 = arith.constant dense<0.000000e+00> : vector<8x4xf32>
    %494 = tpu.matmul %493, %480, %cst_131 {dimension_numbers = #tpu.dot_dimension_numbers<[1], [0], [0], [1], [0, 0, 1, 1], [], []>} : vector<8x8xbf16>, vector<8x4xbf16>, vector<8x4xf32> -> vector<8x4xf32>
    %495 = arith.truncf %494 : vector<8x4xf32> to vector<8x4xbf16>
    %496 = vector.extract_strided_slice %16 {offsets = [12, 0], sizes = [4, 64], strides = [1, 1]} : vector<64x64xbf16> to vector<4x64xbf16>
    %cst_132 = arith.constant dense<0.000000e+00> : vector<8x64xf32>
    %497 = tpu.matmul %495, %496, %cst_132 {dimension_numbers = #tpu.dot_dimension_numbers<[1], [0], [0], [1], [0, 0, 1, 1], [], []>} : vector<8x4xbf16>, vector<4x64xbf16>, vector<8x64xf32> -> vector<8x64xf32>
    %498 = arith.addf %474, %497 : vector<8x64xf32>
    %499 = vector.extract_strided_slice %12 {offsets = [8, 16], sizes = [8, 4], strides = [1, 1]} : vector<16x64xf32> to vector<8x4xf32>
    %500 = arith.truncf %499 : vector<8x4xf32> to vector<8x4xbf16>
    %501 = vector.extract_strided_slice %13 {offsets = [8, 16], sizes = [8, 4], strides = [1, 1]} : vector<16x64xf32> to vector<8x4xf32>
    %502 = arith.truncf %501 : vector<8x4xf32> to vector<8x4xbf16>
    %503 = vector.extract_strided_slice %14 {offsets = [8, 16], sizes = [8, 4], strides = [1, 1]} : vector<16x64xf32> to vector<8x4xf32>
    %504 = arith.truncf %503 : vector<8x4xf32> to vector<8x4xbf16>
    %cst_133 = arith.constant dense<0.000000e+00> : vector<8x8xf32>
    %505 = tpu.matmul %500, %502, %cst_133 {dimension_numbers = #tpu.dot_dimension_numbers<[1], [1], [0], [0], [0, 0, 1, 0], [], []>} : vector<8x4xbf16>, vector<8x4xbf16>, vector<8x8xf32> -> vector<8x8xf32>
    %cst_134 = arith.constant 5.000000e-01 : f32
    %506 = vector.broadcast %cst_134 : f32 to vector<8x8xf32>
    %507 = arith.mulf %505, %506 : vector<8x8xf32>
    %cst_135 = arith.constant dense<0xFF800000> : vector<8xf32>
    %508 = vector.multi_reduction <maximumf>, %507, %cst_135 [1] : vector<8x8xf32> to vector<8xf32>
    %509 = vector.shape_cast %508 : vector<8xf32> to vector<8x1xf32>
    %510 = vector.broadcast %509 : vector<8x1xf32> to vector<8x8xf32>
    %511 = arith.subf %507, %510 : vector<8x8xf32>
    %512 = math.exp %511 : vector<8x8xf32>
    %cst_136 = arith.constant dense<0.000000e+00> : vector<8xf32>
    %513 = vector.multi_reduction <add>, %512, %cst_136 [1] : vector<8x8xf32> to vector<8xf32>
    %514 = vector.shape_cast %513 : vector<8xf32> to vector<8x1xf32>
    %515 = vector.broadcast %514 : vector<8x1xf32> to vector<8x8xf32>
    %516 = arith.divf %512, %515 : vector<8x8xf32>
    %517 = arith.truncf %516 : vector<8x8xf32> to vector<8x8xbf16>
    %cst_137 = arith.constant dense<0.000000e+00> : vector<8x4xf32>
    %518 = tpu.matmul %517, %504, %cst_137 {dimension_numbers = #tpu.dot_dimension_numbers<[1], [0], [0], [1], [0, 0, 1, 1], [], []>} : vector<8x8xbf16>, vector<8x4xbf16>, vector<8x4xf32> -> vector<8x4xf32>
    %519 = arith.truncf %518 : vector<8x4xf32> to vector<8x4xbf16>
    %520 = vector.extract_strided_slice %16 {offsets = [16, 0], sizes = [4, 64], strides = [1, 1]} : vector<64x64xbf16> to vector<4x64xbf16>
    %cst_138 = arith.constant dense<0.000000e+00> : vector<8x64xf32>
    %521 = tpu.matmul %519, %520, %cst_138 {dimension_numbers = #tpu.dot_dimension_numbers<[1], [0], [0], [1], [0, 0, 1, 1], [], []>} : vector<8x4xbf16>, vector<4x64xbf16>, vector<8x64xf32> -> vector<8x64xf32>
    %522 = arith.addf %498, %521 : vector<8x64xf32>
    %523 = vector.extract_strided_slice %12 {offsets = [8, 20], sizes = [8, 4], strides = [1, 1]} : vector<16x64xf32> to vector<8x4xf32>
    %524 = arith.truncf %523 : vector<8x4xf32> to vector<8x4xbf16>
    %525 = vector.extract_strided_slice %13 {offsets = [8, 20], sizes = [8, 4], strides = [1, 1]} : vector<16x64xf32> to vector<8x4xf32>
    %526 = arith.truncf %525 : vector<8x4xf32> to vector<8x4xbf16>
    %527 = vector.extract_strided_slice %14 {offsets = [8, 20], sizes = [8, 4], strides = [1, 1]} : vector<16x64xf32> to vector<8x4xf32>
    %528 = arith.truncf %527 : vector<8x4xf32> to vector<8x4xbf16>
    %cst_139 = arith.constant dense<0.000000e+00> : vector<8x8xf32>
    %529 = tpu.matmul %524, %526, %cst_139 {dimension_numbers = #tpu.dot_dimension_numbers<[1], [1], [0], [0], [0, 0, 1, 0], [], []>} : vector<8x4xbf16>, vector<8x4xbf16>, vector<8x8xf32> -> vector<8x8xf32>
    %cst_140 = arith.constant 5.000000e-01 : f32
    %530 = vector.broadcast %cst_140 : f32 to vector<8x8xf32>
    %531 = arith.mulf %529, %530 : vector<8x8xf32>
    %cst_141 = arith.constant dense<0xFF800000> : vector<8xf32>
    %532 = vector.multi_reduction <maximumf>, %531, %cst_141 [1] : vector<8x8xf32> to vector<8xf32>
    %533 = vector.shape_cast %532 : vector<8xf32> to vector<8x1xf32>
    %534 = vector.broadcast %533 : vector<8x1xf32> to vector<8x8xf32>
    %535 = arith.subf %531, %534 : vector<8x8xf32>
    %536 = math.exp %535 : vector<8x8xf32>
    %cst_142 = arith.constant dense<0.000000e+00> : vector<8xf32>
    %537 = vector.multi_reduction <add>, %536, %cst_142 [1] : vector<8x8xf32> to vector<8xf32>
    %538 = vector.shape_cast %537 : vector<8xf32> to vector<8x1xf32>
    %539 = vector.broadcast %538 : vector<8x1xf32> to vector<8x8xf32>
    %540 = arith.divf %536, %539 : vector<8x8xf32>
    %541 = arith.truncf %540 : vector<8x8xf32> to vector<8x8xbf16>
    %cst_143 = arith.constant dense<0.000000e+00> : vector<8x4xf32>
    %542 = tpu.matmul %541, %528, %cst_143 {dimension_numbers = #tpu.dot_dimension_numbers<[1], [0], [0], [1], [0, 0, 1, 1], [], []>} : vector<8x8xbf16>, vector<8x4xbf16>, vector<8x4xf32> -> vector<8x4xf32>
    %543 = arith.truncf %542 : vector<8x4xf32> to vector<8x4xbf16>
    %544 = vector.extract_strided_slice %16 {offsets = [20, 0], sizes = [4, 64], strides = [1, 1]} : vector<64x64xbf16> to vector<4x64xbf16>
    %cst_144 = arith.constant dense<0.000000e+00> : vector<8x64xf32>
    %545 = tpu.matmul %543, %544, %cst_144 {dimension_numbers = #tpu.dot_dimension_numbers<[1], [0], [0], [1], [0, 0, 1, 1], [], []>} : vector<8x4xbf16>, vector<4x64xbf16>, vector<8x64xf32> -> vector<8x64xf32>
    %546 = arith.addf %522, %545 : vector<8x64xf32>
    %547 = vector.extract_strided_slice %12 {offsets = [8, 24], sizes = [8, 4], strides = [1, 1]} : vector<16x64xf32> to vector<8x4xf32>
    %548 = arith.truncf %547 : vector<8x4xf32> to vector<8x4xbf16>
    %549 = vector.extract_strided_slice %13 {offsets = [8, 24], sizes = [8, 4], strides = [1, 1]} : vector<16x64xf32> to vector<8x4xf32>
    %550 = arith.truncf %549 : vector<8x4xf32> to vector<8x4xbf16>
    %551 = vector.extract_strided_slice %14 {offsets = [8, 24], sizes = [8, 4], strides = [1, 1]} : vector<16x64xf32> to vector<8x4xf32>
    %552 = arith.truncf %551 : vector<8x4xf32> to vector<8x4xbf16>
    %cst_145 = arith.constant dense<0.000000e+00> : vector<8x8xf32>
    %553 = tpu.matmul %548, %550, %cst_145 {dimension_numbers = #tpu.dot_dimension_numbers<[1], [1], [0], [0], [0, 0, 1, 0], [], []>} : vector<8x4xbf16>, vector<8x4xbf16>, vector<8x8xf32> -> vector<8x8xf32>
    %cst_146 = arith.constant 5.000000e-01 : f32
    %554 = vector.broadcast %cst_146 : f32 to vector<8x8xf32>
    %555 = arith.mulf %553, %554 : vector<8x8xf32>
    %cst_147 = arith.constant dense<0xFF800000> : vector<8xf32>
    %556 = vector.multi_reduction <maximumf>, %555, %cst_147 [1] : vector<8x8xf32> to vector<8xf32>
    %557 = vector.shape_cast %556 : vector<8xf32> to vector<8x1xf32>
    %558 = vector.broadcast %557 : vector<8x1xf32> to vector<8x8xf32>
    %559 = arith.subf %555, %558 : vector<8x8xf32>
    %560 = math.exp %559 : vector<8x8xf32>
    %cst_148 = arith.constant dense<0.000000e+00> : vector<8xf32>
    %561 = vector.multi_reduction <add>, %560, %cst_148 [1] : vector<8x8xf32> to vector<8xf32>
    %562 = vector.shape_cast %561 : vector<8xf32> to vector<8x1xf32>
    %563 = vector.broadcast %562 : vector<8x1xf32> to vector<8x8xf32>
    %564 = arith.divf %560, %563 : vector<8x8xf32>
    %565 = arith.truncf %564 : vector<8x8xf32> to vector<8x8xbf16>
    %cst_149 = arith.constant dense<0.000000e+00> : vector<8x4xf32>
    %566 = tpu.matmul %565, %552, %cst_149 {dimension_numbers = #tpu.dot_dimension_numbers<[1], [0], [0], [1], [0, 0, 1, 1], [], []>} : vector<8x8xbf16>, vector<8x4xbf16>, vector<8x4xf32> -> vector<8x4xf32>
    %567 = arith.truncf %566 : vector<8x4xf32> to vector<8x4xbf16>
    %568 = vector.extract_strided_slice %16 {offsets = [24, 0], sizes = [4, 64], strides = [1, 1]} : vector<64x64xbf16> to vector<4x64xbf16>
    %cst_150 = arith.constant dense<0.000000e+00> : vector<8x64xf32>
    %569 = tpu.matmul %567, %568, %cst_150 {dimension_numbers = #tpu.dot_dimension_numbers<[1], [0], [0], [1], [0, 0, 1, 1], [], []>} : vector<8x4xbf16>, vector<4x64xbf16>, vector<8x64xf32> -> vector<8x64xf32>
    %570 = arith.addf %546, %569 : vector<8x64xf32>
    %571 = vector.extract_strided_slice %12 {offsets = [8, 28], sizes = [8, 4], strides = [1, 1]} : vector<16x64xf32> to vector<8x4xf32>
    %572 = arith.truncf %571 : vector<8x4xf32> to vector<8x4xbf16>
    %573 = vector.extract_strided_slice %13 {offsets = [8, 28], sizes = [8, 4], strides = [1, 1]} : vector<16x64xf32> to vector<8x4xf32>
    %574 = arith.truncf %573 : vector<8x4xf32> to vector<8x4xbf16>
    %575 = vector.extract_strided_slice %14 {offsets = [8, 28], sizes = [8, 4], strides = [1, 1]} : vector<16x64xf32> to vector<8x4xf32>
    %576 = arith.truncf %575 : vector<8x4xf32> to vector<8x4xbf16>
    %cst_151 = arith.constant dense<0.000000e+00> : vector<8x8xf32>
    %577 = tpu.matmul %572, %574, %cst_151 {dimension_numbers = #tpu.dot_dimension_numbers<[1], [1], [0], [0], [0, 0, 1, 0], [], []>} : vector<8x4xbf16>, vector<8x4xbf16>, vector<8x8xf32> -> vector<8x8xf32>
    %cst_152 = arith.constant 5.000000e-01 : f32
    %578 = vector.broadcast %cst_152 : f32 to vector<8x8xf32>
    %579 = arith.mulf %577, %578 : vector<8x8xf32>
    %cst_153 = arith.constant dense<0xFF800000> : vector<8xf32>
    %580 = vector.multi_reduction <maximumf>, %579, %cst_153 [1] : vector<8x8xf32> to vector<8xf32>
    %581 = vector.shape_cast %580 : vector<8xf32> to vector<8x1xf32>
    %582 = vector.broadcast %581 : vector<8x1xf32> to vector<8x8xf32>
    %583 = arith.subf %579, %582 : vector<8x8xf32>
    %584 = math.exp %583 : vector<8x8xf32>
    %cst_154 = arith.constant dense<0.000000e+00> : vector<8xf32>
    %585 = vector.multi_reduction <add>, %584, %cst_154 [1] : vector<8x8xf32> to vector<8xf32>
    %586 = vector.shape_cast %585 : vector<8xf32> to vector<8x1xf32>
    %587 = vector.broadcast %586 : vector<8x1xf32> to vector<8x8xf32>
    %588 = arith.divf %584, %587 : vector<8x8xf32>
    %589 = arith.truncf %588 : vector<8x8xf32> to vector<8x8xbf16>
    %cst_155 = arith.constant dense<0.000000e+00> : vector<8x4xf32>
    %590 = tpu.matmul %589, %576, %cst_155 {dimension_numbers = #tpu.dot_dimension_numbers<[1], [0], [0], [1], [0, 0, 1, 1], [], []>} : vector<8x8xbf16>, vector<8x4xbf16>, vector<8x4xf32> -> vector<8x4xf32>
    %591 = arith.truncf %590 : vector<8x4xf32> to vector<8x4xbf16>
    %592 = vector.extract_strided_slice %16 {offsets = [28, 0], sizes = [4, 64], strides = [1, 1]} : vector<64x64xbf16> to vector<4x64xbf16>
    %cst_156 = arith.constant dense<0.000000e+00> : vector<8x64xf32>
    %593 = tpu.matmul %591, %592, %cst_156 {dimension_numbers = #tpu.dot_dimension_numbers<[1], [0], [0], [1], [0, 0, 1, 1], [], []>} : vector<8x4xbf16>, vector<4x64xbf16>, vector<8x64xf32> -> vector<8x64xf32>
    %594 = arith.addf %570, %593 : vector<8x64xf32>
    %595 = vector.extract_strided_slice %12 {offsets = [8, 32], sizes = [8, 4], strides = [1, 1]} : vector<16x64xf32> to vector<8x4xf32>
    %596 = arith.truncf %595 : vector<8x4xf32> to vector<8x4xbf16>
    %597 = vector.extract_strided_slice %13 {offsets = [8, 32], sizes = [8, 4], strides = [1, 1]} : vector<16x64xf32> to vector<8x4xf32>
    %598 = arith.truncf %597 : vector<8x4xf32> to vector<8x4xbf16>
    %599 = vector.extract_strided_slice %14 {offsets = [8, 32], sizes = [8, 4], strides = [1, 1]} : vector<16x64xf32> to vector<8x4xf32>
    %600 = arith.truncf %599 : vector<8x4xf32> to vector<8x4xbf16>
    %cst_157 = arith.constant dense<0.000000e+00> : vector<8x8xf32>
    %601 = tpu.matmul %596, %598, %cst_157 {dimension_numbers = #tpu.dot_dimension_numbers<[1], [1], [0], [0], [0, 0, 1, 0], [], []>} : vector<8x4xbf16>, vector<8x4xbf16>, vector<8x8xf32> -> vector<8x8xf32>
    %cst_158 = arith.constant 5.000000e-01 : f32
    %602 = vector.broadcast %cst_158 : f32 to vector<8x8xf32>
    %603 = arith.mulf %601, %602 : vector<8x8xf32>
    %cst_159 = arith.constant dense<0xFF800000> : vector<8xf32>
    %604 = vector.multi_reduction <maximumf>, %603, %cst_159 [1] : vector<8x8xf32> to vector<8xf32>
    %605 = vector.shape_cast %604 : vector<8xf32> to vector<8x1xf32>
    %606 = vector.broadcast %605 : vector<8x1xf32> to vector<8x8xf32>
    %607 = arith.subf %603, %606 : vector<8x8xf32>
    %608 = math.exp %607 : vector<8x8xf32>
    %cst_160 = arith.constant dense<0.000000e+00> : vector<8xf32>
    %609 = vector.multi_reduction <add>, %608, %cst_160 [1] : vector<8x8xf32> to vector<8xf32>
    %610 = vector.shape_cast %609 : vector<8xf32> to vector<8x1xf32>
    %611 = vector.broadcast %610 : vector<8x1xf32> to vector<8x8xf32>
    %612 = arith.divf %608, %611 : vector<8x8xf32>
    %613 = arith.truncf %612 : vector<8x8xf32> to vector<8x8xbf16>
    %cst_161 = arith.constant dense<0.000000e+00> : vector<8x4xf32>
    %614 = tpu.matmul %613, %600, %cst_161 {dimension_numbers = #tpu.dot_dimension_numbers<[1], [0], [0], [1], [0, 0, 1, 1], [], []>} : vector<8x8xbf16>, vector<8x4xbf16>, vector<8x4xf32> -> vector<8x4xf32>
    %615 = arith.truncf %614 : vector<8x4xf32> to vector<8x4xbf16>
    %616 = vector.extract_strided_slice %16 {offsets = [32, 0], sizes = [4, 64], strides = [1, 1]} : vector<64x64xbf16> to vector<4x64xbf16>
    %cst_162 = arith.constant dense<0.000000e+00> : vector<8x64xf32>
    %617 = tpu.matmul %615, %616, %cst_162 {dimension_numbers = #tpu.dot_dimension_numbers<[1], [0], [0], [1], [0, 0, 1, 1], [], []>} : vector<8x4xbf16>, vector<4x64xbf16>, vector<8x64xf32> -> vector<8x64xf32>
    %618 = arith.addf %594, %617 : vector<8x64xf32>
    %619 = vector.extract_strided_slice %12 {offsets = [8, 36], sizes = [8, 4], strides = [1, 1]} : vector<16x64xf32> to vector<8x4xf32>
    %620 = arith.truncf %619 : vector<8x4xf32> to vector<8x4xbf16>
    %621 = vector.extract_strided_slice %13 {offsets = [8, 36], sizes = [8, 4], strides = [1, 1]} : vector<16x64xf32> to vector<8x4xf32>
    %622 = arith.truncf %621 : vector<8x4xf32> to vector<8x4xbf16>
    %623 = vector.extract_strided_slice %14 {offsets = [8, 36], sizes = [8, 4], strides = [1, 1]} : vector<16x64xf32> to vector<8x4xf32>
    %624 = arith.truncf %623 : vector<8x4xf32> to vector<8x4xbf16>
    %cst_163 = arith.constant dense<0.000000e+00> : vector<8x8xf32>
    %625 = tpu.matmul %620, %622, %cst_163 {dimension_numbers = #tpu.dot_dimension_numbers<[1], [1], [0], [0], [0, 0, 1, 0], [], []>} : vector<8x4xbf16>, vector<8x4xbf16>, vector<8x8xf32> -> vector<8x8xf32>
    %cst_164 = arith.constant 5.000000e-01 : f32
    %626 = vector.broadcast %cst_164 : f32 to vector<8x8xf32>
    %627 = arith.mulf %625, %626 : vector<8x8xf32>
    %cst_165 = arith.constant dense<0xFF800000> : vector<8xf32>
    %628 = vector.multi_reduction <maximumf>, %627, %cst_165 [1] : vector<8x8xf32> to vector<8xf32>
    %629 = vector.shape_cast %628 : vector<8xf32> to vector<8x1xf32>
    %630 = vector.broadcast %629 : vector<8x1xf32> to vector<8x8xf32>
    %631 = arith.subf %627, %630 : vector<8x8xf32>
    %632 = math.exp %631 : vector<8x8xf32>
    %cst_166 = arith.constant dense<0.000000e+00> : vector<8xf32>
    %633 = vector.multi_reduction <add>, %632, %cst_166 [1] : vector<8x8xf32> to vector<8xf32>
    %634 = vector.shape_cast %633 : vector<8xf32> to vector<8x1xf32>
    %635 = vector.broadcast %634 : vector<8x1xf32> to vector<8x8xf32>
    %636 = arith.divf %632, %635 : vector<8x8xf32>
    %637 = arith.truncf %636 : vector<8x8xf32> to vector<8x8xbf16>
    %cst_167 = arith.constant dense<0.000000e+00> : vector<8x4xf32>
    %638 = tpu.matmul %637, %624, %cst_167 {dimension_numbers = #tpu.dot_dimension_numbers<[1], [0], [0], [1], [0, 0, 1, 1], [], []>} : vector<8x8xbf16>, vector<8x4xbf16>, vector<8x4xf32> -> vector<8x4xf32>
    %639 = arith.truncf %638 : vector<8x4xf32> to vector<8x4xbf16>
    %640 = vector.extract_strided_slice %16 {offsets = [36, 0], sizes = [4, 64], strides = [1, 1]} : vector<64x64xbf16> to vector<4x64xbf16>
    %cst_168 = arith.constant dense<0.000000e+00> : vector<8x64xf32>
    %641 = tpu.matmul %639, %640, %cst_168 {dimension_numbers = #tpu.dot_dimension_numbers<[1], [0], [0], [1], [0, 0, 1, 1], [], []>} : vector<8x4xbf16>, vector<4x64xbf16>, vector<8x64xf32> -> vector<8x64xf32>
    %642 = arith.addf %618, %641 : vector<8x64xf32>
    %643 = vector.extract_strided_slice %12 {offsets = [8, 40], sizes = [8, 4], strides = [1, 1]} : vector<16x64xf32> to vector<8x4xf32>
    %644 = arith.truncf %643 : vector<8x4xf32> to vector<8x4xbf16>
    %645 = vector.extract_strided_slice %13 {offsets = [8, 40], sizes = [8, 4], strides = [1, 1]} : vector<16x64xf32> to vector<8x4xf32>
    %646 = arith.truncf %645 : vector<8x4xf32> to vector<8x4xbf16>
    %647 = vector.extract_strided_slice %14 {offsets = [8, 40], sizes = [8, 4], strides = [1, 1]} : vector<16x64xf32> to vector<8x4xf32>
    %648 = arith.truncf %647 : vector<8x4xf32> to vector<8x4xbf16>
    %cst_169 = arith.constant dense<0.000000e+00> : vector<8x8xf32>
    %649 = tpu.matmul %644, %646, %cst_169 {dimension_numbers = #tpu.dot_dimension_numbers<[1], [1], [0], [0], [0, 0, 1, 0], [], []>} : vector<8x4xbf16>, vector<8x4xbf16>, vector<8x8xf32> -> vector<8x8xf32>
    %cst_170 = arith.constant 5.000000e-01 : f32
    %650 = vector.broadcast %cst_170 : f32 to vector<8x8xf32>
    %651 = arith.mulf %649, %650 : vector<8x8xf32>
    %cst_171 = arith.constant dense<0xFF800000> : vector<8xf32>
    %652 = vector.multi_reduction <maximumf>, %651, %cst_171 [1] : vector<8x8xf32> to vector<8xf32>
    %653 = vector.shape_cast %652 : vector<8xf32> to vector<8x1xf32>
    %654 = vector.broadcast %653 : vector<8x1xf32> to vector<8x8xf32>
    %655 = arith.subf %651, %654 : vector<8x8xf32>
    %656 = math.exp %655 : vector<8x8xf32>
    %cst_172 = arith.constant dense<0.000000e+00> : vector<8xf32>
    %657 = vector.multi_reduction <add>, %656, %cst_172 [1] : vector<8x8xf32> to vector<8xf32>
    %658 = vector.shape_cast %657 : vector<8xf32> to vector<8x1xf32>
    %659 = vector.broadcast %658 : vector<8x1xf32> to vector<8x8xf32>
    %660 = arith.divf %656, %659 : vector<8x8xf32>
    %661 = arith.truncf %660 : vector<8x8xf32> to vector<8x8xbf16>
    %cst_173 = arith.constant dense<0.000000e+00> : vector<8x4xf32>
    %662 = tpu.matmul %661, %648, %cst_173 {dimension_numbers = #tpu.dot_dimension_numbers<[1], [0], [0], [1], [0, 0, 1, 1], [], []>} : vector<8x8xbf16>, vector<8x4xbf16>, vector<8x4xf32> -> vector<8x4xf32>
    %663 = arith.truncf %662 : vector<8x4xf32> to vector<8x4xbf16>
    %664 = vector.extract_strided_slice %16 {offsets = [40, 0], sizes = [4, 64], strides = [1, 1]} : vector<64x64xbf16> to vector<4x64xbf16>
    %cst_174 = arith.constant dense<0.000000e+00> : vector<8x64xf32>
    %665 = tpu.matmul %663, %664, %cst_174 {dimension_numbers = #tpu.dot_dimension_numbers<[1], [0], [0], [1], [0, 0, 1, 1], [], []>} : vector<8x4xbf16>, vector<4x64xbf16>, vector<8x64xf32> -> vector<8x64xf32>
    %666 = arith.addf %642, %665 : vector<8x64xf32>
    %667 = vector.extract_strided_slice %12 {offsets = [8, 44], sizes = [8, 4], strides = [1, 1]} : vector<16x64xf32> to vector<8x4xf32>
    %668 = arith.truncf %667 : vector<8x4xf32> to vector<8x4xbf16>
    %669 = vector.extract_strided_slice %13 {offsets = [8, 44], sizes = [8, 4], strides = [1, 1]} : vector<16x64xf32> to vector<8x4xf32>
    %670 = arith.truncf %669 : vector<8x4xf32> to vector<8x4xbf16>
    %671 = vector.extract_strided_slice %14 {offsets = [8, 44], sizes = [8, 4], strides = [1, 1]} : vector<16x64xf32> to vector<8x4xf32>
    %672 = arith.truncf %671 : vector<8x4xf32> to vector<8x4xbf16>
    %cst_175 = arith.constant dense<0.000000e+00> : vector<8x8xf32>
    %673 = tpu.matmul %668, %670, %cst_175 {dimension_numbers = #tpu.dot_dimension_numbers<[1], [1], [0], [0], [0, 0, 1, 0], [], []>} : vector<8x4xbf16>, vector<8x4xbf16>, vector<8x8xf32> -> vector<8x8xf32>
    %cst_176 = arith.constant 5.000000e-01 : f32
    %674 = vector.broadcast %cst_176 : f32 to vector<8x8xf32>
    %675 = arith.mulf %673, %674 : vector<8x8xf32>
    %cst_177 = arith.constant dense<0xFF800000> : vector<8xf32>
    %676 = vector.multi_reduction <maximumf>, %675, %cst_177 [1] : vector<8x8xf32> to vector<8xf32>
    %677 = vector.shape_cast %676 : vector<8xf32> to vector<8x1xf32>
    %678 = vector.broadcast %677 : vector<8x1xf32> to vector<8x8xf32>
    %679 = arith.subf %675, %678 : vector<8x8xf32>
    %680 = math.exp %679 : vector<8x8xf32>
    %cst_178 = arith.constant dense<0.000000e+00> : vector<8xf32>
    %681 = vector.multi_reduction <add>, %680, %cst_178 [1] : vector<8x8xf32> to vector<8xf32>
    %682 = vector.shape_cast %681 : vector<8xf32> to vector<8x1xf32>
    %683 = vector.broadcast %682 : vector<8x1xf32> to vector<8x8xf32>
    %684 = arith.divf %680, %683 : vector<8x8xf32>
    %685 = arith.truncf %684 : vector<8x8xf32> to vector<8x8xbf16>
    %cst_179 = arith.constant dense<0.000000e+00> : vector<8x4xf32>
    %686 = tpu.matmul %685, %672, %cst_179 {dimension_numbers = #tpu.dot_dimension_numbers<[1], [0], [0], [1], [0, 0, 1, 1], [], []>} : vector<8x8xbf16>, vector<8x4xbf16>, vector<8x4xf32> -> vector<8x4xf32>
    %687 = arith.truncf %686 : vector<8x4xf32> to vector<8x4xbf16>
    %688 = vector.extract_strided_slice %16 {offsets = [44, 0], sizes = [4, 64], strides = [1, 1]} : vector<64x64xbf16> to vector<4x64xbf16>
    %cst_180 = arith.constant dense<0.000000e+00> : vector<8x64xf32>
    %689 = tpu.matmul %687, %688, %cst_180 {dimension_numbers = #tpu.dot_dimension_numbers<[1], [0], [0], [1], [0, 0, 1, 1], [], []>} : vector<8x4xbf16>, vector<4x64xbf16>, vector<8x64xf32> -> vector<8x64xf32>
    %690 = arith.addf %666, %689 : vector<8x64xf32>
    %691 = vector.extract_strided_slice %12 {offsets = [8, 48], sizes = [8, 4], strides = [1, 1]} : vector<16x64xf32> to vector<8x4xf32>
    %692 = arith.truncf %691 : vector<8x4xf32> to vector<8x4xbf16>
    %693 = vector.extract_strided_slice %13 {offsets = [8, 48], sizes = [8, 4], strides = [1, 1]} : vector<16x64xf32> to vector<8x4xf32>
    %694 = arith.truncf %693 : vector<8x4xf32> to vector<8x4xbf16>
    %695 = vector.extract_strided_slice %14 {offsets = [8, 48], sizes = [8, 4], strides = [1, 1]} : vector<16x64xf32> to vector<8x4xf32>
    %696 = arith.truncf %695 : vector<8x4xf32> to vector<8x4xbf16>
    %cst_181 = arith.constant dense<0.000000e+00> : vector<8x8xf32>
    %697 = tpu.matmul %692, %694, %cst_181 {dimension_numbers = #tpu.dot_dimension_numbers<[1], [1], [0], [0], [0, 0, 1, 0], [], []>} : vector<8x4xbf16>, vector<8x4xbf16>, vector<8x8xf32> -> vector<8x8xf32>
    %cst_182 = arith.constant 5.000000e-01 : f32
    %698 = vector.broadcast %cst_182 : f32 to vector<8x8xf32>
    %699 = arith.mulf %697, %698 : vector<8x8xf32>
    %cst_183 = arith.constant dense<0xFF800000> : vector<8xf32>
    %700 = vector.multi_reduction <maximumf>, %699, %cst_183 [1] : vector<8x8xf32> to vector<8xf32>
    %701 = vector.shape_cast %700 : vector<8xf32> to vector<8x1xf32>
    %702 = vector.broadcast %701 : vector<8x1xf32> to vector<8x8xf32>
    %703 = arith.subf %699, %702 : vector<8x8xf32>
    %704 = math.exp %703 : vector<8x8xf32>
    %cst_184 = arith.constant dense<0.000000e+00> : vector<8xf32>
    %705 = vector.multi_reduction <add>, %704, %cst_184 [1] : vector<8x8xf32> to vector<8xf32>
    %706 = vector.shape_cast %705 : vector<8xf32> to vector<8x1xf32>
    %707 = vector.broadcast %706 : vector<8x1xf32> to vector<8x8xf32>
    %708 = arith.divf %704, %707 : vector<8x8xf32>
    %709 = arith.truncf %708 : vector<8x8xf32> to vector<8x8xbf16>
    %cst_185 = arith.constant dense<0.000000e+00> : vector<8x4xf32>
    %710 = tpu.matmul %709, %696, %cst_185 {dimension_numbers = #tpu.dot_dimension_numbers<[1], [0], [0], [1], [0, 0, 1, 1], [], []>} : vector<8x8xbf16>, vector<8x4xbf16>, vector<8x4xf32> -> vector<8x4xf32>
    %711 = arith.truncf %710 : vector<8x4xf32> to vector<8x4xbf16>
    %712 = vector.extract_strided_slice %16 {offsets = [48, 0], sizes = [4, 64], strides = [1, 1]} : vector<64x64xbf16> to vector<4x64xbf16>
    %cst_186 = arith.constant dense<0.000000e+00> : vector<8x64xf32>
    %713 = tpu.matmul %711, %712, %cst_186 {dimension_numbers = #tpu.dot_dimension_numbers<[1], [0], [0], [1], [0, 0, 1, 1], [], []>} : vector<8x4xbf16>, vector<4x64xbf16>, vector<8x64xf32> -> vector<8x64xf32>
    %714 = arith.addf %690, %713 : vector<8x64xf32>
    %715 = vector.extract_strided_slice %12 {offsets = [8, 52], sizes = [8, 4], strides = [1, 1]} : vector<16x64xf32> to vector<8x4xf32>
    %716 = arith.truncf %715 : vector<8x4xf32> to vector<8x4xbf16>
    %717 = vector.extract_strided_slice %13 {offsets = [8, 52], sizes = [8, 4], strides = [1, 1]} : vector<16x64xf32> to vector<8x4xf32>
    %718 = arith.truncf %717 : vector<8x4xf32> to vector<8x4xbf16>
    %719 = vector.extract_strided_slice %14 {offsets = [8, 52], sizes = [8, 4], strides = [1, 1]} : vector<16x64xf32> to vector<8x4xf32>
    %720 = arith.truncf %719 : vector<8x4xf32> to vector<8x4xbf16>
    %cst_187 = arith.constant dense<0.000000e+00> : vector<8x8xf32>
    %721 = tpu.matmul %716, %718, %cst_187 {dimension_numbers = #tpu.dot_dimension_numbers<[1], [1], [0], [0], [0, 0, 1, 0], [], []>} : vector<8x4xbf16>, vector<8x4xbf16>, vector<8x8xf32> -> vector<8x8xf32>
    %cst_188 = arith.constant 5.000000e-01 : f32
    %722 = vector.broadcast %cst_188 : f32 to vector<8x8xf32>
    %723 = arith.mulf %721, %722 : vector<8x8xf32>
    %cst_189 = arith.constant dense<0xFF800000> : vector<8xf32>
    %724 = vector.multi_reduction <maximumf>, %723, %cst_189 [1] : vector<8x8xf32> to vector<8xf32>
    %725 = vector.shape_cast %724 : vector<8xf32> to vector<8x1xf32>
    %726 = vector.broadcast %725 : vector<8x1xf32> to vector<8x8xf32>
    %727 = arith.subf %723, %726 : vector<8x8xf32>
    %728 = math.exp %727 : vector<8x8xf32>
    %cst_190 = arith.constant dense<0.000000e+00> : vector<8xf32>
    %729 = vector.multi_reduction <add>, %728, %cst_190 [1] : vector<8x8xf32> to vector<8xf32>
    %730 = vector.shape_cast %729 : vector<8xf32> to vector<8x1xf32>
    %731 = vector.broadcast %730 : vector<8x1xf32> to vector<8x8xf32>
    %732 = arith.divf %728, %731 : vector<8x8xf32>
    %733 = arith.truncf %732 : vector<8x8xf32> to vector<8x8xbf16>
    %cst_191 = arith.constant dense<0.000000e+00> : vector<8x4xf32>
    %734 = tpu.matmul %733, %720, %cst_191 {dimension_numbers = #tpu.dot_dimension_numbers<[1], [0], [0], [1], [0, 0, 1, 1], [], []>} : vector<8x8xbf16>, vector<8x4xbf16>, vector<8x4xf32> -> vector<8x4xf32>
    %735 = arith.truncf %734 : vector<8x4xf32> to vector<8x4xbf16>
    %736 = vector.extract_strided_slice %16 {offsets = [52, 0], sizes = [4, 64], strides = [1, 1]} : vector<64x64xbf16> to vector<4x64xbf16>
    %cst_192 = arith.constant dense<0.000000e+00> : vector<8x64xf32>
    %737 = tpu.matmul %735, %736, %cst_192 {dimension_numbers = #tpu.dot_dimension_numbers<[1], [0], [0], [1], [0, 0, 1, 1], [], []>} : vector<8x4xbf16>, vector<4x64xbf16>, vector<8x64xf32> -> vector<8x64xf32>
    %738 = arith.addf %714, %737 : vector<8x64xf32>
    %739 = vector.extract_strided_slice %12 {offsets = [8, 56], sizes = [8, 4], strides = [1, 1]} : vector<16x64xf32> to vector<8x4xf32>
    %740 = arith.truncf %739 : vector<8x4xf32> to vector<8x4xbf16>
    %741 = vector.extract_strided_slice %13 {offsets = [8, 56], sizes = [8, 4], strides = [1, 1]} : vector<16x64xf32> to vector<8x4xf32>
    %742 = arith.truncf %741 : vector<8x4xf32> to vector<8x4xbf16>
    %743 = vector.extract_strided_slice %14 {offsets = [8, 56], sizes = [8, 4], strides = [1, 1]} : vector<16x64xf32> to vector<8x4xf32>
    %744 = arith.truncf %743 : vector<8x4xf32> to vector<8x4xbf16>
    %cst_193 = arith.constant dense<0.000000e+00> : vector<8x8xf32>
    %745 = tpu.matmul %740, %742, %cst_193 {dimension_numbers = #tpu.dot_dimension_numbers<[1], [1], [0], [0], [0, 0, 1, 0], [], []>} : vector<8x4xbf16>, vector<8x4xbf16>, vector<8x8xf32> -> vector<8x8xf32>
    %cst_194 = arith.constant 5.000000e-01 : f32
    %746 = vector.broadcast %cst_194 : f32 to vector<8x8xf32>
    %747 = arith.mulf %745, %746 : vector<8x8xf32>
    %cst_195 = arith.constant dense<0xFF800000> : vector<8xf32>
    %748 = vector.multi_reduction <maximumf>, %747, %cst_195 [1] : vector<8x8xf32> to vector<8xf32>
    %749 = vector.shape_cast %748 : vector<8xf32> to vector<8x1xf32>
    %750 = vector.broadcast %749 : vector<8x1xf32> to vector<8x8xf32>
    %751 = arith.subf %747, %750 : vector<8x8xf32>
    %752 = math.exp %751 : vector<8x8xf32>
    %cst_196 = arith.constant dense<0.000000e+00> : vector<8xf32>
    %753 = vector.multi_reduction <add>, %752, %cst_196 [1] : vector<8x8xf32> to vector<8xf32>
    %754 = vector.shape_cast %753 : vector<8xf32> to vector<8x1xf32>
    %755 = vector.broadcast %754 : vector<8x1xf32> to vector<8x8xf32>
    %756 = arith.divf %752, %755 : vector<8x8xf32>
    %757 = arith.truncf %756 : vector<8x8xf32> to vector<8x8xbf16>
    %cst_197 = arith.constant dense<0.000000e+00> : vector<8x4xf32>
    %758 = tpu.matmul %757, %744, %cst_197 {dimension_numbers = #tpu.dot_dimension_numbers<[1], [0], [0], [1], [0, 0, 1, 1], [], []>} : vector<8x8xbf16>, vector<8x4xbf16>, vector<8x4xf32> -> vector<8x4xf32>
    %759 = arith.truncf %758 : vector<8x4xf32> to vector<8x4xbf16>
    %760 = vector.extract_strided_slice %16 {offsets = [56, 0], sizes = [4, 64], strides = [1, 1]} : vector<64x64xbf16> to vector<4x64xbf16>
    %cst_198 = arith.constant dense<0.000000e+00> : vector<8x64xf32>
    %761 = tpu.matmul %759, %760, %cst_198 {dimension_numbers = #tpu.dot_dimension_numbers<[1], [0], [0], [1], [0, 0, 1, 1], [], []>} : vector<8x4xbf16>, vector<4x64xbf16>, vector<8x64xf32> -> vector<8x64xf32>
    %762 = arith.addf %738, %761 : vector<8x64xf32>
    %763 = vector.extract_strided_slice %12 {offsets = [8, 60], sizes = [8, 4], strides = [1, 1]} : vector<16x64xf32> to vector<8x4xf32>
    %764 = arith.truncf %763 : vector<8x4xf32> to vector<8x4xbf16>
    %765 = vector.extract_strided_slice %13 {offsets = [8, 60], sizes = [8, 4], strides = [1, 1]} : vector<16x64xf32> to vector<8x4xf32>
    %766 = arith.truncf %765 : vector<8x4xf32> to vector<8x4xbf16>
    %767 = vector.extract_strided_slice %14 {offsets = [8, 60], sizes = [8, 4], strides = [1, 1]} : vector<16x64xf32> to vector<8x4xf32>
    %768 = arith.truncf %767 : vector<8x4xf32> to vector<8x4xbf16>
    %cst_199 = arith.constant dense<0.000000e+00> : vector<8x8xf32>
    %769 = tpu.matmul %764, %766, %cst_199 {dimension_numbers = #tpu.dot_dimension_numbers<[1], [1], [0], [0], [0, 0, 1, 0], [], []>} : vector<8x4xbf16>, vector<8x4xbf16>, vector<8x8xf32> -> vector<8x8xf32>
    %cst_200 = arith.constant 5.000000e-01 : f32
    %770 = vector.broadcast %cst_200 : f32 to vector<8x8xf32>
    %771 = arith.mulf %769, %770 : vector<8x8xf32>
    %cst_201 = arith.constant dense<0xFF800000> : vector<8xf32>
    %772 = vector.multi_reduction <maximumf>, %771, %cst_201 [1] : vector<8x8xf32> to vector<8xf32>
    %773 = vector.shape_cast %772 : vector<8xf32> to vector<8x1xf32>
    %774 = vector.broadcast %773 : vector<8x1xf32> to vector<8x8xf32>
    %775 = arith.subf %771, %774 : vector<8x8xf32>
    %776 = math.exp %775 : vector<8x8xf32>
    %cst_202 = arith.constant dense<0.000000e+00> : vector<8xf32>
    %777 = vector.multi_reduction <add>, %776, %cst_202 [1] : vector<8x8xf32> to vector<8xf32>
    %778 = vector.shape_cast %777 : vector<8xf32> to vector<8x1xf32>
    %779 = vector.broadcast %778 : vector<8x1xf32> to vector<8x8xf32>
    %780 = arith.divf %776, %779 : vector<8x8xf32>
    %781 = arith.truncf %780 : vector<8x8xf32> to vector<8x8xbf16>
    %cst_203 = arith.constant dense<0.000000e+00> : vector<8x4xf32>
    %782 = tpu.matmul %781, %768, %cst_203 {dimension_numbers = #tpu.dot_dimension_numbers<[1], [0], [0], [1], [0, 0, 1, 1], [], []>} : vector<8x8xbf16>, vector<8x4xbf16>, vector<8x4xf32> -> vector<8x4xf32>
    %783 = arith.truncf %782 : vector<8x4xf32> to vector<8x4xbf16>
    %784 = vector.extract_strided_slice %16 {offsets = [60, 0], sizes = [4, 64], strides = [1, 1]} : vector<64x64xbf16> to vector<4x64xbf16>
    %cst_204 = arith.constant dense<0.000000e+00> : vector<8x64xf32>
    %785 = tpu.matmul %783, %784, %cst_204 {dimension_numbers = #tpu.dot_dimension_numbers<[1], [0], [0], [1], [0, 0, 1, 1], [], []>} : vector<8x4xbf16>, vector<4x64xbf16>, vector<8x64xf32> -> vector<8x64xf32>
    %786 = arith.addf %762, %785 : vector<8x64xf32>
    %787 = tpu.concatenate %401, %786 in 0 : vector<8x64xf32>, vector<8x64xf32> -> vector<16x64xf32>
    %c0_205 = arith.constant 0 : index
    %c0_206 = arith.constant 0 : index
    %c0_207 = arith.constant 0 : index
    %788 = vector.load %arg6[%c0_205, %c0_206, %c0_207] : memref<1x1x64xf32, #tpu.memory_space<vmem>>, vector<1x1x64xf32>
    %789 = vector.shape_cast %788 : vector<1x1x64xf32> to vector<1x64xf32>
    %790 = vector.broadcast %789 : vector<1x64xf32> to vector<16x64xf32>
    %791 = arith.addf %787, %790 : vector<16x64xf32>
    %792 = arith.addf %3, %791 : vector<16x64xf32>
    %c0_208 = arith.constant 0 : index
    %c0_209 = arith.constant 0 : index
    %c0_210 = arith.constant 0 : index
    %793 = vector.load %arg7[%c0_208, %c0_209, %c0_210] : memref<1x1x64xf32, #tpu.memory_space<vmem>>, vector<1x1x64xf32>
    %794 = vector.shape_cast %793 : vector<1x1x64xf32> to vector<1x64xf32>
    %c0_211 = arith.constant 0 : index
    %c0_212 = arith.constant 0 : index
    %c0_213 = arith.constant 0 : index
    %795 = vector.load %arg8[%c0_211, %c0_212, %c0_213] : memref<1x1x64xf32, #tpu.memory_space<vmem>>, vector<1x1x64xf32>
    %796 = vector.shape_cast %795 : vector<1x1x64xf32> to vector<1x64xf32>
    %cst_214 = arith.constant dense<0.000000e+00> : vector<16xf32>
    %797 = vector.multi_reduction <add>, %792, %cst_214 [1] : vector<16x64xf32> to vector<16xf32>
    %798 = vector.shape_cast %797 : vector<16xf32> to vector<16x1xf32>
    %cst_215 = arith.constant 6.400000e+01 : f32
    %799 = vector.broadcast %cst_215 : f32 to vector<16x1xf32>
    %800 = arith.divf %798, %799 : vector<16x1xf32>
    %801 = vector.broadcast %800 : vector<16x1xf32> to vector<16x64xf32>
    %802 = arith.subf %792, %801 : vector<16x64xf32>
    %803 = arith.mulf %802, %802 : vector<16x64xf32>
    %cst_216 = arith.constant dense<0.000000e+00> : vector<16xf32>
    %804 = vector.multi_reduction <add>, %803, %cst_216 [1] : vector<16x64xf32> to vector<16xf32>
    %805 = vector.shape_cast %804 : vector<16xf32> to vector<16x1xf32>
    %cst_217 = arith.constant 6.400000e+01 : f32
    %806 = vector.broadcast %cst_217 : f32 to vector<16x1xf32>
    %807 = arith.divf %805, %806 : vector<16x1xf32>
    %cst_218 = arith.constant 9.99999974E-6 : f32
    %808 = vector.broadcast %cst_218 : f32 to vector<16x1xf32>
    %809 = arith.addf %807, %808 : vector<16x1xf32>
    %810 = math.rsqrt %809 : vector<16x1xf32>
    %811 = vector.broadcast %810 : vector<16x1xf32> to vector<16x64xf32>
    %812 = arith.mulf %802, %811 : vector<16x64xf32>
    %813 = vector.broadcast %794 : vector<1x64xf32> to vector<16x64xf32>
    %814 = arith.mulf %812, %813 : vector<16x64xf32>
    %815 = vector.broadcast %796 : vector<1x64xf32> to vector<16x64xf32>
    %816 = arith.addf %814, %815 : vector<16x64xf32>
    %817 = arith.truncf %816 : vector<16x64xf32> to vector<16x64xbf16>
    %cst_219 = arith.constant 0.000000e+00 : f32
    %818 = vector.broadcast %cst_219 : f32 to vector<16x64xf32>
    %c0_220 = arith.constant 0 : index
    %c0_221 = arith.constant 0 : index
    %c0_222 = arith.constant 0 : index
    %819 = vector.load %arg9[%c0_220, %c0_221, %c0_222] : memref<1x64x2048xbf16, #tpu.memory_space<vmem>>, vector<1x64x512xbf16>
    %820 = vector.shape_cast %819 : vector<1x64x512xbf16> to vector<64x512xbf16>
    %cst_223 = arith.constant dense<0.000000e+00> : vector<16x512xf32>
    %821 = tpu.matmul %817, %820, %cst_223 {dimension_numbers = #tpu.dot_dimension_numbers<[1], [0], [0], [1], [0, 0, 1, 1], [], []>} : vector<16x64xbf16>, vector<64x512xbf16>, vector<16x512xf32> -> vector<16x512xf32>
    %c0_224 = arith.constant 0 : index
    %c0_225 = arith.constant 0 : index
    %c0_226 = arith.constant 0 : index
    %822 = vector.load %arg10[%c0_224, %c0_225, %c0_226] : memref<1x1x2048xf32, #tpu.memory_space<vmem>>, vector<1x1x512xf32>
    %823 = vector.shape_cast %822 : vector<1x1x512xf32> to vector<1x512xf32>
    %824 = vector.broadcast %823 : vector<1x512xf32> to vector<16x512xf32>
    %825 = arith.addf %821, %824 : vector<16x512xf32>
    %cst_227 = arith.constant 0.000000e+00 : f32
    %826 = vector.broadcast %cst_227 : f32 to vector<16x512xf32>
    %827 = arith.maximumf %825, %826 : vector<16x512xf32>
    %828 = arith.truncf %827 : vector<16x512xf32> to vector<16x512xbf16>
    %c0_228 = arith.constant 0 : index
    %c0_229 = arith.constant 0 : index
    %c0_230 = arith.constant 0 : index
    %829 = vector.load %arg11[%c0_228, %c0_229, %c0_230] : memref<1x2048x64xbf16, #tpu.memory_space<vmem>>, vector<1x512x64xbf16>
    %830 = vector.shape_cast %829 : vector<1x512x64xbf16> to vector<512x64xbf16>
    %cst_231 = arith.constant dense<0.000000e+00> : vector<16x64xf32>
    %831 = tpu.matmul %828, %830, %cst_231 {dimension_numbers = #tpu.dot_dimension_numbers<[1], [0], [0], [1], [0, 0, 1, 1], [], []>} : vector<16x512xbf16>, vector<512x64xbf16>, vector<16x64xf32> -> vector<16x64xf32>
    %832 = arith.addf %818, %831 : vector<16x64xf32>
    %c0_232 = arith.constant 0 : index
    %c0_233 = arith.constant 0 : index
    %c512 = arith.constant 512 : index
    %833 = vector.load %arg9[%c0_232, %c0_233, %c512] : memref<1x64x2048xbf16, #tpu.memory_space<vmem>>, vector<1x64x512xbf16>
    %834 = vector.shape_cast %833 : vector<1x64x512xbf16> to vector<64x512xbf16>
    %cst_234 = arith.constant dense<0.000000e+00> : vector<16x512xf32>
    %835 = tpu.matmul %817, %834, %cst_234 {dimension_numbers = #tpu.dot_dimension_numbers<[1], [0], [0], [1], [0, 0, 1, 1], [], []>} : vector<16x64xbf16>, vector<64x512xbf16>, vector<16x512xf32> -> vector<16x512xf32>
    %c0_235 = arith.constant 0 : index
    %c0_236 = arith.constant 0 : index
    %c512_237 = arith.constant 512 : index
    %836 = vector.load %arg10[%c0_235, %c0_236, %c512_237] : memref<1x1x2048xf32, #tpu.memory_space<vmem>>, vector<1x1x512xf32>
    %837 = vector.shape_cast %836 : vector<1x1x512xf32> to vector<1x512xf32>
    %838 = vector.broadcast %837 : vector<1x512xf32> to vector<16x512xf32>
    %839 = arith.addf %835, %838 : vector<16x512xf32>
    %cst_238 = arith.constant 0.000000e+00 : f32
    %840 = vector.broadcast %cst_238 : f32 to vector<16x512xf32>
    %841 = arith.maximumf %839, %840 : vector<16x512xf32>
    %842 = arith.truncf %841 : vector<16x512xf32> to vector<16x512xbf16>
    %c0_239 = arith.constant 0 : index
    %c512_240 = arith.constant 512 : index
    %c0_241 = arith.constant 0 : index
    %843 = vector.load %arg11[%c0_239, %c512_240, %c0_241] : memref<1x2048x64xbf16, #tpu.memory_space<vmem>>, vector<1x512x64xbf16>
    %844 = vector.shape_cast %843 : vector<1x512x64xbf16> to vector<512x64xbf16>
    %cst_242 = arith.constant dense<0.000000e+00> : vector<16x64xf32>
    %845 = tpu.matmul %842, %844, %cst_242 {dimension_numbers = #tpu.dot_dimension_numbers<[1], [0], [0], [1], [0, 0, 1, 1], [], []>} : vector<16x512xbf16>, vector<512x64xbf16>, vector<16x64xf32> -> vector<16x64xf32>
    %846 = arith.addf %832, %845 : vector<16x64xf32>
    %c0_243 = arith.constant 0 : index
    %c0_244 = arith.constant 0 : index
    %c1024 = arith.constant 1024 : index
    %847 = vector.load %arg9[%c0_243, %c0_244, %c1024] : memref<1x64x2048xbf16, #tpu.memory_space<vmem>>, vector<1x64x512xbf16>
    %848 = vector.shape_cast %847 : vector<1x64x512xbf16> to vector<64x512xbf16>
    %cst_245 = arith.constant dense<0.000000e+00> : vector<16x512xf32>
    %849 = tpu.matmul %817, %848, %cst_245 {dimension_numbers = #tpu.dot_dimension_numbers<[1], [0], [0], [1], [0, 0, 1, 1], [], []>} : vector<16x64xbf16>, vector<64x512xbf16>, vector<16x512xf32> -> vector<16x512xf32>
    %c0_246 = arith.constant 0 : index
    %c0_247 = arith.constant 0 : index
    %c1024_248 = arith.constant 1024 : index
    %850 = vector.load %arg10[%c0_246, %c0_247, %c1024_248] : memref<1x1x2048xf32, #tpu.memory_space<vmem>>, vector<1x1x512xf32>
    %851 = vector.shape_cast %850 : vector<1x1x512xf32> to vector<1x512xf32>
    %852 = vector.broadcast %851 : vector<1x512xf32> to vector<16x512xf32>
    %853 = arith.addf %849, %852 : vector<16x512xf32>
    %cst_249 = arith.constant 0.000000e+00 : f32
    %854 = vector.broadcast %cst_249 : f32 to vector<16x512xf32>
    %855 = arith.maximumf %853, %854 : vector<16x512xf32>
    %856 = arith.truncf %855 : vector<16x512xf32> to vector<16x512xbf16>
    %c0_250 = arith.constant 0 : index
    %c1024_251 = arith.constant 1024 : index
    %c0_252 = arith.constant 0 : index
    %857 = vector.load %arg11[%c0_250, %c1024_251, %c0_252] : memref<1x2048x64xbf16, #tpu.memory_space<vmem>>, vector<1x512x64xbf16>
    %858 = vector.shape_cast %857 : vector<1x512x64xbf16> to vector<512x64xbf16>
    %cst_253 = arith.constant dense<0.000000e+00> : vector<16x64xf32>
    %859 = tpu.matmul %856, %858, %cst_253 {dimension_numbers = #tpu.dot_dimension_numbers<[1], [0], [0], [1], [0, 0, 1, 1], [], []>} : vector<16x512xbf16>, vector<512x64xbf16>, vector<16x64xf32> -> vector<16x64xf32>
    %860 = arith.addf %846, %859 : vector<16x64xf32>
    %c0_254 = arith.constant 0 : index
    %c0_255 = arith.constant 0 : index
    %c1536 = arith.constant 1536 : index
    %861 = vector.load %arg9[%c0_254, %c0_255, %c1536] : memref<1x64x2048xbf16, #tpu.memory_space<vmem>>, vector<1x64x512xbf16>
    %862 = vector.shape_cast %861 : vector<1x64x512xbf16> to vector<64x512xbf16>
    %cst_256 = arith.constant dense<0.000000e+00> : vector<16x512xf32>
    %863 = tpu.matmul %817, %862, %cst_256 {dimension_numbers = #tpu.dot_dimension_numbers<[1], [0], [0], [1], [0, 0, 1, 1], [], []>} : vector<16x64xbf16>, vector<64x512xbf16>, vector<16x512xf32> -> vector<16x512xf32>
    %c0_257 = arith.constant 0 : index
    %c0_258 = arith.constant 0 : index
    %c1536_259 = arith.constant 1536 : index
    %864 = vector.load %arg10[%c0_257, %c0_258, %c1536_259] : memref<1x1x2048xf32, #tpu.memory_space<vmem>>, vector<1x1x512xf32>
    %865 = vector.shape_cast %864 : vector<1x1x512xf32> to vector<1x512xf32>
    %866 = vector.broadcast %865 : vector<1x512xf32> to vector<16x512xf32>
    %867 = arith.addf %863, %866 : vector<16x512xf32>
    %cst_260 = arith.constant 0.000000e+00 : f32
    %868 = vector.broadcast %cst_260 : f32 to vector<16x512xf32>
    %869 = arith.maximumf %867, %868 : vector<16x512xf32>
    %870 = arith.truncf %869 : vector<16x512xf32> to vector<16x512xbf16>
    %c0_261 = arith.constant 0 : index
    %c1536_262 = arith.constant 1536 : index
    %c0_263 = arith.constant 0 : index
    %871 = vector.load %arg11[%c0_261, %c1536_262, %c0_263] : memref<1x2048x64xbf16, #tpu.memory_space<vmem>>, vector<1x512x64xbf16>
    %872 = vector.shape_cast %871 : vector<1x512x64xbf16> to vector<512x64xbf16>
    %cst_264 = arith.constant dense<0.000000e+00> : vector<16x64xf32>
    %873 = tpu.matmul %870, %872, %cst_264 {dimension_numbers = #tpu.dot_dimension_numbers<[1], [0], [0], [1], [0, 0, 1, 1], [], []>} : vector<16x512xbf16>, vector<512x64xbf16>, vector<16x64xf32> -> vector<16x64xf32>
    %874 = arith.addf %860, %873 : vector<16x64xf32>
    %c0_265 = arith.constant 0 : index
    %c0_266 = arith.constant 0 : index
    %c0_267 = arith.constant 0 : index
    %875 = vector.load %arg12[%c0_265, %c0_266, %c0_267] : memref<1x1x64xf32, #tpu.memory_space<vmem>>, vector<1x1x64xf32>
    %876 = vector.shape_cast %875 : vector<1x1x64xf32> to vector<1x64xf32>
    %877 = vector.broadcast %876 : vector<1x64xf32> to vector<16x64xf32>
    %878 = arith.addf %874, %877 : vector<16x64xf32>
    %879 = arith.addf %816, %878 : vector<16x64xf32>
    %c0_268 = arith.constant 0 : index
    %c0_269 = arith.constant 0 : index
    %c0_270 = arith.constant 0 : index
    %880 = vector.load %arg13[%c0_268, %c0_269, %c0_270] : memref<1x1x64xf32, #tpu.memory_space<vmem>>, vector<1x1x64xf32>
    %881 = vector.shape_cast %880 : vector<1x1x64xf32> to vector<1x64xf32>
    %c0_271 = arith.constant 0 : index
    %c0_272 = arith.constant 0 : index
    %c0_273 = arith.constant 0 : index
    %882 = vector.load %arg14[%c0_271, %c0_272, %c0_273] : memref<1x1x64xf32, #tpu.memory_space<vmem>>, vector<1x1x64xf32>
    %883 = vector.shape_cast %882 : vector<1x1x64xf32> to vector<1x64xf32>
    %cst_274 = arith.constant dense<0.000000e+00> : vector<16xf32>
    %884 = vector.multi_reduction <add>, %879, %cst_274 [1] : vector<16x64xf32> to vector<16xf32>
    %885 = vector.shape_cast %884 : vector<16xf32> to vector<16x1xf32>
    %cst_275 = arith.constant 6.400000e+01 : f32
    %886 = vector.broadcast %cst_275 : f32 to vector<16x1xf32>
    %887 = arith.divf %885, %886 : vector<16x1xf32>
    %888 = vector.broadcast %887 : vector<16x1xf32> to vector<16x64xf32>
    %889 = arith.subf %879, %888 : vector<16x64xf32>
    %890 = arith.mulf %889, %889 : vector<16x64xf32>
    %cst_276 = arith.constant dense<0.000000e+00> : vector<16xf32>
    %891 = vector.multi_reduction <add>, %890, %cst_276 [1] : vector<16x64xf32> to vector<16xf32>
    %892 = vector.shape_cast %891 : vector<16xf32> to vector<16x1xf32>
    %cst_277 = arith.constant 6.400000e+01 : f32
    %893 = vector.broadcast %cst_277 : f32 to vector<16x1xf32>
    %894 = arith.divf %892, %893 : vector<16x1xf32>
    %cst_278 = arith.constant 9.99999974E-6 : f32
    %895 = vector.broadcast %cst_278 : f32 to vector<16x1xf32>
    %896 = arith.addf %894, %895 : vector<16x1xf32>
    %897 = math.rsqrt %896 : vector<16x1xf32>
    %898 = vector.broadcast %897 : vector<16x1xf32> to vector<16x64xf32>
    %899 = arith.mulf %889, %898 : vector<16x64xf32>
    %900 = vector.broadcast %881 : vector<1x64xf32> to vector<16x64xf32>
    %901 = arith.mulf %899, %900 : vector<16x64xf32>
    %902 = vector.broadcast %883 : vector<1x64xf32> to vector<16x64xf32>
    %903 = arith.addf %901, %902 : vector<16x64xf32>
    %c0_279 = arith.constant 0 : index
    %c0_280 = arith.constant 0 : index
    %904 = vector.load %arg16[%c0_279, %c0_280] : memref<16x64xf32, #tpu.memory_space<vmem>>, vector<16x64xf32>
    tpu.vector_store %arg16[%c0_279, %c0_280], %903 {strides = array<i32>} : memref<16x64xf32, #tpu.memory_space<vmem>>, vector<16x64xf32>,
    %c9_i32 = arith.constant 9 : i32
    %905 = arith.cmpi eq, %arg0, %c9_i32 : i32
    %906 = arith.extui %905 : i1 to i32
    %c0_i32_281 = arith.constant 0 : i32
    %907 = arith.cmpi ne, %906, %c0_i32_281 : i32
    scf.if %907 {
      %c0_282 = arith.constant 0 : index
      %c0_283 = arith.constant 0 : index
      %908 = vector.load %arg16[%c0_282, %c0_283] : memref<16x64xf32, #tpu.memory_space<vmem>>, vector<16x64xf32>
      %c0_284 = arith.constant 0 : index
      %c0_285 = arith.constant 0 : index
      %909 = vector.load %arg15[%c0_284, %c0_285] : memref<16x64xf32, #tpu.memory_space<vmem>>, vector<16x64xf32>
      tpu.vector_store %arg15[%c0_284, %c0_285], %908 {strides = array<i32>} : memref<16x64xf32, #tpu.memory_space<vmem>>, vector<16x64xf32>,
    } else {
    }
    return
  }
  func.func @transform_0(%arg0: i32) -> (i32, i32) {
    %c0_i32 = arith.constant 0 : i32
    %c0_i32_0 = arith.constant 0 : i32
    %c0_i32_1 = arith.constant 0 : i32
    return %c0_i32, %c0_i32_0 : i32, i32
  }
  func.func @transform_1(%arg0: i32) -> (i32, i32) {
    %c0_i32 = arith.constant 0 : i32
    %c0_i32_0 = arith.constant 0 : i32
    %c0_i32_1 = arith.constant 0 : i32
    return %c0_i32, %c0_i32_0 : i32, i32
  }
  func.func @transform_2(%arg0: i32) -> (i32, i32, i32) {
    %c0_i32 = arith.constant 0 : i32
    %c0_i32_0 = arith.constant 0 : i32
    %c0_i32_1 = arith.constant 0 : i32
    return %arg0, %c0_i32, %c0_i32_0 : i32, i32, i32
  }
  func.func @transform_3(%arg0: i32) -> (i32, i32, i32) {
    %c0_i32 = arith.constant 0 : i32
    %c0_i32_0 = arith.constant 0 : i32
    %c0_i32_1 = arith.constant 0 : i32
    return %arg0, %c0_i32, %c0_i32_0 : i32, i32, i32
  }
  func.func @transform_4(%arg0: i32) -> (i32, i32, i32) {
    %c0_i32 = arith.constant 0 : i32
    %c0_i32_0 = arith.constant 0 : i32
    %c0_i32_1 = arith.constant 0 : i32
    return %arg0, %c0_i32, %c0_i32_0 : i32, i32, i32
  }
  func.func @transform_5(%arg0: i32) -> (i32, i32, i32) {
    %c0_i32 = arith.constant 0 : i32
    %c0_i32_0 = arith.constant 0 : i32
    %c0_i32_1 = arith.constant 0 : i32
    return %arg0, %c0_i32, %c0_i32_0 : i32, i32, i32
  }
  func.func @transform_6(%arg0: i32) -> (i32, i32, i32) {
    %c0_i32 = arith.constant 0 : i32
    %c0_i32_0 = arith.constant 0 : i32
    %c0_i32_1 = arith.constant 0 : i32
    return %arg0, %c0_i32, %c0_i32_0 : i32, i32, i32
  }
  func.func @transform_7(%arg0: i32) -> (i32, i32, i32) {
    %c0_i32 = arith.constant 0 : i32
    %c0_i32_0 = arith.constant 0 : i32
    %c0_i32_1 = arith.constant 0 : i32
    return %arg0, %c0_i32, %c0_i32_0 : i32, i32, i32
  }
  func.func @transform_8(%arg0: i32) -> (i32, i32, i32) {
    %c0_i32 = arith.constant 0 : i32
    %c0_i32_0 = arith.constant 0 : i32
    %c0_i32_1 = arith.constant 0 : i32
    return %arg0, %c0_i32, %c0_i32_0 : i32, i32, i32
  }
  func.func @transform_9(%arg0: i32) -> (i32, i32, i32) {
    %c0_i32 = arith.constant 0 : i32
    %c0_i32_0 = arith.constant 0 : i32
    %c0_i32_1 = arith.constant 0 : i32
    return %arg0, %c0_i32, %c0_i32_0 : i32, i32, i32
  }
  func.func @transform_10(%arg0: i32) -> (i32, i32, i32) {
    %c0_i32 = arith.constant 0 : i32
    %c0_i32_0 = arith.constant 0 : i32
    %c0_i32_1 = arith.constant 0 : i32
    return %arg0, %c0_i32, %c0_i32_0 : i32, i32, i32
  }
  func.func @transform_11(%arg0: i32) -> (i32, i32, i32) {
    %c0_i32 = arith.constant 0 : i32
    %c0_i32_0 = arith.constant 0 : i32
    %c0_i32_1 = arith.constant 0 : i32
    return %arg0, %c0_i32, %c0_i32_0 : i32, i32, i32
  }
  func.func @transform_12(%arg0: i32) -> (i32, i32, i32) {
    %c0_i32 = arith.constant 0 : i32
    %c0_i32_0 = arith.constant 0 : i32
    %c0_i32_1 = arith.constant 0 : i32
    return %arg0, %c0_i32, %c0_i32_0 : i32, i32, i32
  }
  func.func @transform_13(%arg0: i32) -> (i32, i32, i32) {
    %c0_i32 = arith.constant 0 : i32
    %c0_i32_0 = arith.constant 0 : i32
    %c0_i32_1 = arith.constant 0 : i32
    return %arg0, %c0_i32, %c0_i32_0 : i32, i32, i32
  }
  func.func @transform_14(%arg0: i32) -> (i32, i32) {
    %c0_i32 = arith.constant 0 : i32
    %c0_i32_0 = arith.constant 0 : i32
    %c0_i32_1 = arith.constant 0 : i32
    return %c0_i32, %c0_i32_0 : i32, i32
  }
}

</mosaic_0001>

<bundles_post_ra>
// kernel: midi_transformer_forward.1
= control target key start
LH: loop header
LB: loop body
LE: loop exit
PB: predicated region body
PF: predicated region fallthrough
CT: control target
= control target key end

     0   :  { %s10052_s29 = smov 0   ;;  %s11339_s0 = inlined_call_operand.vmem [shape: f32[16,64], index: 0, kind: input, shape index: {}]   ;;  %s11340_s1 = inlined_call_operand.vmem [shape: f32[16,64], index: 1, kind: input, shape index: {}]   ;;  %s11341_s2 = inlined_call_operand.vmem [shape: bf16[10,64,192], index: 2, kind: input, shape index: {}]   ;;  %s11342_s3 = inlined_call_operand.vmem [shape: f32[10,1,192], index: 3, kind: input, shape index: {}]   ;;  %s11343_s4 = inlined_call_operand.vmem [shape: bf16[10,64,64], index: 4, kind: input, shape index: {}]   ;;  %s11344_s5 = inlined_call_operand.vmem [shape: f32[10,1,64], index: 5, kind: input, shape index: {}]   ;;  %s11345_s6 = inlined_call_operand.vmem [shape: f32[10,1,64], index: 6, kind: input, shape index: {}]   ;;  %s11346_s7 = inlined_call_operand.vmem [shape: f32[10,1,64], index: 7, kind: input, shape index: {}]   ;;  %s11347_s8 = inlined_call_operand.vmem [shape: bf16[10,64,2048], index: 8, kind: input, shape index: {}]   ;;  %s11348_s9 = inlined_call_operand.vmem [shape: f32[10,1,2048], index: 9, kind: input, shape index: {}]   ;;  %s11349_s10 = inlined_call_operand.vmem [shape: bf16[10,2048,64], index: 10, kind: input, shape index: {}]   ;;  %s11350_s11 = inlined_call_operand.vmem [shape: f32[10,1,64], index: 11, kind: input, shape index: {}]   ;;  %s11351_s12 = inlined_call_operand.vmem [shape: f32[10,1,64], index: 12, kind: input, shape index: {}]   ;;  %s11352_s13 = inlined_call_operand.vmem [shape: f32[10,1,64], index: 13, kind: input, shape index: {}]   ;;  %s11353_s14 = inlined_call_operand.vmem [shape: f32[16,64], index: 14, kind: output, shape index: {}]  }
   0x1   :  { %11382 = sst [smem:[#allocation5_spill]] %s11340_s1 }
   0x2   :  { %11383 = sst [smem:[#allocation6_spill]] %s11341_s2 }
   0x3   :  { %11384 = sst [smem:[#allocation7_spill]] %s11342_s3 }
   0x4   :  { %11385 = sst [smem:[#allocation8_spill]] %s11343_s4 }
   0x5   :  { %11386 = sst [smem:[#allocation9_spill]] %s11353_s14 }
   0x6 LB: > { %11387 = sst [smem:[#allocation3_spill]] %s9941_s29  ;;  %s10058_s30 = sadd.s32 4294967295, %s9941_s29   ;;  %s9941_s29 = sphi %s10052_s29, %s24_s29  }
   0x7   : > { %p8325_p0 = scmp.ge.s32.totalorder %s9941_s29, 1  ;;  %p503_p1 = scmp.lt.s32.totalorder %s9941_s29, 11 }
   0x9   : > { %p504_p2 = pnand %p8325_p0, %p503_p1 }
   0xb   : > { %507 = sbr.rel (%p504_p2) target bundleno = 18210 (0x4722), region = 76 }
  0x10   : > { %p585_p3 = scmp.lt.s32.totalorder %s10058_s30, 9  ;;  %s11388_s2 = sld [smem:[#allocation6_spill]] }
  0x11   : > { %s11389_s3 = sld [smem:[#allocation7_spill]]  ;;  %p8336_p4 = scmp.ne.s32.totalorder %s10058_s30, 0 }
  0x12   : > { %s10064_s15 = scalar_select %p585_p3, %s10058_s30, 9 }
  0x13   : > { %s11391_s4 = sld [smem:[#allocation8_spill]] }
  0x14   : > { %s8659_s16 = sshll.u32 %s10064_s15, 6  ;;  %s8328_s17 = sshll.u32 %s10064_s15, 1 }
  0x15   : > { %s8660_s24 = sshll.u32 %s10064_s15, 5  ;;  %s8333_s25 = sshll.u32 %s10064_s15, 4 }
  0x16   : > { %s10071_s20 = scalar_lea.vmem %s11388_s2, %s8659_s16  ;;  %s10106_s29 = scalar_lea.vmem %s11348_s9, %s8333_s25 }
  0x17   : > { %s10076_s23 = scalar_lea.vmem %s11389_s3, %s8328_s17  ;;  %s8661_s17 = sshll.u32 %s10064_s15, 9 }
  0x18   : > { %11390 = sst [smem:[#allocation4_spill]] %s10076_s23  ;;  %s10100_s23 = scalar_lea.vmem %s11347_s8, %s8661_s17 }
  0x19   : > { %s10086_s14 = scalar_lea.vmem %s11391_s4, %s8660_s24  ;;  %s8662_s24 = sshll.u32 %s10064_s15, 10 }
  0x1a   : > { %s10112_s18 = scalar_lea.vmem %s11349_s10, %s8662_s24  ;;  %635 = sbr.rel (%p8336_p4) target bundleno = 37 (0x25), region = 80 }
  0x1b   : > { %s11392_s1 = sld [smem:[#allocation5_spill]] (!%p8336_p4) }
  0x1f   : > { %v636_v0 = vld [vmem:[%s11339_s0] sm:$0xff]  ;;  %vm642_vm0 = vcmask 523264   ;;  %v637_v2 = vld [vmem:[%s11339_s0 + $0x8] sm:$0xff] }
  0x21   : > { %v638_v1 = vld [vmem:[%s11392_s1] sm:$0xff]  ;;  %v639_v4 = vld [vmem:[%s11392_s1 + $0x8] sm:$0xff] }
  0x22   : > { %v640_v3 = vadd.f32 %v638_v1, %v636_v0  ;;  %v641_v5 = vadd.f32 %v639_v4, %v637_v2 }
  0x24   : > { %643 = vst.msk [vmem:[#allocation2] sm:$0xff] %vm642_vm0, %v640_v3  ;;  %644 = vst.msk [vmem:[#allocation2 + $0x8] sm:$0xff] %vm642_vm0, %v641_v5 }
  0x25 PF: > { %v9649_v6 = vld [vmem:[%s10071_s20 + $0x34] ss:$8 sps:$4 sm:$0xff]   ;;  %v9651_v7 = vld [vmem:[%s10071_s20 + $0x30] ss:$8 sps:$4 sm:$0xff]   ;;  %v9943_v8 = vmov 0   ;;  %vm708_vm1 = vcmask 523264   ;;  %v658_v18 = vlaneseq }
  0x26   : > { %744 = vmatprep.mubr.bf16.mxu0 %v9943_v8  ;;  %720 = vmatprep.subr.bf16.mxu0 %v9649_v6  ;;  %v9652_v9 = vld [vmem:[%s10071_s20 + $0x24] ss:$8 sps:$4 sm:$0xff]   ;;  %v9654_v10 = vld [vmem:[%s10071_s20 + $0x20] ss:$8 sps:$4 sm:$0xff]   ;;  %v9655_v11 = vld [vmem:[%s10071_s20 + $0x14] ss:$8 sps:$4 sm:$0xff]  }
  0x27   : > { %721 = vmatpush1.bf16.msra.mxu0 %v9651_v7  ;;  %v9657_v12 = vld [vmem:[%s10071_s20 + $0x10] ss:$8 sps:$4 sm:$0xff]   ;;  %v9658_v13 = vld [vmem:[%s10071_s20 + $0x4] ss:$8 sps:$4 sm:$0xff]   ;;  %s11393_s3 = sld [smem:[#allocation4_spill]]  ;;  %v10149_v19 = vshrl.u32 %v658_v18, 7 }
  0x28   : > { %722 = vmatprep.subr.bf16.mxu0 %v9652_v9  ;;  %v9660_v14 = vld [vmem:[%s10071_s20] ss:$8 sps:$4 sm:$0xff]   ;;  %v9944_v20 = vmov 0.0   ;;  %vm9945_vm2 = vmmov 0   ;;  %s9946_s20 = smov 124   ;;  %s9947_s22 = smov 64  }
  0x29   : > { %9031 = vmatprep.subr.bf16.mxu1 %v9944_v20  ;;  %v10154_v21 = vsub.s32 0, %v10149_v19  ;;  %9033 = vmatprep.mubr.msk.bf16.mxu1 %vm9945_vm2, %v9944_v20  ;;  %s9948_s25 = smov 60   ;;  %v10173_v30 = vsub.s32 1, %v10149_v19  ;;  %vm768_vm3 = vcmask 31744   ;;  %vm832_vm4 = vcmask 1043456   ;;  %s9949_s26 = smov 56  }
  0x2a   : > { %vm816_vm5 = vcmask 64512   ;;  %s9950_s24 = smov 120   ;;  %vm997_vm6 = vcmask 1041408   ;;  %s9951_s28 = smov 116  }
  0x2b   : > { %723 = vmatpush1.bf16.msra.mxu0 %v9654_v10  ;;  %v645_v15 = vld [vmem:[#allocation2] sm:$0xff]  ;;  %v646_v16 = vld [vmem:[#allocation2 + $0x8] sm:$0xff]  ;;  %s9952_s2 = smov 52   ;;  %s9953_s19 = smov 48  }
  0x2c   : > { %724 = vmatprep.subr.bf16.mxu0 %v9655_v11  ;;  %v647_v17 = vpack.c.bf16 %v646_v16, %v645_v15  ;;  %v755_v10 = vld [vmem:[%s10086_s14] sm:$0xf]  ;;  %s9954_s16 = smov 112   ;;  %s9955_s4 = smov 108  }
  0x2d   : > { %v656_v22 = vld [vmem:[%s11393_s3] sm:$0x3]  ;;  %v10217_v11 = vsel %vm997_vm6, %v755_v10, 0  ;;  %s9956_s3 = smov 44   ;;  %s11357_s27 = smov 40  }
  0x2e   : > { %v661_v23 = vrot.slane %v656_v22, %v10154_v21  ;;  %v10176_v31 = vrot.slane %v656_v22, %v10173_v30  ;;  %s11359_s17 = smov 104   ;;  %s11362_s21 = smov 100  }
  0x2f   : > { %725 = vmatpush1.bf16.msra.mxu0 %v9657_v12  ;;  %v8350_v12 = vcombine.low %v755_v10, %v755_v10  ;;  %p8656_p5 = scmp.ne.s32.totalorder %s10058_s30, 9 }
  0x30   : > { %726 = vmatprep.subr.bf16.mxu0 %v9658_v13 }
  0x31   : > { %v993_v13 = vrot.slane %v8350_v12, 2 }
  0x33   : > { %727 = vmatpush1.bf16.msra.mxu0 %v9660_v14  ;;  %v10222_v14 = vsel %vm997_vm6, %v993_v13, 0 }
  0x34   : > { %9043 = vmatprep.subr.bf16.mxu0 %v9944_v20 }
  0x36   : > { %8345 = vmatmul.mubr.msk.bf16.vlgmr.msra.gmra.mxu0 %vm708_vm1, %v647_v17 }
  0x37   : > { %9045 = vmatprep.mubr.msk.bf16.mxu0 %vm9945_vm2, %v9944_v20 }
  0xf6   : > { %v746_v24 = vpop.f32.mrf.mxu0 }
  0xf7   : > { %v747_v25 = vadd.f32 %v746_v24, %v661_v23 }
  0xf8   : > { %v748_v26 = vpop.f32.mrf.mxu0 }
  0xf9   : > { %v10162_v27 = vpack.c.bf16 %v747_v25, %v747_v25  ;;  %v749_v33 = vadd.f32 %v748_v26, %v10176_v31 }
  0xfa   : > { %v750_v28 = vpop.f32.mrf.mxu0 }
  0xfb   : > { %v10164_v29 = vadd.f32 %v750_v28, %v661_v23  ;;  %877 = vrot.lane.b32.xlu1 %v10162_v27, %s9946_s20  ;;  %766 = vrot.lane.b32.xlu0 %v10162_v27, %s9947_s22  ;;  %v10181_v36 = vpack.c.bf16 %v749_v33, %v749_v33 }
  0xfc   : > { %v10195_v42 = vpop.f32.mrf.mxu0 }
  0xfd   : > { %v834_v38 = vsel %vm832_vm4, %v10181_v36, 0 }
  0xff   : > { %879 = vrot.lane.b32.xlu0 %v10162_v27, %s9948_s25 }
 0x16d   : > { %v767_v32 = vpop.permute.xlu0 %766  ;;  %v878_v39 = vpop.permute.xlu1 %877 }
 0x16e   : > { %v773_v34 = vsel %vm768_vm3, %v767_v32, 0 }
 0x16f   : > { %9032 = vmatpush3.bf16.xpose.msra.mxu1 %v773_v34 }
 0x170   : > { %9037 = vmatprep.subr.bf16.mxu1 %v9944_v20 }
 0x171   : > { %v880_v35 = vpop.permute.xlu0 %879 }
 0x172   : > { %v885_v37 = vsel %vm768_vm3, %v880_v35, 0 }
 0x173   : > { %9044 = vmatpush3.bf16.xpose.msra.mxu0 %v885_v37 }
 0x174   : > { %9055 = vmatprep.subr.bf16.mxu0 %v9944_v20 }
 0x176   : > { %9034 = vmatmul.mubr.msk.bf16.vlgmr.msra.gmra.mxu1 %vm768_vm3, %v10162_v27 }
 0x177   : > { %9038 = vmatpush3.bf16.msra.mxu1 %v834_v38  ;;  %9039 = vmatprep.mubr.msk.bf16.mxu1 %vm9945_vm2, %v9944_v20 }
 0x178   : > { %9049 = vmatprep.subr.bf16.mxu1 %v9944_v20 }
 0x17a   : > { %9046 = vmatmul.mubr.msk.bf16.vlgmr.msra.gmra.mxu0 %vm768_vm3, %v878_v39 }
 0x17b   : > { %9057 = vmatprep.mubr.msk.bf16.mxu0 %vm9945_vm2, %v9944_v20  ;;  %9056 = vmatpush3.bf16.msra.mxu0 %v10222_v14 }
 0x17c   : > { %9067 = vmatprep.subr.bf16.mxu0 %v9944_v20 }
 0x236   : > { %v809_v40 = vpop.f32.mrf.mxu1 }
 0x237   : > { %v815_v41 = vmul.f32 0.5, %v809_v40 }
 0x238   : > { %v9035_v43 = vpop.f32.mrf.mxu1 }
 0x239   : > { %v817_v44 = vsel %vm816_vm5, %v815_v41, -inf }
 0x23a   : > { %818 = vmax.xlane.f32.xlu1 %v817_v44  ;;  %v812_v45 = vpop.f32.mrf.mxu1  ;;  %v921_v46 = vpop.f32.mrf.mxu0 }
 0x23b   : > { %v927_v47 = vmul.f32 0.5, %v921_v46 }
 0x23c   : > { %v9036_v48 = vpop.f32.mrf.mxu1  ;;  %v9047_v49 = vpop.f32.mrf.mxu0 }
 0x23d   : > { %v928_v50 = vsel %vm816_vm5, %v927_v47, -inf }
 0x23e   : > { %929 = vmax.xlane.f32.xlu0 %v928_v50  ;;  %v924_v51 = vpop.f32.mrf.mxu0 }
 0x240   : > { %v9048_v52 = vpop.f32.mrf.mxu0 }
 0x2c3   : > { %v819_v53 = vpop.xlane.xlu1 %818 }
 0x2c4   : > { %v820_v54 = vsub.f32 %v815_v41, %v819_v53 }
 0x2c6   : > { %v821_v55 = vmul.f32 1.442695, %v820_v54 }
 0x2c7   : > { %v930_v56 = vpop.xlane.xlu0 %929 }
 0x2c8   : > { %9797 = vpow2.f32 %v821_v55  ;;  %v931_v57 = vsub.f32 %v927_v47, %v930_v56 }
 0x2ca   : > { %v932_v58 = vmul.f32 1.442695, %v931_v57 }
 0x2cc   : > { %9799 = vpow2.f32 %v932_v58 }
 0x2d5   : > { %v9798_v59 = vpop.eup %9797 }
 0x2d6   : > { %v823_v60 = vsel %vm816_vm5, %v9798_v59, 0.0 }
 0x2d7   : > { %824 = vadd.xlane.f32.xlu0 %v823_v60 }
 0x2d9   : > { %v9800_v61 = vpop.eup %9799 }
 0x2da   : > { %v934_v62 = vsel %vm816_vm5, %v9800_v61, 0.0 }
 0x2db   : > { %935 = vadd.xlane.f32.xlu1 %v934_v62 }
 0x2ec   : > { %1089 = vrot.lane.b32.xlu1 %v10162_v27, %s9949_s26 }
 0x2ed   : > { %941 = vrot.lane.b32.xlu0 %v10181_v36, %s9946_s20 }
 0x2f0   : > { %1087 = vrot.lane.b32.xlu1 %v10162_v27, %s9950_s24 }
 0x360   : > { %v825_v63 = vpop.xlane.xlu0 %824 }
 0x361   : > { %9801 = vrcp.f32 %v825_v63 }
 0x364   : > { %v936_v0 = vpop.xlane.xlu1 %935  ;;  %v942_v3 = vpop.permute.xlu0 %941 }
 0x365   : > { %9803 = vrcp.f32 %v936_v0  ;;  %v947_v6 = vsel %vm832_vm4, %v942_v3, 0 }
 0x368   : > { %v1090_v23 = vpop.permute.xlu1 %1089 }
 0x369   : > { %v1095_v28 = vsel %vm768_vm3, %v1090_v23, 0 }
 0x36c   : > { %v1088_v34 = vpop.permute.xlu1 %1087 }
 0x36e   : > { %v9802_v1 = vpop.eup %9801 }
 0x36f   : > { %v827_v2 = vmul.f32 %v9802_v1, %v9798_v59 }
 0x371   : > { %v828_v4 = vpack.c.bf16 %v827_v2, %v827_v2  ;;  %v756_v2 = vld [vmem:[%s10086_s14 + $0x4] sm:$0xf] }
 0x372   : > { %v9804_v5 = vpop.eup %9803  ;;  %v10259_v3 = vsel %vm997_vm6, %v756_v2, 0 }
 0x373   : > { %9040 = vmatmul.mubr.msk.bf16.vlgmr.msra.gmra.mxu1 %vm816_vm5, %v828_v4  ;;  %v938_v7 = vmul.f32 %v9804_v5, %v9800_v61 }
 0x374   : > { %9050 = vmatpush3.bf16.msra.mxu1 %v947_v6  ;;  %9051 = vmatprep.mubr.msk.bf16.mxu1 %vm9945_vm2, %v9944_v20 }
 0x375   : > { %9061 = vmatprep.subr.bf16.mxu1 %v9944_v20  ;;  %v939_v9 = vpack.c.bf16 %v938_v7, %v938_v7 }
 0x37b   : > { %9052 = vmatmul.mubr.msk.bf16.vlgmr.msra.gmra.mxu1 %vm816_vm5, %v939_v9 }
 0x37c   : > { %9063 = vmatprep.mubr.msk.bf16.mxu1 %vm9945_vm2, %v9944_v20  ;;  %9062 = vmatpush3.bf16.msra.mxu1 %v10217_v11 }
 0x37d   : > { %9073 = vmatprep.subr.bf16.mxu1 %v9944_v20 }
 0x433   : > { %v870_v15 = vpop.f32.mrf.mxu1 }
 0x434   : > { %v876_v16 = vpack.c.bf16 %v870_v15, %v870_v15 }
 0x435   : > { %v9041_v17 = vpop.f32.mrf.mxu1 }
 0x436   : > { %9064 = vmatmul.mubr.msk.bf16.vlgmr.msra.gmra.mxu1 %vm768_vm3, %v876_v16 }
 0x437   : > { %v873_v18 = vpop.f32.mrf.mxu1  ;;  %9075 = vmatprep.mubr.msk.bf16.mxu1 %vm9945_vm2, %v9944_v20 }
 0x439   : > { %v9042_v22 = vpop.f32.mrf.mxu1 }
 0x43b   : > { %v983_v24 = vpop.f32.mrf.mxu1 }
 0x43c   : > { %v989_v25 = vpack.c.bf16 %v983_v24, %v983_v24 }
 0x43d   : > { %v9053_v26 = vpop.f32.mrf.mxu1 }
 0x43e   : > { %9058 = vmatmul.mubr.msk.bf16.vlgmr.msra.gmra.mxu0 %vm768_vm3, %v989_v25 }
 0x43f   : > { %9068 = vmatpush3.bf16.xpose.msra.mxu0 %v1095_v28  ;;  %v986_v32 = vpop.f32.mrf.mxu1  ;;  %9069 = vmatprep.mubr.msk.bf16.mxu0 %vm9945_vm2, %v9944_v20 }
 0x440   : > { %9079 = vmatprep.subr.bf16.mxu0 %v9944_v20 }
 0x441   : > { %v9054_v33 = vpop.f32.mrf.mxu1 }
 0x446   : > { %9070 = vmatmul.mubr.msk.bf16.vlgmr.msra.gmra.mxu0 %vm768_vm3, %v1088_v34 }
 0x447   : > { %9081 = vmatprep.mubr.msk.bf16.mxu0 %vm9945_vm2, %v9944_v20  ;;  %9080 = vmatpush3.bf16.msra.mxu0 %v10259_v3 }
 0x448   : > { %9091 = vmatprep.subr.bf16.mxu0 %v9944_v20 }
 0x4f6   : > { %v1081_v35 = vpop.f32.mrf.mxu1 }
 0x4f8   : > { %v9065_v37 = vpop.f32.mrf.mxu1 }
 0x4fa   : > { %v1084_v38 = vpop.f32.mrf.mxu1 }
 0x4fc   : > { %v9066_v39 = vpop.f32.mrf.mxu1 }
 0x4fe   : > { %v1035_v40 = vpop.f32.mrf.mxu0 }
 0x4ff   : > { %v10237_v41 = vadd.f32 %v1081_v35, %v1035_v40 }
 0x500   : > { %v9059_v43 = vpop.f32.mrf.mxu0 }
 0x502   : > { %v1038_v44 = vpop.f32.mrf.mxu0 }
 0x504   : > { %v9060_v45 = vpop.f32.mrf.mxu0 }
 0x506   : > { %v1131_v46 = vpop.f32.mrf.mxu0 }
 0x507   : > { %v1137_v47 = vmul.f32 0.5, %v1131_v46  ;;  %v8358_v46 = vcombine.low %v756_v2, %v756_v2 }
 0x508   : > { %v9071_v48 = vpop.f32.mrf.mxu0 }
 0x509   : > { %v1138_v49 = vsel %vm816_vm5, %v1137_v47, -inf }
 0x50a   : > { %1139 = vmax.xlane.f32.xlu0 %v1138_v49  ;;  %v1134_v50 = vpop.f32.mrf.mxu0 }
 0x50c   : > { %v9072_v51 = vpop.f32.mrf.mxu0 }
 0x520   : > { %1150 = vrot.lane.b32.xlu0 %v10181_v36, %s9950_s24 }
 0x524   : > { %1246 = vrot.lane.b32.xlu0 %v10162_v27, %s9951_s28 }
 0x593   : > { %v1140_v52 = vpop.xlane.xlu0 %1139 }
 0x594   : > { %v1141_v53 = vsub.f32 %v1137_v47, %v1140_v52  ;;  %v1361_v47 = vrot.slane %v8358_v46, 2 }
 0x596   : > { %v1142_v54 = vmul.f32 1.442695, %v1141_v53  ;;  %v10286_v48 = vsel %vm997_vm6, %v1361_v47, 0 }
 0x597   : > { %v1151_v55 = vpop.permute.xlu0 %1150 }
 0x598   : > { %9805 = vpow2.f32 %v1142_v54  ;;  %v1156_v56 = vsel %vm832_vm4, %v1151_v55, 0 }
 0x599   : > { %9074 = vmatpush3.bf16.msra.mxu1 %v1156_v56 }
 0x59a   : > { %9085 = vmatprep.subr.bf16.mxu1 %v9944_v20 }
 0x59b   : > { %v1247_v1 = vpop.permute.xlu0 %1246 }
 0x5a5   : > { %v9806_v57 = vpop.eup %9805 }
 0x5a6   : > { %v1144_v58 = vsel %vm816_vm5, %v9806_v57, 0.0 }
 0x5a7   : > { %1145 = vadd.xlane.f32.xlu1 %v1144_v58 }
 0x5b8   : > { %1248 = vrot.lane.b32.xlu1 %v10162_v27, %s9952_s2 }
 0x630   : > { %v1146_v59 = vpop.xlane.xlu1 %1145 }
 0x631   : > { %9807 = vrcp.f32 %v1146_v59 }
 0x634   : > { %v1249_v62 = vpop.permute.xlu1 %1248 }
 0x635   : > { %v1254_v0 = vsel %vm768_vm3, %v1249_v62, 0 }
 0x63e   : > { %v9808_v60 = vpop.eup %9807 }
 0x63f   : > { %v1148_v61 = vmul.f32 %v9808_v60, %v9806_v57 }
 0x641   : > { %v1149_v63 = vpack.c.bf16 %v1148_v61, %v1148_v61 }
 0x643   : > { %9076 = vmatmul.mubr.msk.bf16.vlgmr.msra.gmra.mxu1 %vm816_vm5, %v1149_v63 }
 0x644   : > { %9086 = vmatpush3.bf16.xpose.msra.mxu1 %v1254_v0  ;;  %9087 = vmatprep.mubr.msk.bf16.mxu1 %vm9945_vm2, %v9944_v20 }
 0x645   : > { %9097 = vmatprep.subr.bf16.mxu1 %v9944_v20 }
 0x64b   : > { %9088 = vmatmul.mubr.msk.bf16.vlgmr.msra.gmra.mxu1 %vm768_vm3, %v1247_v1 }
 0x64c   : > { %9099 = vmatprep.mubr.msk.bf16.mxu1 %vm9945_vm2, %v9944_v20  ;;  %9098 = vmatpush3.bf16.msra.mxu1 %v10286_v48 }
 0x64d   : > { %9109 = vmatprep.subr.bf16.mxu1 %v9944_v20 }
 0x703   : > { %v1192_v4 = vpop.f32.mrf.mxu1 }
 0x704   : > { %v1198_v5 = vpack.c.bf16 %v1192_v4, %v1192_v4 }
 0x705   : > { %v9077_v6 = vpop.f32.mrf.mxu1 }
 0x706   : > { %9082 = vmatmul.mubr.msk.bf16.vlgmr.msra.gmra.mxu0 %vm768_vm3, %v1198_v5 }
 0x707   : > { %v1195_v7 = vpop.f32.mrf.mxu1  ;;  %9093 = vmatprep.mubr.msk.bf16.mxu0 %vm9945_vm2, %v9944_v20 }
 0x709   : > { %v9078_v9 = vpop.f32.mrf.mxu1 }
 0x70b   : > { %v1290_v10 = vpop.f32.mrf.mxu1 }
 0x70c   : > { %v1296_v12 = vmul.f32 0.5, %v1290_v10 }
 0x70d   : > { %v9089_v13 = vpop.f32.mrf.mxu1 }
 0x70e   : > { %v1297_v15 = vsel %vm816_vm5, %v1296_v12, -inf }
 0x70f   : > { %1298 = vmax.xlane.f32.xlu1 %v1297_v15  ;;  %v1293_v16 = vpop.f32.mrf.mxu1 }
 0x711   : > { %v9090_v17 = vpop.f32.mrf.mxu1 }
 0x720   : > { %1411 = vrot.lane.b32.xlu1 %v10162_v27, %s9953_s19 }
 0x724   : > { %1409 = vrot.lane.b32.xlu1 %v10162_v27, %s9954_s16 }
 0x798   : > { %v1299_v18 = vpop.xlane.xlu1 %1298 }
 0x799   : > { %v1300_v22 = vsub.f32 %v1296_v12, %v1299_v18 }
 0x79b   : > { %v1301_v23 = vmul.f32 1.442695, %v1300_v22  ;;  %v757_v22 = vld [vmem:[%s10086_s14 + $0x8] sm:$0xf] }
 0x79c   : > { %v1412_v43 = vpop.permute.xlu1 %1411 }
 0x79d   : > { %9809 = vpow2.f32 %v1301_v23  ;;  %v1417_v45 = vsel %vm768_vm3, %v1412_v43, 0  ;;  %v10313_v23 = vsel %vm997_vm6, %v757_v22, 0 }
 0x7aa   : > { %v9810_v24 = vpop.eup %9809 }
 0x7ab   : > { %v1303_v25 = vsel %vm816_vm5, %v9810_v24, 0.0 }
 0x7ac   : > { %1304 = vadd.xlane.f32.xlu0 %v1303_v25 }
 0x7c2   : > { %1309 = vrot.lane.b32.xlu0 %v10181_v36, %s9951_s28 }
 0x7c6   : > { %v1239_v26 = vpop.f32.mrf.mxu0 }
 0x7c7   : > { %v1245_v28 = vadd.f32 %v1239_v26, %v10237_v41  ;;  %v1410_v41 = vpop.permute.xlu1 %1409 }
 0x7c8   : > { %v9083_v32 = vpop.f32.mrf.mxu0 }
 0x7ca   : > { %v1242_v33 = vpop.f32.mrf.mxu0 }
 0x7cc   : > { %v9084_v34 = vpop.f32.mrf.mxu0 }
 0x835   : > { %v1305_v35 = vpop.xlane.xlu0 %1304 }
 0x836   : > { %9811 = vrcp.f32 %v1305_v35 }
 0x839   : > { %v1310_v37 = vpop.permute.xlu0 %1309 }
 0x83a   : > { %v1315_v38 = vsel %vm832_vm4, %v1310_v37, 0 }
 0x83b   : > { %9092 = vmatpush3.bf16.msra.mxu0 %v1315_v38 }
 0x83c   : > { %9103 = vmatprep.subr.bf16.mxu0 %v9944_v20 }
 0x843   : > { %v9812_v39 = vpop.eup %9811 }
 0x844   : > { %v1307_v40 = vmul.f32 %v9812_v39, %v9810_v24 }
 0x846   : > { %v1308_v44 = vpack.c.bf16 %v1307_v40, %v1307_v40 }
 0x848   : > { %9094 = vmatmul.mubr.msk.bf16.vlgmr.msra.gmra.mxu0 %vm816_vm5, %v1308_v44 }
 0x849   : > { %9104 = vmatpush3.bf16.xpose.msra.mxu0 %v1417_v45  ;;  %9105 = vmatprep.mubr.msk.bf16.mxu0 %vm9945_vm2, %v9944_v20 }
 0x84a   : > { %9115 = vmatprep.subr.bf16.mxu0 %v9944_v20 }
 0x850   : > { %9106 = vmatmul.mubr.msk.bf16.vlgmr.msra.gmra.mxu0 %vm768_vm3, %v1410_v41 }
 0x851   : > { %9117 = vmatprep.mubr.msk.bf16.mxu0 %vm9945_vm2, %v9944_v20  ;;  %9116 = vmatpush3.bf16.msra.mxu0 %v10313_v23 }
 0x852   : > { %9127 = vmatprep.subr.bf16.mxu0 %v9944_v20 }
 0x908   : > { %v1351_v49 = vpop.f32.mrf.mxu0 }
 0x909   : > { %v1357_v50 = vpack.c.bf16 %v1351_v49, %v1351_v49 }
 0x90a   : > { %v9095_v51 = vpop.f32.mrf.mxu0 }
 0x90b   : > { %9100 = vmatmul.mubr.msk.bf16.vlgmr.msra.gmra.mxu1 %vm768_vm3, %v1357_v50 }
 0x90c   : > { %v1354_v52 = vpop.f32.mrf.mxu0  ;;  %9111 = vmatprep.mubr.msk.bf16.mxu1 %vm9945_vm2, %v9944_v20 }
 0x90e   : > { %v9096_v53 = vpop.f32.mrf.mxu0 }
 0x910   : > { %v1453_v54 = vpop.f32.mrf.mxu0 }
 0x911   : > { %v1459_v55 = vmul.f32 0.5, %v1453_v54 }
 0x912   : > { %v9107_v56 = vpop.f32.mrf.mxu0 }
 0x913   : > { %v1460_v57 = vsel %vm816_vm5, %v1459_v55, -inf }
 0x914   : > { %1461 = vmax.xlane.f32.xlu0 %v1460_v57  ;;  %v1456_v58 = vpop.f32.mrf.mxu0 }
 0x916   : > { %v9108_v59 = vpop.f32.mrf.mxu0 }
 0x92a   : > { %1472 = vrot.lane.b32.xlu0 %v10181_v36, %s9954_s16 }
 0x92e   : > { %1568 = vrot.lane.b32.xlu0 %v10162_v27, %s9955_s4 }
 0x99d   : > { %v1462_v60 = vpop.xlane.xlu0 %1461 }
 0x99e   : > { %v1463_v61 = vsub.f32 %v1459_v55, %v1462_v60 }
 0x9a0   : > { %v1464_v62 = vmul.f32 1.442695, %v1463_v61  ;;  %v8365_v61 = vcombine.low %v757_v22, %v757_v22 }
 0x9a1   : > { %v1473_v63 = vpop.permute.xlu0 %1472 }
 0x9a2   : > { %9813 = vpow2.f32 %v1464_v62  ;;  %v1478_v0 = vsel %vm832_vm4, %v1473_v63, 0  ;;  %v1683_v62 = vrot.slane %v8365_v61, 2 }
 0x9a3   : > { %9110 = vmatpush3.bf16.msra.mxu1 %v1478_v0 }
 0x9a4   : > { %9121 = vmatprep.subr.bf16.mxu1 %v9944_v20  ;;  %v10339_v63 = vsel %vm997_vm6, %v1683_v62, 0 }
 0x9a5   : > { %v1569_v18 = vpop.permute.xlu0 %1568 }
 0x9af   : > { %v9814_v1 = vpop.eup %9813 }
 0x9b0   : > { %v1466_v2 = vsel %vm816_vm5, %v9814_v1, 0.0 }
 0x9b1   : > { %1467 = vadd.xlane.f32.xlu1 %v1466_v2 }
 0x9c2   : > { %1570 = vrot.lane.b32.xlu1 %v10162_v27, %s9956_s3 }
 0x9cb   : > { %v1402_v4 = vpop.f32.mrf.mxu1 }
 0x9cc   : > { %v1408_v5 = vadd.f32 %v1402_v4, %v1245_v28 }
 0x9cd   : > { %v9101_v6 = vpop.f32.mrf.mxu1 }
 0x9cf   : > { %v1405_v7 = vpop.f32.mrf.mxu1 }
 0x9d1   : > { %v9102_v9 = vpop.f32.mrf.mxu1 }
 0xa3a   : > { %v1468_v10 = vpop.xlane.xlu1 %1467 }
 0xa3b   : > { %9815 = vrcp.f32 %v1468_v10 }
 0xa3e   : > { %v1571_v15 = vpop.permute.xlu1 %1570 }
 0xa3f   : > { %v1576_v17 = vsel %vm768_vm3, %v1571_v15, 0 }
 0xa48   : > { %v9816_v12 = vpop.eup %9815 }
 0xa49   : > { %v1470_v13 = vmul.f32 %v9816_v12, %v9814_v1 }
 0xa4b   : > { %v1471_v16 = vpack.c.bf16 %v1470_v13, %v1470_v13 }
 0xa4d   : > { %9112 = vmatmul.mubr.msk.bf16.vlgmr.msra.gmra.mxu1 %vm816_vm5, %v1471_v16 }
 0xa4e   : > { %9122 = vmatpush3.bf16.xpose.msra.mxu1 %v1576_v17  ;;  %9123 = vmatprep.mubr.msk.bf16.mxu1 %vm9945_vm2, %v9944_v20 }
 0xa4f   : > { %9133 = vmatprep.subr.bf16.mxu1 %v9944_v20 }
 0xa55   : > { %9124 = vmatmul.mubr.msk.bf16.vlgmr.msra.gmra.mxu1 %vm768_vm3, %v1569_v18 }
 0xa56   : > { %9135 = vmatprep.mubr.msk.bf16.mxu1 %vm9945_vm2, %v9944_v20  ;;  %9134 = vmatpush3.bf16.msra.mxu1 %v10339_v63 }
 0xa57   : > { %9145 = vmatprep.subr.bf16.mxu1 %v9944_v20 }
 0xb0d   : > { %v1514_v24 = vpop.f32.mrf.mxu1 }
 0xb0e   : > { %v1520_v25 = vpack.c.bf16 %v1514_v24, %v1514_v24 }
 0xb0f   : > { %v9113_v26 = vpop.f32.mrf.mxu1 }
 0xb10   : > { %9118 = vmatmul.mubr.msk.bf16.vlgmr.msra.gmra.mxu0 %vm768_vm3, %v1520_v25 }
 0xb11   : > { %v1517_v28 = vpop.f32.mrf.mxu1  ;;  %9129 = vmatprep.mubr.msk.bf16.mxu0 %vm9945_vm2, %v9944_v20 }
 0xb13   : > { %v9114_v32 = vpop.f32.mrf.mxu1 }
 0xb15   : > { %v1612_v33 = vpop.f32.mrf.mxu1 }
 0xb16   : > { %v1618_v34 = vmul.f32 0.5, %v1612_v33 }
 0xb17   : > { %v9125_v35 = vpop.f32.mrf.mxu1 }
 0xb18   : > { %v1619_v37 = vsel %vm816_vm5, %v1618_v34, -inf }
 0xb19   : > { %1620 = vmax.xlane.f32.xlu1 %v1619_v37  ;;  %v1615_v38 = vpop.f32.mrf.mxu1 }
 0xb1b   : > { %v9126_v39 = vpop.f32.mrf.mxu1 }
 0xb2a   : > { %1733 = vrot.lane.b32.xlu1 %v10162_v27, %s11357_s27  ;;  %s11358_s27 = smov 36  }
 0xb2e   : > { %1731 = vrot.lane.b32.xlu1 %v10162_v27, %s11359_s17 }
 0xba2   : > { %v1621_v40 = vpop.xlane.xlu1 %1620 }
 0xba3   : > { %v1622_v43 = vsub.f32 %v1618_v34, %v1621_v40 }
 0xba5   : > { %v1623_v44 = vmul.f32 1.442695, %v1622_v43 }
 0xba6   : > { %v1734_v57 = vpop.permute.xlu1 %1733 }
 0xba7   : > { %9817 = vpow2.f32 %v1623_v44  ;;  %v1739_v59 = vsel %vm768_vm3, %v1734_v57, 0 }
 0xbaa   : > { %v1732_v60 = vpop.permute.xlu1 %1731 }
 0xbb4   : > { %v9818_v45 = vpop.eup %9817 }
 0xbb5   : > { %v1625_v41 = vsel %vm816_vm5, %v9818_v45, 0.0 }
 0xbb6   : > { %1626 = vadd.xlane.f32.xlu0 %v1625_v41 }
 0xbcc   : > { %1631 = vrot.lane.b32.xlu0 %v10181_v36, %s9955_s4 }
 0xbd0   : > { %v1561_v46 = vpop.f32.mrf.mxu0 }
 0xbd1   : > { %v1567_v47 = vadd.f32 %v1561_v46, %v1408_v5 }
 0xbd2   : > { %v9119_v49 = vpop.f32.mrf.mxu0 }
 0xbd4   : > { %v1564_v50 = vpop.f32.mrf.mxu0 }
 0xbd6   : > { %v9120_v51 = vpop.f32.mrf.mxu0 }
 0xc3f   : > { %v1627_v52 = vpop.xlane.xlu0 %1626 }
 0xc40   : > { %9819 = vrcp.f32 %v1627_v52 }
 0xc43   : > { %v1632_v53 = vpop.permute.xlu0 %1631 }
 0xc44   : > { %v1637_v54 = vsel %vm832_vm4, %v1632_v53, 0 }
 0xc45   : > { %9128 = vmatpush3.bf16.msra.mxu0 %v1637_v54 }
 0xc46   : > { %9139 = vmatprep.subr.bf16.mxu0 %v9944_v20 }
 0xc4d   : > { %v9820_v55 = vpop.eup %9819 }
 0xc4e   : > { %v1629_v56 = vmul.f32 %v9820_v55, %v9818_v45  ;;  %v758_v45 = vld [vmem:[%s10086_s14 + $0xc] sm:$0xf] }
 0xc4f   : > { %v10366_v41 = vsel %vm997_vm6, %v758_v45, 0 }
 0xc50   : > { %v1630_v58 = vpack.c.bf16 %v1629_v56, %v1629_v56 }
 0xc52   : > { %9130 = vmatmul.mubr.msk.bf16.vlgmr.msra.gmra.mxu0 %vm816_vm5, %v1630_v58 }
 0xc53   : > { %9140 = vmatpush3.bf16.xpose.msra.mxu0 %v1739_v59  ;;  %9141 = vmatprep.mubr.msk.bf16.mxu0 %vm9945_vm2, %v9944_v20 }
 0xc54   : > { %9151 = vmatprep.subr.bf16.mxu0 %v9944_v20 }
 0xc5a   : > { %9142 = vmatmul.mubr.msk.bf16.vlgmr.msra.gmra.mxu0 %vm768_vm3, %v1732_v60 }
 0xc5b   : > { %9153 = vmatprep.mubr.msk.bf16.mxu0 %vm9945_vm2, %v9944_v20  ;;  %9152 = vmatpush3.bf16.msra.mxu0 %v10366_v41 }
 0xc5c   : > { %9163 = vmatprep.subr.bf16.mxu0 %v9944_v20 }
 0xd12   : > { %v1673_v0 = vpop.f32.mrf.mxu0 }
 0xd13   : > { %v1679_v1 = vpack.c.bf16 %v1673_v0, %v1673_v0 }
 0xd14   : > { %v9131_v2 = vpop.f32.mrf.mxu0 }
 0xd15   : > { %9136 = vmatmul.mubr.msk.bf16.vlgmr.msra.gmra.mxu1 %vm768_vm3, %v1679_v1 }
 0xd16   : > { %v1676_v4 = vpop.f32.mrf.mxu0  ;;  %9147 = vmatprep.mubr.msk.bf16.mxu1 %vm9945_vm2, %v9944_v20 }
 0xd18   : > { %v9132_v5 = vpop.f32.mrf.mxu0 }
 0xd1a   : > { %v1775_v6 = vpop.f32.mrf.mxu0 }
 0xd1b   : > { %v1781_v7 = vmul.f32 0.5, %v1775_v6 }
 0xd1c   : > { %v9143_v9 = vpop.f32.mrf.mxu0 }
 0xd1d   : > { %v1782_v10 = vsel %vm816_vm5, %v1781_v7, -inf }
 0xd1e   : > { %1783 = vmax.xlane.f32.xlu0 %v1782_v10  ;;  %v1778_v12 = vpop.f32.mrf.mxu0 }
 0xd20   : > { %v9144_v13 = vpop.f32.mrf.mxu0 }
 0xd34   : > { %1794 = vrot.lane.b32.xlu0 %v10181_v36, %s11359_s17  ;;  %s11365_s17 = smov 96  }
 0xd38   : > { %1890 = vrot.lane.b32.xlu0 %v10162_v27, %s11362_s21 }
 0xda7   : > { %v1784_v15 = vpop.xlane.xlu0 %1783 }
 0xda8   : > { %v1785_v16 = vsub.f32 %v1781_v7, %v1784_v15 }
 0xdaa   : > { %v1786_v17 = vmul.f32 1.442695, %v1785_v16 }
 0xdab   : > { %v1795_v18 = vpop.permute.xlu0 %1794 }
 0xdac   : > { %9821 = vpow2.f32 %v1786_v17  ;;  %v1800_v22 = vsel %vm832_vm4, %v1795_v18, 0  ;;  %v8372_v18 = vcombine.low %v758_v45, %v758_v45 }
 0xdad   : > { %9146 = vmatpush3.bf16.msra.mxu1 %v1800_v22 }
 0xdae   : > { %9157 = vmatprep.subr.bf16.mxu1 %v9944_v20  ;;  %v2005_v22 = vrot.slane %v8372_v18, 2 }
 0xdaf   : > { %v1891_v44 = vpop.permute.xlu0 %1890 }
 0xdb9   : > { %v9822_v24 = vpop.eup %9821 }
 0xdba   : > { %v1788_v25 = vsel %vm816_vm5, %v9822_v24, 0.0 }
 0xdbb   : > { %1789 = vadd.xlane.f32.xlu1 %v1788_v25 }
 0xdcc   : > { %1892 = vrot.lane.b32.xlu1 %v10162_v27, %s11358_s27  ;;  %s11361_s27 = smov 32  }
 0xdd5   : > { %v1724_v26 = vpop.f32.mrf.mxu1 }
 0xdd6   : > { %v1730_v28 = vadd.f32 %v1724_v26, %v1567_v47 }
 0xdd7   : > { %v9137_v32 = vpop.f32.mrf.mxu1 }
 0xdd9   : > { %v1727_v33 = vpop.f32.mrf.mxu1 }
 0xddb   : > { %v9138_v34 = vpop.f32.mrf.mxu1 }
 0xe44   : > { %v1790_v35 = vpop.xlane.xlu1 %1789 }
 0xe45   : > { %9823 = vrcp.f32 %v1790_v35 }
 0xe48   : > { %v1893_v39 = vpop.permute.xlu1 %1892 }
 0xe49   : > { %v1898_v43 = vsel %vm768_vm3, %v1893_v39, 0 }
 0xe52   : > { %v9824_v37 = vpop.eup %9823 }
 0xe53   : > { %v1792_v38 = vmul.f32 %v9824_v37, %v9822_v24  ;;  %v10392_v24 = vsel %vm997_vm6, %v2005_v22, 0 }
 0xe55   : > { %v1793_v40 = vpack.c.bf16 %v1792_v38, %v1792_v38 }
 0xe57   : > { %9148 = vmatmul.mubr.msk.bf16.vlgmr.msra.gmra.mxu1 %vm816_vm5, %v1793_v40 }
 0xe58   : > { %9158 = vmatpush3.bf16.xpose.msra.mxu1 %v1898_v43  ;;  %9159 = vmatprep.mubr.msk.bf16.mxu1 %vm9945_vm2, %v9944_v20 }
 0xe59   : > { %9169 = vmatprep.subr.bf16.mxu1 %v9944_v20 }
 0xe5f   : > { %9160 = vmatmul.mubr.msk.bf16.vlgmr.msra.gmra.mxu1 %vm768_vm3, %v1891_v44 }
 0xe60   : > { %9171 = vmatprep.mubr.msk.bf16.mxu1 %vm9945_vm2, %v9944_v20  ;;  %9170 = vmatpush3.bf16.msra.mxu1 %v10392_v24 }
 0xe61   : > { %9181 = vmatprep.subr.bf16.mxu1 %v9944_v20 }
 0xf17   : > { %v1836_v46 = vpop.f32.mrf.mxu1 }
 0xf18   : > { %v1842_v47 = vpack.c.bf16 %v1836_v46, %v1836_v46 }
 0xf19   : > { %v9149_v49 = vpop.f32.mrf.mxu1 }
 0xf1a   : > { %9154 = vmatmul.mubr.msk.bf16.vlgmr.msra.gmra.mxu0 %vm768_vm3, %v1842_v47 }
 0xf1b   : > { %v1839_v50 = vpop.f32.mrf.mxu1  ;;  %9165 = vmatprep.mubr.msk.bf16.mxu0 %vm9945_vm2, %v9944_v20 }
 0xf1d   : > { %v9150_v51 = vpop.f32.mrf.mxu1 }
 0xf1f   : > { %v1934_v52 = vpop.f32.mrf.mxu1 }
 0xf20   : > { %v1940_v53 = vmul.f32 0.5, %v1934_v52 }
 0xf21   : > { %v9161_v54 = vpop.f32.mrf.mxu1 }
 0xf22   : > { %v1941_v55 = vsel %vm816_vm5, %v1940_v53, -inf }
 0xf23   : > { %1942 = vmax.xlane.f32.xlu1 %v1941_v55  ;;  %v1937_v56 = vpop.f32.mrf.mxu1 }
 0xf25   : > { %v9162_v57 = vpop.f32.mrf.mxu1 }
 0xf34   : > { %2055 = vrot.lane.b32.xlu1 %v10162_v27, %s11361_s27  ;;  %s11368_s27 = smov 92  }
 0xf38   : > { %2053 = vrot.lane.b32.xlu1 %v10162_v27, %s11365_s17 }
 0xfac   : > { %v1943_v58 = vpop.xlane.xlu1 %1942 }
 0xfad   : > { %v1944_v59 = vsub.f32 %v1940_v53, %v1943_v58 }
 0xfaf   : > { %v1945_v60 = vmul.f32 1.442695, %v1944_v59 }
 0xfb0   : > { %v2056_v13 = vpop.permute.xlu1 %2055 }
 0xfb1   : > { %9825 = vpow2.f32 %v1945_v60  ;;  %v2061_v16 = vsel %vm768_vm3, %v2056_v13, 0 }
 0xfb4   : > { %v2054_v17 = vpop.permute.xlu1 %2053 }
 0xfbe   : > { %v9826_v61 = vpop.eup %9825 }
 0xfbf   : > { %v1947_v62 = vsel %vm816_vm5, %v9826_v61, 0.0 }
 0xfc0   : > { %1948 = vadd.xlane.f32.xlu0 %v1947_v62 }
 0xfd6   : > { %1953 = vrot.lane.b32.xlu0 %v10181_v36, %s11362_s21  ;;  %s11364_s21 = smov 28  }
 0xfda   : > { %v1883_v0 = vpop.f32.mrf.mxu0 }
 0xfdb   : > { %v1889_v1 = vadd.f32 %v1883_v0, %v1730_v28  ;;  %v759_v0 = vld [vmem:[%s10086_s14 + $0x10] sm:$0xf] }
 0xfdc   : > { %v9155_v2 = vpop.f32.mrf.mxu0 }
 0xfde   : > { %v1886_v4 = vpop.f32.mrf.mxu0 }
 0xfe0   : > { %v9156_v5 = vpop.f32.mrf.mxu0 }
0x1049   : > { %v1949_v6 = vpop.xlane.xlu0 %1948 }
0x104a   : > { %9827 = vrcp.f32 %v1949_v6 }
0x104d   : > { %v1954_v7 = vpop.permute.xlu0 %1953 }
0x104e   : > { %v1959_v9 = vsel %vm832_vm4, %v1954_v7, 0 }
0x104f   : > { %9164 = vmatpush3.bf16.msra.mxu0 %v1959_v9 }
0x1050   : > { %9175 = vmatprep.subr.bf16.mxu0 %v9944_v20 }
0x1057   : > { %v9828_v10 = vpop.eup %9827 }
0x1058   : > { %v1951_v12 = vmul.f32 %v9828_v10, %v9826_v61 }
0x105a   : > { %v1952_v15 = vpack.c.bf16 %v1951_v12, %v1951_v12 }
0x105c   : > { %9166 = vmatmul.mubr.msk.bf16.vlgmr.msra.gmra.mxu0 %vm816_vm5, %v1952_v15 }
0x105d   : > { %9176 = vmatpush3.bf16.xpose.msra.mxu0 %v2061_v16  ;;  %9177 = vmatprep.mubr.msk.bf16.mxu0 %vm9945_vm2, %v9944_v20 }
0x105e   : > { %9187 = vmatprep.subr.bf16.mxu0 %v9944_v20 }
0x1064   : > { %9178 = vmatmul.mubr.msk.bf16.vlgmr.msra.gmra.mxu0 %vm768_vm3, %v2054_v17 }
0x1065   : > { %9189 = vmatprep.mubr.msk.bf16.mxu0 %vm9945_vm2, %v9944_v20 }
0x111c   : > { %v1995_v25 = vpop.f32.mrf.mxu0 }
0x111d   : > { %v2001_v26 = vpack.c.bf16 %v1995_v25, %v1995_v25 }
0x111e   : > { %v9167_v28 = vpop.f32.mrf.mxu0 }
0x111f   : > { %9172 = vmatmul.mubr.msk.bf16.vlgmr.msra.gmra.mxu1 %vm768_vm3, %v2001_v26 }
0x1120   : > { %v1998_v32 = vpop.f32.mrf.mxu0  ;;  %9183 = vmatprep.mubr.msk.bf16.mxu1 %vm9945_vm2, %v9944_v20 }
0x1122   : > { %v9168_v33 = vpop.f32.mrf.mxu0 }
0x1124   : > { %v2097_v34 = vpop.f32.mrf.mxu0 }
0x1125   : > { %v2103_v35 = vmul.f32 0.5, %v2097_v34 }
0x1126   : > { %v9179_v37 = vpop.f32.mrf.mxu0 }
0x1127   : > { %v2104_v38 = vsel %vm816_vm5, %v2103_v35, -inf }
0x1128   : > { %2105 = vmax.xlane.f32.xlu0 %v2104_v38  ;;  %v2100_v39 = vpop.f32.mrf.mxu0 }
0x112a   : > { %v9180_v40 = vpop.f32.mrf.mxu0 }
0x113e   : > { %2116 = vrot.lane.b32.xlu0 %v10181_v36, %s11365_s17  ;;  %s11371_s17 = smov 88  }
0x1142   : > { %2212 = vrot.lane.b32.xlu0 %v10162_v27, %s11368_s27 }
0x11b1   : > { %v2106_v43 = vpop.xlane.xlu0 %2105 }
0x11b2   : > { %v2107_v44 = vsub.f32 %v2103_v35, %v2106_v43 }
0x11b4   : > { %v2108_v45 = vmul.f32 1.442695, %v2107_v44 }
0x11b5   : > { %v2117_v46 = vpop.permute.xlu0 %2116 }
0x11b6   : > { %9829 = vpow2.f32 %v2108_v45  ;;  %v2122_v47 = vsel %vm832_vm4, %v2117_v46, 0 }
0x11b7   : > { %9182 = vmatpush3.bf16.msra.mxu1 %v2122_v47 }
0x11b8   : > { %9193 = vmatprep.subr.bf16.mxu1 %v9944_v20 }
0x11b9   : > { %v2213_v62 = vpop.permute.xlu0 %2212 }
0x11c3   : > { %v9830_v49 = vpop.eup %9829 }
0x11c4   : > { %v2110_v50 = vsel %vm816_vm5, %v9830_v49, 0.0 }
0x11c5   : > { %2111 = vadd.xlane.f32.xlu1 %v2110_v50 }
0x11d6   : > { %2214 = vrot.lane.b32.xlu1 %v10162_v27, %s11364_s21  ;;  %s11367_s21 = smov 24  }
0x11df   : > { %v2046_v51 = vpop.f32.mrf.mxu1 }
0x11e0   : > { %v2052_v52 = vadd.f32 %v2046_v51, %v1889_v1  ;;  %v10419_v1 = vsel %vm997_vm6, %v759_v0, 0 }
0x11e1   : > { %v9173_v53 = vpop.f32.mrf.mxu1  ;;  %9188 = vmatpush3.bf16.msra.mxu0 %v10419_v1 }
0x11e2   : > { %9199 = vmatprep.subr.bf16.mxu0 %v9944_v20 }
0x11e3   : > { %v2049_v54 = vpop.f32.mrf.mxu1 }
0x11e5   : > { %v9174_v55 = vpop.f32.mrf.mxu1 }
0x124e   : > { %v2112_v56 = vpop.xlane.xlu1 %2111 }
0x124f   : > { %9831 = vrcp.f32 %v2112_v56 }
0x1252   : > { %v2215_v59 = vpop.permute.xlu1 %2214 }
0x1253   : > { %v2220_v61 = vsel %vm768_vm3, %v2215_v59, 0 }
0x125c   : > { %v9832_v57 = vpop.eup %9831 }
0x125d   : > { %v2114_v58 = vmul.f32 %v9832_v57, %v9830_v49  ;;  %v8379_v49 = vcombine.low %v759_v0, %v759_v0 }
0x125f   : > { %v2115_v60 = vpack.c.bf16 %v2114_v58, %v2114_v58  ;;  %v2327_v50 = vrot.slane %v8379_v49, 2 }
0x1261   : > { %9184 = vmatmul.mubr.msk.bf16.vlgmr.msra.gmra.mxu1 %vm816_vm5, %v2115_v60  ;;  %v10445_v51 = vsel %vm997_vm6, %v2327_v50, 0 }
0x1262   : > { %9194 = vmatpush3.bf16.xpose.msra.mxu1 %v2220_v61  ;;  %9195 = vmatprep.mubr.msk.bf16.mxu1 %vm9945_vm2, %v9944_v20 }
0x1263   : > { %9205 = vmatprep.subr.bf16.mxu1 %v9944_v20 }
0x1269   : > { %9196 = vmatmul.mubr.msk.bf16.vlgmr.msra.gmra.mxu1 %vm768_vm3, %v2213_v62 }
0x126a   : > { %9207 = vmatprep.mubr.msk.bf16.mxu1 %vm9945_vm2, %v9944_v20  ;;  %9206 = vmatpush3.bf16.msra.mxu1 %v10445_v51 }
0x126b   : > { %9217 = vmatprep.subr.bf16.mxu1 %v9944_v20 }
0x1321   : > { %v2158_v2 = vpop.f32.mrf.mxu1 }
0x1322   : > { %v2164_v4 = vpack.c.bf16 %v2158_v2, %v2158_v2 }
0x1323   : > { %v9185_v5 = vpop.f32.mrf.mxu1 }
0x1324   : > { %9190 = vmatmul.mubr.msk.bf16.vlgmr.msra.gmra.mxu0 %vm768_vm3, %v2164_v4 }
0x1325   : > { %v2161_v6 = vpop.f32.mrf.mxu1  ;;  %9201 = vmatprep.mubr.msk.bf16.mxu0 %vm9945_vm2, %v9944_v20 }
0x1327   : > { %v9186_v7 = vpop.f32.mrf.mxu1 }
0x1329   : > { %v2256_v9 = vpop.f32.mrf.mxu1 }
0x132a   : > { %v2262_v10 = vmul.f32 0.5, %v2256_v9 }
0x132b   : > { %v9197_v12 = vpop.f32.mrf.mxu1 }
0x132c   : > { %v2263_v13 = vsel %vm816_vm5, %v2262_v10, -inf }
0x132d   : > { %2264 = vmax.xlane.f32.xlu1 %v2263_v13  ;;  %v2259_v15 = vpop.f32.mrf.mxu1 }
0x132f   : > { %v9198_v16 = vpop.f32.mrf.mxu1 }
0x133e   : > { %2377 = vrot.lane.b32.xlu1 %v10162_v27, %s11367_s21  ;;  %s11374_s21 = smov 84  }
0x1342   : > { %2375 = vrot.lane.b32.xlu1 %v10162_v27, %s11371_s17 }
0x13b6   : > { %v2265_v17 = vpop.xlane.xlu1 %2264 }
0x13b7   : > { %v2266_v18 = vsub.f32 %v2262_v10, %v2265_v17 }
0x13b9   : > { %v2267_v22 = vmul.f32 1.442695, %v2266_v18 }
0x13ba   : > { %v2378_v44 = vpop.permute.xlu1 %2377 }
0x13bb   : > { %9833 = vpow2.f32 %v2267_v22  ;;  %v2383_v46 = vsel %vm768_vm3, %v2378_v44, 0 }
0x13be   : > { %v2376_v47 = vpop.permute.xlu1 %2375 }
0x13c8   : > { %v9834_v25 = vpop.eup %9833 }
0x13c9   : > { %v2269_v26 = vsel %vm816_vm5, %v9834_v25, 0.0 }
0x13ca   : > { %2270 = vadd.xlane.f32.xlu0 %v2269_v26 }
0x13e0   : > { %2275 = vrot.lane.b32.xlu0 %v10181_v36, %s11368_s27  ;;  %s11370_s27 = smov 20  }
0x13e4   : > { %v2205_v28 = vpop.f32.mrf.mxu0 }
0x13e5   : > { %v2211_v32 = vadd.f32 %v2205_v28, %v2052_v52 }
0x13e6   : > { %v9191_v33 = vpop.f32.mrf.mxu0 }
0x13e7   : > { %v760_v33 = vld [vmem:[%s10086_s14 + $0x14] sm:$0xf] }
0x13e8   : > { %v2208_v34 = vpop.f32.mrf.mxu0 }
0x13e9   : > { %v10472_v34 = vsel %vm997_vm6, %v760_v33, 0 }
0x13ea   : > { %v9192_v35 = vpop.f32.mrf.mxu0 }
0x1453   : > { %v2271_v37 = vpop.xlane.xlu0 %2270 }
0x1454   : > { %9835 = vrcp.f32 %v2271_v37 }
0x1457   : > { %v2276_v38 = vpop.permute.xlu0 %2275 }
0x1458   : > { %v2281_v39 = vsel %vm832_vm4, %v2276_v38, 0 }
0x1459   : > { %9200 = vmatpush3.bf16.msra.mxu0 %v2281_v39 }
0x145a   : > { %9211 = vmatprep.subr.bf16.mxu0 %v9944_v20 }
0x1461   : > { %v9836_v40 = vpop.eup %9835 }
0x1462   : > { %v2273_v43 = vmul.f32 %v9836_v40, %v9834_v25 }
0x1464   : > { %v2274_v45 = vpack.c.bf16 %v2273_v43, %v2273_v43 }
0x1466   : > { %9202 = vmatmul.mubr.msk.bf16.vlgmr.msra.gmra.mxu0 %vm816_vm5, %v2274_v45 }
0x1467   : > { %9212 = vmatpush3.bf16.xpose.msra.mxu0 %v2383_v46  ;;  %9213 = vmatprep.mubr.msk.bf16.mxu0 %vm9945_vm2, %v9944_v20 }
0x1468   : > { %9223 = vmatprep.subr.bf16.mxu0 %v9944_v20 }
0x146e   : > { %9214 = vmatmul.mubr.msk.bf16.vlgmr.msra.gmra.mxu0 %vm768_vm3, %v2376_v47 }
0x146f   : > { %9225 = vmatprep.mubr.msk.bf16.mxu0 %vm9945_vm2, %v9944_v20  ;;  %9224 = vmatpush3.bf16.msra.mxu0 %v10472_v34 }
0x1470   : > { %9235 = vmatprep.subr.bf16.mxu0 %v9944_v20 }
0x1526   : > { %v2317_v52 = vpop.f32.mrf.mxu0 }
0x1527   : > { %v2323_v53 = vpack.c.bf16 %v2317_v52, %v2317_v52 }
0x1528   : > { %v9203_v54 = vpop.f32.mrf.mxu0 }
0x1529   : > { %9208 = vmatmul.mubr.msk.bf16.vlgmr.msra.gmra.mxu1 %vm768_vm3, %v2323_v53 }
0x152a   : > { %v2320_v55 = vpop.f32.mrf.mxu0  ;;  %9219 = vmatprep.mubr.msk.bf16.mxu1 %vm9945_vm2, %v9944_v20 }
0x152c   : > { %v9204_v56 = vpop.f32.mrf.mxu0 }
0x152e   : > { %v2419_v57 = vpop.f32.mrf.mxu0 }
0x152f   : > { %v2425_v58 = vmul.f32 0.5, %v2419_v57 }
0x1530   : > { %v9215_v59 = vpop.f32.mrf.mxu0 }
0x1531   : > { %v2426_v60 = vsel %vm816_vm5, %v2425_v58, -inf }
0x1532   : > { %2427 = vmax.xlane.f32.xlu0 %v2426_v60  ;;  %v2422_v61 = vpop.f32.mrf.mxu0 }
0x1534   : > { %v9216_v62 = vpop.f32.mrf.mxu0 }
0x1548   : > { %2438 = vrot.lane.b32.xlu0 %v10181_v36, %s11371_s17  ;;  %s11377_s17 = smov 80  }
0x154c   : > { %2534 = vrot.lane.b32.xlu0 %v10162_v27, %s11374_s21 }
0x15bb   : > { %v2428_v0 = vpop.xlane.xlu0 %2427 }
0x15bc   : > { %v2429_v2 = vsub.f32 %v2425_v58, %v2428_v0 }
0x15be   : > { %v2430_v4 = vmul.f32 1.442695, %v2429_v2 }
0x15bf   : > { %v2439_v5 = vpop.permute.xlu0 %2438 }
0x15c0   : > { %9837 = vpow2.f32 %v2430_v4  ;;  %v2444_v6 = vsel %vm832_vm4, %v2439_v5, 0 }
0x15c1   : > { %9218 = vmatpush3.bf16.msra.mxu1 %v2444_v6 }
0x15c2   : > { %9229 = vmatprep.subr.bf16.mxu1 %v9944_v20 }
0x15cd   : > { %v9838_v7 = vpop.eup %9837 }
0x15ce   : > { %v2432_v9 = vsel %vm816_vm5, %v9838_v7, 0.0 }
0x15cf   : > { %2433 = vadd.xlane.f32.xlu1 %v2432_v9 }
0x15e0   : > { %2536 = vrot.lane.b32.xlu1 %v10162_v27, %s11370_s27  ;;  %s11373_s27 = smov 16  }
0x15e9   : > { %v2368_v10 = vpop.f32.mrf.mxu1 }
0x15ea   : > { %v2374_v12 = vadd.f32 %v2368_v10, %v2211_v32  ;;  %v2535_v32 = vpop.permute.xlu0 %2534  ;;  %v8386_v10 = vcombine.low %v760_v33, %v760_v33 }
0x15eb   : > { %v9209_v13 = vpop.f32.mrf.mxu1 }
0x15ed   : > { %v2371_v15 = vpop.f32.mrf.mxu1 }
0x15ef   : > { %v9210_v16 = vpop.f32.mrf.mxu1 }
0x1658   : > { %v2434_v17 = vpop.xlane.xlu1 %2433 }
0x1659   : > { %9839 = vrcp.f32 %v2434_v17 }
0x165c   : > { %v2537_v25 = vpop.permute.xlu1 %2536 }
0x165d   : > { %v2542_v28 = vsel %vm768_vm3, %v2537_v25, 0 }
0x1666   : > { %v9840_v18 = vpop.eup %9839 }
0x1667   : > { %v2436_v22 = vmul.f32 %v9840_v18, %v9838_v7 }
0x1669   : > { %v2437_v26 = vpack.c.bf16 %v2436_v22, %v2436_v22 }
0x166b   : > { %9220 = vmatmul.mubr.msk.bf16.vlgmr.msra.gmra.mxu1 %vm816_vm5, %v2437_v26 }
0x166c   : > { %9230 = vmatpush3.bf16.xpose.msra.mxu1 %v2542_v28  ;;  %9231 = vmatprep.mubr.msk.bf16.mxu1 %vm9945_vm2, %v9944_v20 }
0x166d   : > { %9241 = vmatprep.subr.bf16.mxu1 %v9944_v20 }
0x1673   : > { %9232 = vmatmul.mubr.msk.bf16.vlgmr.msra.gmra.mxu1 %vm768_vm3, %v2535_v32 }
0x1674   : > { %9243 = vmatprep.mubr.msk.bf16.mxu1 %vm9945_vm2, %v9944_v20 }
0x172b   : > { %v2480_v35 = vpop.f32.mrf.mxu1 }
0x172c   : > { %v2486_v37 = vpack.c.bf16 %v2480_v35, %v2480_v35 }
0x172d   : > { %v9221_v38 = vpop.f32.mrf.mxu1 }
0x172e   : > { %9226 = vmatmul.mubr.msk.bf16.vlgmr.msra.gmra.mxu0 %vm768_vm3, %v2486_v37 }
0x172f   : > { %v2483_v39 = vpop.f32.mrf.mxu1  ;;  %9237 = vmatprep.mubr.msk.bf16.mxu0 %vm9945_vm2, %v9944_v20 }
0x1731   : > { %v9222_v40 = vpop.f32.mrf.mxu1 }
0x1733   : > { %v2578_v43 = vpop.f32.mrf.mxu1 }
0x1734   : > { %v2584_v44 = vmul.f32 0.5, %v2578_v43 }
0x1735   : > { %v9233_v45 = vpop.f32.mrf.mxu1 }
0x1736   : > { %v2585_v46 = vsel %vm816_vm5, %v2584_v44, -inf }
0x1737   : > { %2586 = vmax.xlane.f32.xlu1 %v2585_v46  ;;  %v2581_v47 = vpop.f32.mrf.mxu1 }
0x1739   : > { %v9234_v49 = vpop.f32.mrf.mxu1 }
0x1748   : > { %2699 = vrot.lane.b32.xlu1 %v10162_v27, %s11373_s27  ;;  %s11380_s27 = smov 76  }
0x174c   : > { %2697 = vrot.lane.b32.xlu1 %v10162_v27, %s11377_s17 }
0x17c0   : > { %v2587_v50 = vpop.xlane.xlu1 %2586 }
0x17c1   : > { %v2588_v52 = vsub.f32 %v2584_v44, %v2587_v50 }
0x17c3   : > { %v2589_v53 = vmul.f32 1.442695, %v2588_v52 }
0x17c4   : > { %v2700_v5 = vpop.permute.xlu1 %2699 }
0x17c5   : > { %9841 = vpow2.f32 %v2589_v53  ;;  %v2705_v7 = vsel %vm768_vm3, %v2700_v5, 0 }
0x17c8   : > { %v2698_v9 = vpop.permute.xlu1 %2697 }
0x17d2   : > { %v9842_v54 = vpop.eup %9841 }
0x17d3   : > { %v2591_v55 = vsel %vm816_vm5, %v9842_v54, 0.0 }
0x17d4   : > { %2592 = vadd.xlane.f32.xlu0 %v2591_v55 }
0x17ea   : > { %2597 = vrot.lane.b32.xlu0 %v10181_v36, %s11374_s21  ;;  %s11376_s21 = smov 12  }
0x17ee   : > { %v2527_v56 = vpop.f32.mrf.mxu0 }
0x17ef   : > { %v2533_v57 = vadd.f32 %v2527_v56, %v2374_v12  ;;  %v2649_v12 = vrot.slane %v8386_v10, 2 }
0x17f0   : > { %v9227_v58 = vpop.f32.mrf.mxu0 }
0x17f1   : > { %v10498_v13 = vsel %vm997_vm6, %v2649_v12, 0 }
0x17f2   : > { %v2530_v59 = vpop.f32.mrf.mxu0  ;;  %9242 = vmatpush3.bf16.msra.mxu1 %v10498_v13 }
0x17f3   : > { %9253 = vmatprep.subr.bf16.mxu1 %v9944_v20 }
0x17f4   : > { %v9228_v60 = vpop.f32.mrf.mxu0 }
0x17f5   : > { %v761_v60 = vld [vmem:[%s10086_s14 + $0x18] sm:$0xf] }
0x185d   : > { %v2593_v61 = vpop.xlane.xlu0 %2592 }
0x185e   : > { %9843 = vrcp.f32 %v2593_v61  ;;  %v10525_v61 = vsel %vm997_vm6, %v761_v60, 0 }
0x1861   : > { %v2598_v62 = vpop.permute.xlu0 %2597 }
0x1862   : > { %v2603_v0 = vsel %vm832_vm4, %v2598_v62, 0 }
0x1863   : > { %9236 = vmatpush3.bf16.msra.mxu0 %v2603_v0 }
0x1864   : > { %9247 = vmatprep.subr.bf16.mxu0 %v9944_v20 }
0x186b   : > { %v9844_v2 = vpop.eup %9843 }
0x186c   : > { %v2595_v4 = vmul.f32 %v9844_v2, %v9842_v54 }
0x186e   : > { %v2596_v6 = vpack.c.bf16 %v2595_v4, %v2595_v4 }
0x1870   : > { %9238 = vmatmul.mubr.msk.bf16.vlgmr.msra.gmra.mxu0 %vm816_vm5, %v2596_v6 }
0x1871   : > { %9248 = vmatpush3.bf16.xpose.msra.mxu0 %v2705_v7  ;;  %9249 = vmatprep.mubr.msk.bf16.mxu0 %vm9945_vm2, %v9944_v20 }
0x1872   : > { %9259 = vmatprep.subr.bf16.mxu0 %v9944_v20 }
0x1878   : > { %9250 = vmatmul.mubr.msk.bf16.vlgmr.msra.gmra.mxu0 %vm768_vm3, %v2698_v9 }
0x1879   : > { %9261 = vmatprep.mubr.msk.bf16.mxu0 %vm9945_vm2, %v9944_v20  ;;  %9260 = vmatpush3.bf16.msra.mxu0 %v10525_v61 }
0x187a   : > { %9271 = vmatprep.subr.bf16.mxu0 %v9944_v20 }
0x1930   : > { %v2639_v15 = vpop.f32.mrf.mxu0 }
0x1931   : > { %v2645_v16 = vpack.c.bf16 %v2639_v15, %v2639_v15 }
0x1932   : > { %v9239_v17 = vpop.f32.mrf.mxu0 }
0x1933   : > { %9244 = vmatmul.mubr.msk.bf16.vlgmr.msra.gmra.mxu1 %vm768_vm3, %v2645_v16 }
0x1934   : > { %v2642_v18 = vpop.f32.mrf.mxu0  ;;  %9255 = vmatprep.mubr.msk.bf16.mxu1 %vm9945_vm2, %v9944_v20 }
0x1936   : > { %v9240_v22 = vpop.f32.mrf.mxu0 }
0x1938   : > { %v2741_v25 = vpop.f32.mrf.mxu0 }
0x1939   : > { %v2747_v26 = vmul.f32 0.5, %v2741_v25 }
0x193a   : > { %v9251_v28 = vpop.f32.mrf.mxu0 }
0x193b   : > { %v2748_v32 = vsel %vm816_vm5, %v2747_v26, -inf }
0x193c   : > { %2749 = vmax.xlane.f32.xlu0 %v2748_v32  ;;  %v2744_v33 = vpop.f32.mrf.mxu0 }
0x193e   : > { %v9252_v35 = vpop.f32.mrf.mxu0 }
0x1952   : > { %2760 = vrot.lane.b32.xlu0 %v10181_v36, %s11377_s17  ;;  %s9974_s17 = smov 72  }
0x1956   : > { %2856 = vrot.lane.b32.xlu0 %v10162_v27, %s11380_s27 }
0x19c5   : > { %v2750_v37 = vpop.xlane.xlu0 %2749 }
0x19c6   : > { %v2751_v38 = vsub.f32 %v2747_v26, %v2750_v37 }
0x19c8   : > { %v2752_v39 = vmul.f32 1.442695, %v2751_v38 }
0x19c9   : > { %v2761_v40 = vpop.permute.xlu0 %2760 }
0x19ca   : > { %9845 = vpow2.f32 %v2752_v39  ;;  %v2766_v43 = vsel %vm832_vm4, %v2761_v40, 0 }
0x19cb   : > { %9254 = vmatpush3.bf16.msra.mxu1 %v2766_v43 }
0x19cc   : > { %9265 = vmatprep.subr.bf16.mxu1 %v9944_v20 }
0x19d7   : > { %v9846_v44 = vpop.eup %9845 }
0x19d8   : > { %v2754_v45 = vsel %vm816_vm5, %v9846_v44, 0.0 }
0x19d9   : > { %2755 = vadd.xlane.f32.xlu1 %v2754_v45 }
0x19ea   : > { %2858 = vrot.lane.b32.xlu1 %v10162_v27, %s11376_s21  ;;  %s11379_s21 = smov 8  }
0x19f3   : > { %v2690_v46 = vpop.f32.mrf.mxu1 }
0x19f4   : > { %v2696_v47 = vadd.f32 %v2690_v46, %v2533_v57  ;;  %v2857_v57 = vpop.permute.xlu0 %2856 }
0x19f5   : > { %v9245_v49 = vpop.f32.mrf.mxu1 }
0x19f6   : > { %v8393_v49 = vcombine.low %v761_v60, %v761_v60 }
0x19f7   : > { %v2693_v50 = vpop.f32.mrf.mxu1 }
0x19f8   : > { %v2971_v50 = vrot.slane %v8393_v49, 2 }
0x19f9   : > { %v9246_v52 = vpop.f32.mrf.mxu1 }
0x19fa   : > { %v10551_v52 = vsel %vm997_vm6, %v2971_v50, 0 }
0x1a62   : > { %v2756_v53 = vpop.xlane.xlu1 %2755 }
0x1a63   : > { %9847 = vrcp.f32 %v2756_v53 }
0x1a66   : > { %v2859_v56 = vpop.permute.xlu1 %2858 }
0x1a67   : > { %v2864_v59 = vsel %vm768_vm3, %v2859_v56, 0 }
0x1a70   : > { %v9848_v54 = vpop.eup %9847 }
0x1a71   : > { %v2758_v55 = vmul.f32 %v9848_v54, %v9846_v44 }
0x1a73   : > { %v2759_v58 = vpack.c.bf16 %v2758_v55, %v2758_v55 }
0x1a75   : > { %9256 = vmatmul.mubr.msk.bf16.vlgmr.msra.gmra.mxu1 %vm816_vm5, %v2759_v58 }
0x1a76   : > { %9266 = vmatpush3.bf16.xpose.msra.mxu1 %v2864_v59  ;;  %9267 = vmatprep.mubr.msk.bf16.mxu1 %vm9945_vm2, %v9944_v20 }
0x1a77   : > { %9277 = vmatprep.subr.bf16.mxu1 %v9944_v20 }
0x1a7d   : > { %9268 = vmatmul.mubr.msk.bf16.vlgmr.msra.gmra.mxu1 %vm768_vm3, %v2857_v57 }
0x1a7e   : > { %9279 = vmatprep.mubr.msk.bf16.mxu1 %vm9945_vm2, %v9944_v20  ;;  %9278 = vmatpush3.bf16.msra.mxu1 %v10551_v52 }
0x1a7f   : > { %9289 = vmatprep.subr.bf16.mxu1 %v9944_v20 }
0x1b35   : > { %v2802_v62 = vpop.f32.mrf.mxu1 }
0x1b36   : > { %v2808_v0 = vpack.c.bf16 %v2802_v62, %v2802_v62 }
0x1b37   : > { %v9257_v2 = vpop.f32.mrf.mxu1 }
0x1b38   : > { %9262 = vmatmul.mubr.msk.bf16.vlgmr.msra.gmra.mxu0 %vm768_vm3, %v2808_v0 }
0x1b39   : > { %v2805_v4 = vpop.f32.mrf.mxu1  ;;  %9273 = vmatprep.mubr.msk.bf16.mxu0 %vm9945_vm2, %v9944_v20 }
0x1b3b   : > { %v9258_v5 = vpop.f32.mrf.mxu1 }
0x1b3d   : > { %v2900_v6 = vpop.f32.mrf.mxu1 }
0x1b3e   : > { %v2906_v7 = vmul.f32 0.5, %v2900_v6 }
0x1b3f   : > { %v9269_v9 = vpop.f32.mrf.mxu1 }
0x1b40   : > { %v2907_v10 = vsel %vm816_vm5, %v2906_v7, -inf }
0x1b41   : > { %2908 = vmax.xlane.f32.xlu1 %v2907_v10  ;;  %v2903_v12 = vpop.f32.mrf.mxu1 }
0x1b43   : > { %v9270_v15 = vpop.f32.mrf.mxu1 }
0x1b52   : > { %3021 = vrot.lane.b32.xlu1 %v10162_v27, %s11379_s21  ;;  %s9975_s21 = smov 68  }
0x1b56   : > { %3019 = vrot.lane.b32.xlu1 %v10162_v27, %s9974_s17 }
0x1bca   : > { %v2909_v16 = vpop.xlane.xlu1 %2908 }
0x1bcb   : > { %v2910_v17 = vsub.f32 %v2906_v7, %v2909_v16 }
0x1bcd   : > { %v2911_v18 = vmul.f32 1.442695, %v2910_v17 }
0x1bce   : > { %v3022_v44 = vpop.permute.xlu1 %3021 }
0x1bcf   : > { %9849 = vpow2.f32 %v2911_v18  ;;  %v3027_v46 = vsel %vm768_vm3, %v3022_v44, 0 }
0x1bdc   : > { %v9850_v22 = vpop.eup %9849 }
0x1bdd   : > { %v2913_v25 = vsel %vm816_vm5, %v9850_v22, 0.0 }
0x1bde   : > { %2914 = vadd.xlane.f32.xlu0 %v2913_v25 }
0x1bf4   : > { %2919 = vrot.lane.b32.xlu0 %v10181_v36, %s11380_s27  ;;  %s9976_s27 = smov 4  }
0x1bf8   : > { %v2849_v26 = vpop.f32.mrf.mxu0 }
0x1bf9   : > { %v2855_v28 = vadd.f32 %v2849_v26, %v2696_v47  ;;  %v3020_v47 = vpop.permute.xlu1 %3019 }
0x1bfa   : > { %v9263_v32 = vpop.f32.mrf.mxu0 }
0x1bfc   : > { %v2852_v33 = vpop.f32.mrf.mxu0 }
0x1bfe   : > { %v9264_v35 = vpop.f32.mrf.mxu0 }
0x1c67   : > { %v2915_v37 = vpop.xlane.xlu0 %2914 }
0x1c68   : > { %9851 = vrcp.f32 %v2915_v37 }
0x1c6b   : > { %v2920_v38 = vpop.permute.xlu0 %2919 }
0x1c6c   : > { %v2925_v39 = vsel %vm832_vm4, %v2920_v38, 0 }
0x1c6d   : > { %9272 = vmatpush3.bf16.msra.mxu0 %v2925_v39 }
0x1c6e   : > { %9283 = vmatprep.subr.bf16.mxu0 %v9944_v20 }
0x1c75   : > { %v9852_v40 = vpop.eup %9851 }
0x1c76   : > { %v2917_v43 = vmul.f32 %v9852_v40, %v9850_v22 }
0x1c78   : > { %v2918_v45 = vpack.c.bf16 %v2917_v43, %v2917_v43 }
0x1c7a   : > { %9274 = vmatmul.mubr.msk.bf16.vlgmr.msra.gmra.mxu0 %vm816_vm5, %v2918_v45 }
0x1c7b   : > { %9284 = vmatpush3.bf16.xpose.msra.mxu0 %v3027_v46  ;;  %9285 = vmatprep.mubr.msk.bf16.mxu0 %vm9945_vm2, %v9944_v20 }
0x1c7c   : > { %9295 = vmatprep.subr.bf16.mxu0 %v9944_v20 }
0x1c82   : > { %9286 = vmatmul.mubr.msk.bf16.vlgmr.msra.gmra.mxu0 %vm768_vm3, %v3020_v47 }
0x1c83   : > { %9297 = vmatprep.mubr.msk.bf16.mxu0 %vm9945_vm2, %v9944_v20 }
0x1d3a   : > { %v2961_v53 = vpop.f32.mrf.mxu0 }
0x1d3b   : > { %v2967_v54 = vpack.c.bf16 %v2961_v53, %v2961_v53 }
0x1d3c   : > { %v9275_v55 = vpop.f32.mrf.mxu0 }
0x1d3d   : > { %9280 = vmatmul.mubr.msk.bf16.vlgmr.msra.gmra.mxu1 %vm768_vm3, %v2967_v54  ;;  %v10588_v55 = vpack.c.bf16 %v10164_v29, %v10164_v29 }
0x1d3e   : > { %v2964_v56 = vpop.f32.mrf.mxu0  ;;  %9291 = vmatprep.mubr.msk.bf16.mxu1 %vm9945_vm2, %v9944_v20 }
0x1d40   : > { %v9276_v58 = vpop.f32.mrf.mxu0 }
0x1d42   : > { %v3063_v59 = vpop.f32.mrf.mxu0 }
0x1d43   : > { %v3069_v57 = vmul.f32 0.5, %v3063_v59 }
0x1d44   : > { %v9287_v60 = vpop.f32.mrf.mxu0 }
0x1d45   : > { %v3070_v62 = vsel %vm816_vm5, %v3069_v57, -inf }
0x1d46   : > { %3071 = vmax.xlane.f32.xlu0 %v3070_v62  ;;  %v3066_v0 = vpop.f32.mrf.mxu0 }
0x1d48   : > { %v9288_v2 = vpop.f32.mrf.mxu0 }
0x1d5c   : > { %3082 = vrot.lane.b32.xlu0 %v10181_v36, %s9974_s17 }
0x1d60   : > { %3178 = vrot.lane.b32.xlu0 %v10162_v27, %s9975_s21 }
0x1dcf   : > { %v3072_v4 = vpop.xlane.xlu0 %3071 }
0x1dd0   : > { %v3073_v5 = vsub.f32 %v3069_v57, %v3072_v4 }
0x1dd2   : > { %v3074_v6 = vmul.f32 1.442695, %v3073_v5 }
0x1dd3   : > { %v3083_v7 = vpop.permute.xlu0 %3082 }
0x1dd4   : > { %9853 = vpow2.f32 %v3074_v6  ;;  %v3088_v9 = vsel %vm832_vm4, %v3083_v7, 0 }
0x1dd5   : > { %9290 = vmatpush3.bf16.msra.mxu1 %v3088_v9 }
0x1dd6   : > { %9301 = vmatprep.subr.bf16.mxu1 %v9944_v20 }
0x1de1   : > { %v9854_v10 = vpop.eup %9853 }
0x1de2   : > { %v3076_v12 = vsel %vm816_vm5, %v9854_v10, 0.0 }
0x1de3   : > { %3077 = vadd.xlane.f32.xlu1 %v3076_v12 }
0x1df4   : > { %3180 = vrot.lane.b32.xlu1 %v10162_v27, %s9976_s27  ;;  %v3179_v27 = vpop.permute.xlu0 %3178 }
0x1dfd   : > { %v3012_v15 = vpop.f32.mrf.mxu1 }
0x1dfe   : > { %v3018_v16 = vadd.f32 %v3012_v15, %v2855_v28  ;;  %v762_v28 = vld [vmem:[%s10086_s14 + $0x1c] sm:$0xf]  ;;  %s11394_s14 = smov 40  }
0x1dff   : > { %v9281_v17 = vpop.f32.mrf.mxu1  ;;  %v10578_v38 = vsel %vm997_vm6, %v762_v28, 0  ;;  %v8400_v5 = vcombine.low %v762_v28, %v762_v28 }
0x1e00   : > { %9296 = vmatpush3.bf16.msra.mxu0 %v10578_v38 }
0x1e01   : > { %v3015_v18 = vpop.f32.mrf.mxu1  ;;  %9307 = vmatprep.subr.bf16.mxu0 %v9944_v20  ;;  %v3293_v6 = vrot.slane %v8400_v5, 2 }
0x1e03   : > { %v9282_v22 = vpop.f32.mrf.mxu1  ;;  %v10602_v7 = vsel %vm997_vm6, %v3293_v6, 0 }
0x1e6c   : > { %v3078_v25 = vpop.xlane.xlu1 %3077 }
0x1e6d   : > { %9855 = vrcp.f32 %v3078_v25 }
0x1e70   : > { %v3181_v33 = vpop.permute.xlu1 %3180 }
0x1e71   : > { %v3186_v37 = vsel %vm768_vm3, %v3181_v33, 0 }
0x1e7a   : > { %v9856_v26 = vpop.eup %9855 }
0x1e7b   : > { %v3080_v32 = vmul.f32 %v9856_v26, %v9854_v10 }
0x1e7d   : > { %v3081_v35 = vpack.c.bf16 %v3080_v32, %v3080_v32  ;;  %v753_v32 = vadd.f32 %v10195_v42, %v10176_v31 }
0x1e7f   : > { %9292 = vmatmul.mubr.msk.bf16.vlgmr.msra.gmra.mxu1 %vm816_vm5, %v3081_v35  ;;  %v10626_v33 = vpack.c.bf16 %v753_v32, %v753_v32 }
0x1e80   : > { %9302 = vmatpush3.bf16.xpose.msra.mxu1 %v3186_v37  ;;  %9303 = vmatprep.mubr.msk.bf16.mxu1 %vm9945_vm2, %v9944_v20 }
0x1e81   : > { %9313 = vmatprep.subr.bf16.mxu1 %v9944_v20  ;;  %v3409_v28 = vsel %vm832_vm4, %v10626_v33, 0 }
0x1e87   : > { %9304 = vmatmul.mubr.msk.bf16.vlgmr.msra.gmra.mxu1 %vm768_vm3, %v3179_v27 }
0x1e88   : > { %9315 = vmatprep.mubr.msk.bf16.mxu1 %vm9945_vm2, %v9944_v20  ;;  %9314 = vmatpush3.bf16.msra.mxu1 %v10602_v7 }
0x1e89   : > { %9325 = vmatprep.subr.bf16.mxu1 %v9944_v20 }
0x1f3f   : > { %v3124_v39 = vpop.f32.mrf.mxu1 }
0x1f40   : > { %v3130_v40 = vpack.c.bf16 %v3124_v39, %v3124_v39 }
0x1f41   : > { %v9293_v43 = vpop.f32.mrf.mxu1 }
0x1f42   : > { %9298 = vmatmul.mubr.msk.bf16.vlgmr.msra.gmra.mxu0 %vm768_vm3, %v3130_v40 }
0x1f43   : > { %v3127_v44 = vpop.f32.mrf.mxu1  ;;  %9309 = vmatprep.mubr.msk.bf16.mxu0 %vm9945_vm2, %v9944_v20 }
0x1f45   : > { %v9294_v45 = vpop.f32.mrf.mxu1 }
0x1f47   : > { %v3222_v46 = vpop.f32.mrf.mxu1 }
0x1f48   : > { %v3228_v47 = vmul.f32 0.5, %v3222_v46 }
0x1f49   : > { %v9305_v49 = vpop.f32.mrf.mxu1 }
0x1f4a   : > { %v3229_v50 = vsel %vm816_vm5, %v3228_v47, -inf }
0x1f4b   : > { %3230 = vmax.xlane.f32.xlu1 %v3229_v50  ;;  %v3225_v53 = vpop.f32.mrf.mxu1 }
0x1f4d   : > { %v9306_v54 = vpop.f32.mrf.mxu1 }
0x1f5c   : > { %3344 = vrot.lane.b32.xlu1 %v10588_v55, %s9947_s22  ;;  %s11396_s22 = smov 100  }
0x1f60   : > { %3454 = vrot.lane.b32.xlu1 %v10588_v55, %s9948_s25  ;;  %s11397_s25 = smov 36  }
0x1fd4   : > { %v3231_v56 = vpop.xlane.xlu1 %3230 }
0x1fd5   : > { %v3232_v58 = vsub.f32 %v3228_v47, %v3231_v56 }
0x1fd7   : > { %v3233_v59 = vmul.f32 1.442695, %v3232_v58 }
0x1fd9   : > { %9857 = vpow2.f32 %v3233_v59 }
0x1fe6   : > { %v9858_v57 = vpop.eup %9857 }
0x1fe7   : > { %v3235_v60 = vsel %vm816_vm5, %v9858_v57, 0.0 }
0x1fe8   : > { %3236 = vadd.xlane.f32.xlu0 %v3235_v60 }
0x1ffe   : > { %3241 = vrot.lane.b32.xlu0 %v10181_v36, %s9975_s21 }
0x2002   : > { %3452 = vrot.lane.b32.xlu0 %v10588_v55, %s9946_s20  ;;  %v3171_v29 = vpop.f32.mrf.mxu0 }
0x2003   : > { %v10599_v62 = vadd.f32 %v3171_v29, %v3018_v16  ;;  %v3345_v16 = vpop.permute.xlu1 %3344 }
0x2004   : > { %v9299_v0 = vpop.f32.mrf.mxu0  ;;  %v3350_v18 = vsel %vm768_vm3, %v3345_v16, 0 }
0x2006   : > { %v3174_v2 = vpop.f32.mrf.mxu0 }
0x2007   : > { %v3455_v22 = vpop.permute.xlu1 %3454 }
0x2008   : > { %v9300_v4 = vpop.f32.mrf.mxu0  ;;  %v3460_v25 = vsel %vm768_vm3, %v3455_v22, 0 }
0x2071   : > { %v3237_v9 = vpop.xlane.xlu0 %3236 }
0x2072   : > { %9859 = vrcp.f32 %v3237_v9 }
0x2075   : > { %v3242_v36 = vpop.permute.xlu0 %3241 }
0x2076   : > { %v3247_v10 = vsel %vm832_vm4, %v3242_v36, 0 }
0x2077   : > { %9308 = vmatpush3.bf16.msra.mxu0 %v3247_v10 }
0x2078   : > { %9319 = vmatprep.subr.bf16.mxu0 %v9944_v20 }
0x2079   : > { %v3453_v26 = vpop.permute.xlu0 %3452 }
0x207f   : > { %v9860_v12 = vpop.eup %9859 }
0x2080   : > { %v3239_v15 = vmul.f32 %v9860_v12, %v9858_v57 }
0x2082   : > { %v3240_v17 = vpack.c.bf16 %v3239_v15, %v3239_v15 }
0x2084   : > { %9310 = vmatmul.mubr.msk.bf16.vlgmr.msra.gmra.mxu0 %vm816_vm5, %v3240_v17 }
0x2085   : > { %9320 = vmatpush3.bf16.xpose.msra.mxu0 %v3350_v18  ;;  %9321 = vmatprep.mubr.msk.bf16.mxu0 %vm9945_vm2, %v9944_v20 }
0x2086   : > { %9331 = vmatprep.subr.bf16.mxu0 %v9944_v20 }
0x208c   : > { %9322 = vmatmul.mubr.msk.bf16.vlgmr.msra.gmra.mxu0 %vm768_vm3, %v10588_v55 }
0x208d   : > { %9332 = vmatpush3.bf16.xpose.msra.mxu0 %v3460_v25  ;;  %9333 = vmatprep.mubr.msk.bf16.mxu0 %vm9945_vm2, %v9944_v20 }
0x208e   : > { %9343 = vmatprep.subr.bf16.mxu0 %v9944_v20 }
0x2094   : > { %9334 = vmatmul.mubr.msk.bf16.vlgmr.msra.gmra.mxu0 %vm768_vm3, %v3453_v26 }
0x2095   : > { %9344 = vmatpush3.bf16.msra.mxu0 %v10222_v14  ;;  %9345 = vmatprep.mubr.msk.bf16.mxu0 %vm9945_vm2, %v9944_v20 }
0x2096   : > { %9355 = vmatprep.subr.bf16.mxu0 %v9944_v20 }
0x2144   : > { %v3283_v35 = vpop.f32.mrf.mxu0 }
0x2145   : > { %v3289_v37 = vpack.c.bf16 %v3283_v35, %v3283_v35 }
0x2146   : > { %v9311_v27 = vpop.f32.mrf.mxu0 }
0x2147   : > { %9316 = vmatmul.mubr.msk.bf16.vlgmr.msra.gmra.mxu1 %vm768_vm3, %v3289_v37 }
0x2148   : > { %9326 = vmatpush3.bf16.msra.mxu1 %v3409_v28  ;;  %v3286_v14 = vpop.f32.mrf.mxu0  ;;  %9327 = vmatprep.mubr.msk.bf16.mxu1 %vm9945_vm2, %v9944_v20 }
0x2149   : > { %9337 = vmatprep.subr.bf16.mxu1 %v9944_v20 }
0x214a   : > { %v9312_v39 = vpop.f32.mrf.mxu0 }
0x214c   : > { %v3386_v40 = vpop.f32.mrf.mxu0 }
0x214d   : > { %v3392_v31 = vmul.f32 0.5, %v3386_v40 }
0x214e   : > { %v9323_v42 = vpop.f32.mrf.mxu0 }
0x214f   : > { %v3393_v43 = vsel %vm816_vm5, %v3392_v31, -inf }
0x2150   : > { %3394 = vmax.xlane.f32.xlu1 %v3393_v43  ;;  %v3389_v44 = vpop.f32.mrf.mxu0 }
0x2152   : > { %v9324_v45 = vpop.f32.mrf.mxu0 }
0x2154   : > { %v3496_v46 = vpop.f32.mrf.mxu0 }
0x2155   : > { %v3502_v47 = vmul.f32 0.5, %v3496_v46 }
0x2156   : > { %v9335_v49 = vpop.f32.mrf.mxu0 }
0x2157   : > { %v3503_v50 = vsel %vm816_vm5, %v3502_v47, -inf }
0x2158   : > { %3504 = vmax.xlane.f32.xlu0 %v3503_v50  ;;  %v3499_v53 = vpop.f32.mrf.mxu0 }
0x215a   : > { %v9336_v54 = vpop.f32.mrf.mxu0 }
0x21d9   : > { %v3395_v56 = vpop.xlane.xlu1 %3394 }
0x21da   : > { %v3396_v58 = vsub.f32 %v3392_v31, %v3395_v56 }
0x21dc   : > { %v3397_v59 = vmul.f32 1.442695, %v3396_v58 }
0x21de   : > { %9861 = vpow2.f32 %v3397_v59 }
0x21e1   : > { %v3505_v57 = vpop.xlane.xlu0 %3504 }
0x21e2   : > { %v3506_v60 = vsub.f32 %v3502_v47, %v3505_v57 }
0x21e4   : > { %v3507_v29 = vmul.f32 1.442695, %v3506_v60 }
0x21e6   : > { %9863 = vpow2.f32 %v3507_v29 }
0x21eb   : > { %v9862_v0 = vpop.eup %9861 }
0x21ec   : > { %v3399_v2 = vsel %vm816_vm5, %v9862_v0, 0.0 }
0x21ed   : > { %3400 = vadd.xlane.f32.xlu0 %v3399_v2 }
0x21f3   : > { %v9864_v4 = vpop.eup %9863 }
0x21f4   : > { %v3509_v5 = vsel %vm816_vm5, %v9864_v4, 0.0 }
0x21f5   : > { %3510 = vadd.xlane.f32.xlu1 %v3509_v5 }
0x2203   : > { %3516 = vrot.lane.b32.xlu0 %v10626_v33, %s9946_s20  ;;  %s11395_s20 = smov 104  }
0x2206   : > { %3653 = vrot.lane.b32.xlu1 %v10588_v55, %s9949_s26  ;;  %s11398_s26 = smov 32  }
0x2207   : > { %v3334_v6 = vpop.f32.mrf.mxu1 }
0x2208   : > { %v10643_v9 = vadd.f32 %v3334_v6, %v10599_v62 }
0x2209   : > { %v9317_v36 = vpop.f32.mrf.mxu1 }
0x220a   : > { %3651 = vrot.lane.b32.xlu1 %v10588_v55, %s9950_s24 }
0x220b   : > { %v3337_v10 = vpop.f32.mrf.mxu1 }
0x220d   : > { %v9318_v12 = vpop.f32.mrf.mxu1 }
0x2276   : > { %v3401_v15 = vpop.xlane.xlu0 %3400 }
0x2277   : > { %9865 = vrcp.f32 %v3401_v15 }
0x227a   : > { %v3517_v22 = vpop.permute.xlu0 %3516 }
0x227b   : > { %v3522_v26 = vsel %vm832_vm4, %v3517_v22, 0 }
0x227e   : > { %v3511_v16 = vpop.xlane.xlu1 %3510 }
0x227f   : > { %9867 = vrcp.f32 %v3511_v16 }
0x2282   : > { %v3654_v40 = vpop.permute.xlu1 %3653 }
0x2284   : > { %v9866_v17 = vpop.eup %9865 }
0x2285   : > { %v3403_v18 = vmul.f32 %v9866_v17, %v9862_v0 }
0x2286   : > { %v3652_v46 = vpop.permute.xlu1 %3651 }
0x2287   : > { %v3404_v25 = vpack.c.bf16 %v3403_v18, %v3403_v18 }
0x2289   : > { %9328 = vmatmul.mubr.msk.bf16.vlgmr.msra.gmra.mxu1 %vm816_vm5, %v3404_v25 }
0x228a   : > { %9338 = vmatpush3.bf16.msra.mxu1 %v3522_v26  ;;  %9339 = vmatprep.mubr.msk.bf16.mxu1 %vm9945_vm2, %v9944_v20 }
0x228b   : > { %9349 = vmatprep.subr.bf16.mxu1 %v9944_v20 }
0x228c   : > { %v9868_v62 = vpop.eup %9867 }
0x228d   : > { %v3513_v32 = vmul.f32 %v9868_v62, %v9864_v4 }
0x228f   : > { %v3514_v35 = vpack.c.bf16 %v3513_v32, %v3513_v32 }
0x2291   : > { %9340 = vmatmul.mubr.msk.bf16.vlgmr.msra.gmra.mxu1 %vm816_vm5, %v3514_v35 }
0x2292   : > { %9350 = vmatpush3.bf16.msra.mxu1 %v10217_v11  ;;  %9351 = vmatprep.mubr.msk.bf16.mxu1 %vm9945_vm2, %v9944_v20  ;;  %v3659_v11 = vsel %vm768_vm3, %v3654_v40, 0 }
0x2293   : > { %9361 = vmatprep.subr.bf16.mxu1 %v9944_v20 }
0x2349   : > { %v3445_v37 = vpop.f32.mrf.mxu1 }
0x234a   : > { %v3451_v27 = vpack.c.bf16 %v3445_v37, %v3445_v37 }
0x234b   : > { %v9329_v28 = vpop.f32.mrf.mxu1 }
0x234c   : > { %9352 = vmatmul.mubr.msk.bf16.vlgmr.msra.gmra.mxu1 %vm768_vm3, %v3451_v27 }
0x234d   : > { %v3448_v14 = vpop.f32.mrf.mxu1  ;;  %9363 = vmatprep.mubr.msk.bf16.mxu1 %vm9945_vm2, %v9944_v20 }
0x234f   : > { %v9330_v39 = vpop.f32.mrf.mxu1 }
0x2351   : > { %v3558_v31 = vpop.f32.mrf.mxu1 }
0x2352   : > { %v3564_v42 = vpack.c.bf16 %v3558_v31, %v3558_v31 }
0x2353   : > { %v9341_v43 = vpop.f32.mrf.mxu1 }
0x2354   : > { %9346 = vmatmul.mubr.msk.bf16.vlgmr.msra.gmra.mxu0 %vm768_vm3, %v3564_v42 }
0x2355   : > { %9356 = vmatpush3.bf16.xpose.msra.mxu0 %v3659_v11  ;;  %v3561_v44 = vpop.f32.mrf.mxu1  ;;  %9357 = vmatprep.mubr.msk.bf16.mxu0 %vm9945_vm2, %v9944_v20 }
0x2356   : > { %9367 = vmatprep.subr.bf16.mxu0 %v9944_v20 }
0x2357   : > { %v9342_v45 = vpop.f32.mrf.mxu1 }
0x235c   : > { %9358 = vmatmul.mubr.msk.bf16.vlgmr.msra.gmra.mxu0 %vm768_vm3, %v3652_v46 }
0x235d   : > { %9368 = vmatpush3.bf16.msra.mxu0 %v10259_v3  ;;  %9369 = vmatprep.mubr.msk.bf16.mxu0 %vm9945_vm2, %v9944_v20 }
0x235e   : > { %9379 = vmatprep.subr.bf16.mxu0 %v9944_v20 }
0x240c   : > { %v3645_v47 = vpop.f32.mrf.mxu1 }
0x240e   : > { %v9353_v49 = vpop.f32.mrf.mxu1 }
0x2410   : > { %v3648_v50 = vpop.f32.mrf.mxu1 }
0x2412   : > { %v9354_v53 = vpop.f32.mrf.mxu1 }
0x2414   : > { %v3602_v54 = vpop.f32.mrf.mxu0 }
0x2415   : > { %v10670_v56 = vadd.f32 %v3645_v47, %v3602_v54 }
0x2416   : > { %v9347_v58 = vpop.f32.mrf.mxu0 }
0x2418   : > { %v3605_v59 = vpop.f32.mrf.mxu0 }
0x241a   : > { %v9348_v57 = vpop.f32.mrf.mxu0 }
0x241c   : > { %v3695_v60 = vpop.f32.mrf.mxu0 }
0x241d   : > { %v3701_v29 = vmul.f32 0.5, %v3695_v60 }
0x241e   : > { %v9359_v0 = vpop.f32.mrf.mxu0 }
0x241f   : > { %v3702_v3 = vsel %vm816_vm5, %v3701_v29, -inf }
0x2420   : > { %3703 = vmax.xlane.f32.xlu0 %v3702_v3  ;;  %v3698_v2 = vpop.f32.mrf.mxu0 }
0x2422   : > { %v9360_v4 = vpop.f32.mrf.mxu0 }
0x2436   : > { %3714 = vrot.lane.b32.xlu0 %v10626_v33, %s9950_s24  ;;  %s11399_s24 = smov 96  }
0x243a   : > { %3807 = vrot.lane.b32.xlu0 %v10588_v55, %s9951_s28 }
0x24a9   : > { %v3704_v5 = vpop.xlane.xlu0 %3703 }
0x24aa   : > { %v3705_v6 = vsub.f32 %v3701_v29, %v3704_v5 }
0x24ac   : > { %v3706_v36 = vmul.f32 1.442695, %v3705_v6 }
0x24ad   : > { %v3715_v10 = vpop.permute.xlu0 %3714 }
0x24ae   : > { %9869 = vpow2.f32 %v3706_v36  ;;  %v3720_v12 = vsel %vm832_vm4, %v3715_v10, 0 }
0x24af   : > { %9362 = vmatpush3.bf16.msra.mxu1 %v3720_v12 }
0x24b0   : > { %9373 = vmatprep.subr.bf16.mxu1 %v9944_v20 }
0x24b1   : > { %v3808_v32 = vpop.permute.xlu0 %3807 }
0x24bb   : > { %v9870_v15 = vpop.eup %9869 }
0x24bc   : > { %v3708_v16 = vsel %vm816_vm5, %v9870_v15, 0.0 }
0x24bd   : > { %3709 = vadd.xlane.f32.xlu1 %v3708_v16 }
0x24ce   : > { %3809 = vrot.lane.b32.xlu1 %v10588_v55, %s9952_s2  ;;  %s11401_s2 = smov 28  }
0x2546   : > { %v3710_v17 = vpop.xlane.xlu1 %3709 }
0x2547   : > { %9871 = vrcp.f32 %v3710_v17 }
0x254a   : > { %v3810_v25 = vpop.permute.xlu1 %3809 }
0x254b   : > { %v3815_v62 = vsel %vm768_vm3, %v3810_v25, 0 }
0x2554   : > { %v9872_v18 = vpop.eup %9871 }
0x2555   : > { %v3712_v22 = vmul.f32 %v9872_v18, %v9870_v15 }
0x2557   : > { %v3713_v26 = vpack.c.bf16 %v3712_v22, %v3712_v22 }
0x2559   : > { %9364 = vmatmul.mubr.msk.bf16.vlgmr.msra.gmra.mxu1 %vm816_vm5, %v3713_v26 }
0x255a   : > { %9374 = vmatpush3.bf16.xpose.msra.mxu1 %v3815_v62  ;;  %9375 = vmatprep.mubr.msk.bf16.mxu1 %vm9945_vm2, %v9944_v20 }
0x255b   : > { %9385 = vmatprep.subr.bf16.mxu1 %v9944_v20 }
0x2561   : > { %9376 = vmatmul.mubr.msk.bf16.vlgmr.msra.gmra.mxu1 %vm768_vm3, %v3808_v32 }
0x2562   : > { %9386 = vmatpush3.bf16.msra.mxu1 %v10286_v48  ;;  %9387 = vmatprep.mubr.msk.bf16.mxu1 %vm9945_vm2, %v9944_v20 }
0x2563   : > { %9397 = vmatprep.subr.bf16.mxu1 %v9944_v20 }
0x2619   : > { %v3756_v35 = vpop.f32.mrf.mxu1 }
0x261a   : > { %v3762_v37 = vpack.c.bf16 %v3756_v35, %v3756_v35 }
0x261b   : > { %v9365_v27 = vpop.f32.mrf.mxu1 }
0x261c   : > { %9370 = vmatmul.mubr.msk.bf16.vlgmr.msra.gmra.mxu0 %vm768_vm3, %v3762_v37 }
0x261d   : > { %v3759_v28 = vpop.f32.mrf.mxu1  ;;  %9381 = vmatprep.mubr.msk.bf16.mxu0 %vm9945_vm2, %v9944_v20 }
0x261f   : > { %v9366_v14 = vpop.f32.mrf.mxu1 }
0x2621   : > { %v3851_v39 = vpop.f32.mrf.mxu1 }
0x2622   : > { %v3857_v40 = vmul.f32 0.5, %v3851_v39 }
0x2623   : > { %v9377_v31 = vpop.f32.mrf.mxu1 }
0x2624   : > { %v3858_v48 = vsel %vm816_vm5, %v3857_v40, -inf }
0x2625   : > { %3859 = vmax.xlane.f32.xlu1 %v3858_v48  ;;  %v3854_v42 = vpop.f32.mrf.mxu1 }
0x2627   : > { %v9378_v43 = vpop.f32.mrf.mxu1 }
0x2636   : > { %3965 = vrot.lane.b32.xlu1 %v10588_v55, %s9953_s19  ;;  %s11402_s19 = smov 24  }
0x263a   : > { %3963 = vrot.lane.b32.xlu1 %v10588_v55, %s9954_s16 }
0x26ae   : > { %v3860_v11 = vpop.xlane.xlu1 %3859 }
0x26af   : > { %v3861_v44 = vsub.f32 %v3857_v40, %v3860_v11 }
0x26b1   : > { %v3862_v45 = vmul.f32 1.442695, %v3861_v44 }
0x26b2   : > { %v3966_v3 = vpop.permute.xlu1 %3965 }
0x26b3   : > { %9873 = vpow2.f32 %v3862_v45  ;;  %v3971_v4 = vsel %vm768_vm3, %v3966_v3, 0 }
0x26c0   : > { %v9874_v46 = vpop.eup %9873 }
0x26c1   : > { %v3864_v47 = vsel %vm816_vm5, %v9874_v46, 0.0 }
0x26c2   : > { %3865 = vadd.xlane.f32.xlu0 %v3864_v47 }
0x26d8   : > { %3870 = vrot.lane.b32.xlu0 %v10626_v33, %s9951_s28  ;;  %s11400_s28 = smov 92  }
0x26dc   : > { %v3800_v49 = vpop.f32.mrf.mxu0 }
0x26dd   : > { %v3806_v50 = vadd.f32 %v3800_v49, %v10670_v56  ;;  %v3964_v56 = vpop.permute.xlu1 %3963 }
0x26de   : > { %v9371_v53 = vpop.f32.mrf.mxu0 }
0x26e0   : > { %v3803_v54 = vpop.f32.mrf.mxu0 }
0x26e2   : > { %v9372_v58 = vpop.f32.mrf.mxu0 }
0x274b   : > { %v3866_v59 = vpop.xlane.xlu0 %3865 }
0x274c   : > { %9875 = vrcp.f32 %v3866_v59 }
0x274f   : > { %v3871_v57 = vpop.permute.xlu0 %3870 }
0x2750   : > { %v3876_v60 = vsel %vm832_vm4, %v3871_v57, 0 }
0x2751   : > { %9380 = vmatpush3.bf16.msra.mxu0 %v3876_v60 }
0x2752   : > { %9391 = vmatprep.subr.bf16.mxu0 %v9944_v20 }
0x2759   : > { %v9876_v29 = vpop.eup %9875 }
0x275a   : > { %v3868_v0 = vmul.f32 %v9876_v29, %v9874_v46 }
0x275c   : > { %v3869_v2 = vpack.c.bf16 %v3868_v0, %v3868_v0 }
0x275e   : > { %9382 = vmatmul.mubr.msk.bf16.vlgmr.msra.gmra.mxu0 %vm816_vm5, %v3869_v2 }
0x275f   : > { %9392 = vmatpush3.bf16.xpose.msra.mxu0 %v3971_v4  ;;  %9393 = vmatprep.mubr.msk.bf16.mxu0 %vm9945_vm2, %v9944_v20 }
0x2760   : > { %9403 = vmatprep.subr.bf16.mxu0 %v9944_v20 }
0x2766   : > { %9394 = vmatmul.mubr.msk.bf16.vlgmr.msra.gmra.mxu0 %vm768_vm3, %v3964_v56 }
0x2767   : > { %9404 = vmatpush3.bf16.msra.mxu0 %v10313_v23  ;;  %9405 = vmatprep.mubr.msk.bf16.mxu0 %vm9945_vm2, %v9944_v20 }
0x2768   : > { %9415 = vmatprep.subr.bf16.mxu0 %v9944_v20 }
0x281e   : > { %v3912_v5 = vpop.f32.mrf.mxu0 }
0x281f   : > { %v3918_v6 = vpack.c.bf16 %v3912_v5, %v3912_v5 }
0x2820   : > { %v9383_v36 = vpop.f32.mrf.mxu0 }
0x2821   : > { %9388 = vmatmul.mubr.msk.bf16.vlgmr.msra.gmra.mxu1 %vm768_vm3, %v3918_v6 }
0x2822   : > { %v3915_v10 = vpop.f32.mrf.mxu0  ;;  %9399 = vmatprep.mubr.msk.bf16.mxu1 %vm9945_vm2, %v9944_v20 }
0x2824   : > { %v9384_v12 = vpop.f32.mrf.mxu0 }
0x2826   : > { %v4007_v15 = vpop.f32.mrf.mxu0 }
0x2827   : > { %v4013_v16 = vmul.f32 0.5, %v4007_v15 }
0x2828   : > { %v9395_v17 = vpop.f32.mrf.mxu0 }
0x2829   : > { %v4014_v23 = vsel %vm816_vm5, %v4013_v16, -inf }
0x282a   : > { %4015 = vmax.xlane.f32.xlu0 %v4014_v23  ;;  %v4010_v18 = vpop.f32.mrf.mxu0 }
0x282c   : > { %v9396_v22 = vpop.f32.mrf.mxu0 }
0x2840   : > { %4026 = vrot.lane.b32.xlu0 %v10626_v33, %s9954_s16  ;;  %s11403_s16 = smov 88  }
0x2844   : > { %4119 = vrot.lane.b32.xlu0 %v10588_v55, %s9955_s4 }
0x28b3   : > { %v4016_v25 = vpop.xlane.xlu0 %4015 }
0x28b4   : > { %v4017_v26 = vsub.f32 %v4013_v16, %v4016_v25 }
0x28b6   : > { %v4018_v62 = vmul.f32 1.442695, %v4017_v26 }
0x28b7   : > { %v4027_v32 = vpop.permute.xlu0 %4026 }
0x28b8   : > { %9877 = vpow2.f32 %v4018_v62  ;;  %v4032_v35 = vsel %vm832_vm4, %v4027_v32, 0 }
0x28b9   : > { %9398 = vmatpush3.bf16.msra.mxu1 %v4032_v35 }
0x28ba   : > { %9409 = vmatprep.subr.bf16.mxu1 %v9944_v20 }
0x28bb   : > { %v4120_v46 = vpop.permute.xlu0 %4119 }
0x28c5   : > { %v9878_v37 = vpop.eup %9877 }
0x28c6   : > { %v4020_v27 = vsel %vm816_vm5, %v9878_v37, 0.0 }
0x28c7   : > { %4021 = vadd.xlane.f32.xlu1 %v4020_v27 }
0x28d8   : > { %4121 = vrot.lane.b32.xlu1 %v10588_v55, %s9956_s3  ;;  %s11405_s3 = smov 20  }
0x28e1   : > { %v3956_v28 = vpop.f32.mrf.mxu1 }
0x28e2   : > { %v3962_v14 = vadd.f32 %v3956_v28, %v3806_v50 }
0x28e3   : > { %v9389_v39 = vpop.f32.mrf.mxu1 }
0x28e5   : > { %v3959_v40 = vpop.f32.mrf.mxu1 }
0x28e7   : > { %v9390_v31 = vpop.f32.mrf.mxu1 }
0x2950   : > { %v4022_v48 = vpop.xlane.xlu1 %4021 }
0x2951   : > { %9879 = vrcp.f32 %v4022_v48 }
0x2954   : > { %v4122_v11 = vpop.permute.xlu1 %4121 }
0x2955   : > { %v4127_v45 = vsel %vm768_vm3, %v4122_v11, 0 }
0x295e   : > { %v9880_v42 = vpop.eup %9879 }
0x295f   : > { %v4024_v43 = vmul.f32 %v9880_v42, %v9878_v37 }
0x2961   : > { %v4025_v44 = vpack.c.bf16 %v4024_v43, %v4024_v43 }
0x2963   : > { %9400 = vmatmul.mubr.msk.bf16.vlgmr.msra.gmra.mxu1 %vm816_vm5, %v4025_v44 }
0x2964   : > { %9410 = vmatpush3.bf16.xpose.msra.mxu1 %v4127_v45  ;;  %9411 = vmatprep.mubr.msk.bf16.mxu1 %vm9945_vm2, %v9944_v20 }
0x2965   : > { %9421 = vmatprep.subr.bf16.mxu1 %v9944_v20 }
0x296b   : > { %9412 = vmatmul.mubr.msk.bf16.vlgmr.msra.gmra.mxu1 %vm768_vm3, %v4120_v46 }
0x296c   : > { %9422 = vmatpush3.bf16.msra.mxu1 %v10339_v63  ;;  %9423 = vmatprep.mubr.msk.bf16.mxu1 %vm9945_vm2, %v9944_v20 }
0x296d   : > { %9433 = vmatprep.subr.bf16.mxu1 %v9944_v20 }
0x2a23   : > { %v4068_v47 = vpop.f32.mrf.mxu1 }
0x2a24   : > { %v4074_v49 = vpack.c.bf16 %v4068_v47, %v4068_v47 }
0x2a25   : > { %v9401_v50 = vpop.f32.mrf.mxu1 }
0x2a26   : > { %9406 = vmatmul.mubr.msk.bf16.vlgmr.msra.gmra.mxu0 %vm768_vm3, %v4074_v49 }
0x2a27   : > { %v4071_v53 = vpop.f32.mrf.mxu1  ;;  %9417 = vmatprep.mubr.msk.bf16.mxu0 %vm9945_vm2, %v9944_v20 }
0x2a29   : > { %v9402_v54 = vpop.f32.mrf.mxu1 }
0x2a2b   : > { %v4163_v58 = vpop.f32.mrf.mxu1 }
0x2a2c   : > { %v4169_v59 = vmul.f32 0.5, %v4163_v58 }
0x2a2d   : > { %v9413_v57 = vpop.f32.mrf.mxu1 }
0x2a2e   : > { %v4170_v63 = vsel %vm816_vm5, %v4169_v59, -inf }
0x2a2f   : > { %4171 = vmax.xlane.f32.xlu1 %v4170_v63  ;;  %v4166_v60 = vpop.f32.mrf.mxu1 }
0x2a31   : > { %v9414_v29 = vpop.f32.mrf.mxu1 }
0x2a40   : > { %4277 = vrot.lane.b32.xlu1 %v10588_v55, %s11394_s14  ;;  %s11406_s14 = smov 16  }
0x2a44   : > { %4275 = vrot.lane.b32.xlu1 %v10588_v55, %s11395_s20 }
0x2ab8   : > { %v4172_v0 = vpop.xlane.xlu1 %4171 }
0x2ab9   : > { %v4173_v3 = vsub.f32 %v4169_v59, %v4172_v0 }
0x2abb   : > { %v4174_v2 = vmul.f32 1.442695, %v4173_v3 }
0x2abc   : > { %v4278_v22 = vpop.permute.xlu1 %4277 }
0x2abd   : > { %9881 = vpow2.f32 %v4174_v2  ;;  %v4283_v26 = vsel %vm768_vm3, %v4278_v22, 0 }
0x2ac0   : > { %v4276_v62 = vpop.permute.xlu1 %4275 }
0x2aca   : > { %v9882_v4 = vpop.eup %9881 }
0x2acb   : > { %v4176_v56 = vsel %vm816_vm5, %v9882_v4, 0.0 }
0x2acc   : > { %4177 = vadd.xlane.f32.xlu0 %v4176_v56 }
0x2ae2   : > { %4182 = vrot.lane.b32.xlu0 %v10626_v33, %s9955_s4  ;;  %s11404_s4 = smov 84  }
0x2ae6   : > { %v4112_v5 = vpop.f32.mrf.mxu0 }
0x2ae7   : > { %v4118_v6 = vadd.f32 %v4112_v5, %v3962_v14 }
0x2ae8   : > { %v9407_v36 = vpop.f32.mrf.mxu0 }
0x2aea   : > { %v4115_v10 = vpop.f32.mrf.mxu0 }
0x2aec   : > { %v9408_v12 = vpop.f32.mrf.mxu0 }
0x2b55   : > { %v4178_v15 = vpop.xlane.xlu0 %4177 }
0x2b56   : > { %9883 = vrcp.f32 %v4178_v15 }
0x2b59   : > { %v4183_v16 = vpop.permute.xlu0 %4182 }
0x2b5a   : > { %v4188_v17 = vsel %vm832_vm4, %v4183_v16, 0 }
0x2b5b   : > { %9416 = vmatpush3.bf16.msra.mxu0 %v4188_v17 }
0x2b5c   : > { %9427 = vmatprep.subr.bf16.mxu0 %v9944_v20 }
0x2b63   : > { %v9884_v23 = vpop.eup %9883 }
0x2b64   : > { %v4180_v18 = vmul.f32 %v9884_v23, %v9882_v4 }
0x2b66   : > { %v4181_v25 = vpack.c.bf16 %v4180_v18, %v4180_v18 }
0x2b68   : > { %9418 = vmatmul.mubr.msk.bf16.vlgmr.msra.gmra.mxu0 %vm816_vm5, %v4181_v25 }
0x2b69   : > { %9428 = vmatpush3.bf16.xpose.msra.mxu0 %v4283_v26  ;;  %9429 = vmatprep.mubr.msk.bf16.mxu0 %vm9945_vm2, %v9944_v20 }
0x2b6a   : > { %9439 = vmatprep.subr.bf16.mxu0 %v9944_v20 }
0x2b70   : > { %9430 = vmatmul.mubr.msk.bf16.vlgmr.msra.gmra.mxu0 %vm768_vm3, %v4276_v62 }
0x2b71   : > { %9440 = vmatpush3.bf16.msra.mxu0 %v10366_v41  ;;  %9441 = vmatprep.mubr.msk.bf16.mxu0 %vm9945_vm2, %v9944_v20 }
0x2b72   : > { %9451 = vmatprep.subr.bf16.mxu0 %v9944_v20 }
0x2c28   : > { %v4224_v32 = vpop.f32.mrf.mxu0 }
0x2c29   : > { %v4230_v35 = vpack.c.bf16 %v4224_v32, %v4224_v32 }
0x2c2a   : > { %v9419_v37 = vpop.f32.mrf.mxu0 }
0x2c2b   : > { %9424 = vmatmul.mubr.msk.bf16.vlgmr.msra.gmra.mxu1 %vm768_vm3, %v4230_v35 }
0x2c2c   : > { %v4227_v27 = vpop.f32.mrf.mxu0  ;;  %9435 = vmatprep.mubr.msk.bf16.mxu1 %vm9945_vm2, %v9944_v20 }
0x2c2e   : > { %v9420_v28 = vpop.f32.mrf.mxu0 }
0x2c30   : > { %v4319_v14 = vpop.f32.mrf.mxu0 }
0x2c31   : > { %v4325_v39 = vmul.f32 0.5, %v4319_v14 }
0x2c32   : > { %v9431_v40 = vpop.f32.mrf.mxu0 }
0x2c33   : > { %v4326_v41 = vsel %vm816_vm5, %v4325_v39, -inf }
0x2c34   : > { %4327 = vmax.xlane.f32.xlu0 %v4326_v41  ;;  %v4322_v31 = vpop.f32.mrf.mxu0 }
0x2c36   : > { %v9432_v48 = vpop.f32.mrf.mxu0 }
0x2c4a   : > { %4338 = vrot.lane.b32.xlu0 %v10626_v33, %s11395_s20  ;;  %s11407_s20 = smov 80  }
0x2c4e   : > { %4431 = vrot.lane.b32.xlu0 %v10588_v55, %s11396_s22 }
0x2cbd   : > { %v4328_v42 = vpop.xlane.xlu0 %4327 }
0x2cbe   : > { %v4329_v43 = vsub.f32 %v4325_v39, %v4328_v42 }
0x2cc0   : > { %v4330_v11 = vmul.f32 1.442695, %v4329_v43 }
0x2cc1   : > { %v4339_v44 = vpop.permute.xlu0 %4338 }
0x2cc2   : > { %9885 = vpow2.f32 %v4330_v11  ;;  %v4344_v45 = vsel %vm832_vm4, %v4339_v44, 0 }
0x2cc3   : > { %9434 = vmatpush3.bf16.msra.mxu1 %v4344_v45 }
0x2cc4   : > { %9445 = vmatprep.subr.bf16.mxu1 %v9944_v20 }
0x2cc5   : > { %v4432_v3 = vpop.permute.xlu0 %4431 }
0x2ccf   : > { %v9886_v46 = vpop.eup %9885 }
0x2cd0   : > { %v4332_v47 = vsel %vm816_vm5, %v9886_v46, 0.0 }
0x2cd1   : > { %4333 = vadd.xlane.f32.xlu1 %v4332_v47 }
0x2ce2   : > { %4433 = vrot.lane.b32.xlu1 %v10588_v55, %s11397_s25  ;;  %s11409_s25 = smov 12  }
0x2ceb   : > { %v4268_v49 = vpop.f32.mrf.mxu1 }
0x2cec   : > { %v4274_v50 = vadd.f32 %v4268_v49, %v4118_v6 }
0x2ced   : > { %v9425_v53 = vpop.f32.mrf.mxu1 }
0x2cef   : > { %v4271_v54 = vpop.f32.mrf.mxu1 }
0x2cf1   : > { %v9426_v58 = vpop.f32.mrf.mxu1 }
0x2d5a   : > { %v4334_v59 = vpop.xlane.xlu1 %4333 }
0x2d5b   : > { %9887 = vrcp.f32 %v4334_v59 }
0x2d5e   : > { %v4434_v60 = vpop.permute.xlu1 %4433 }
0x2d5f   : > { %v4439_v0 = vsel %vm768_vm3, %v4434_v60, 0 }
0x2d68   : > { %v9888_v57 = vpop.eup %9887 }
0x2d69   : > { %v4336_v63 = vmul.f32 %v9888_v57, %v9886_v46 }
0x2d6b   : > { %v4337_v29 = vpack.c.bf16 %v4336_v63, %v4336_v63 }
0x2d6d   : > { %9436 = vmatmul.mubr.msk.bf16.vlgmr.msra.gmra.mxu1 %vm816_vm5, %v4337_v29 }
0x2d6e   : > { %9446 = vmatpush3.bf16.xpose.msra.mxu1 %v4439_v0  ;;  %9447 = vmatprep.mubr.msk.bf16.mxu1 %vm9945_vm2, %v9944_v20 }
0x2d6f   : > { %9457 = vmatprep.subr.bf16.mxu1 %v9944_v20 }
0x2d75   : > { %9448 = vmatmul.mubr.msk.bf16.vlgmr.msra.gmra.mxu1 %vm768_vm3, %v4432_v3 }
0x2d76   : > { %9458 = vmatpush3.bf16.msra.mxu1 %v10392_v24  ;;  %9459 = vmatprep.mubr.msk.bf16.mxu1 %vm9945_vm2, %v9944_v20 }
0x2d77   : > { %9469 = vmatprep.subr.bf16.mxu1 %v9944_v20 }
0x2e2d   : > { %v4380_v2 = vpop.f32.mrf.mxu1 }
0x2e2e   : > { %v4386_v4 = vpack.c.bf16 %v4380_v2, %v4380_v2 }
0x2e2f   : > { %v9437_v56 = vpop.f32.mrf.mxu1 }
0x2e30   : > { %9442 = vmatmul.mubr.msk.bf16.vlgmr.msra.gmra.mxu0 %vm768_vm3, %v4386_v4 }
0x2e31   : > { %v4383_v5 = vpop.f32.mrf.mxu1  ;;  %9453 = vmatprep.mubr.msk.bf16.mxu0 %vm9945_vm2, %v9944_v20 }
0x2e33   : > { %v9438_v6 = vpop.f32.mrf.mxu1 }
0x2e35   : > { %v4475_v36 = vpop.f32.mrf.mxu1 }
0x2e36   : > { %v4481_v10 = vmul.f32 0.5, %v4475_v36 }
0x2e37   : > { %v9449_v12 = vpop.f32.mrf.mxu1 }
0x2e38   : > { %v4482_v24 = vsel %vm816_vm5, %v4481_v10, -inf }
0x2e39   : > { %4483 = vmax.xlane.f32.xlu1 %v4482_v24  ;;  %v4478_v15 = vpop.f32.mrf.mxu1 }
0x2e3b   : > { %v9450_v16 = vpop.f32.mrf.mxu1 }
0x2e4a   : > { %4589 = vrot.lane.b32.xlu1 %v10588_v55, %s11398_s26  ;;  %s11410_s26 = smov 8  }
0x2e4e   : > { %4587 = vrot.lane.b32.xlu1 %v10588_v55, %s11399_s24 }
0x2ec2   : > { %v4484_v17 = vpop.xlane.xlu1 %4483 }
0x2ec3   : > { %v4485_v23 = vsub.f32 %v4481_v10, %v4484_v17 }
0x2ec5   : > { %v4486_v18 = vmul.f32 1.442695, %v4485_v23 }
0x2ec6   : > { %v4590_v41 = vpop.permute.xlu1 %4589 }
0x2ec7   : > { %9889 = vpow2.f32 %v4486_v18  ;;  %v4595_v48 = vsel %vm768_vm3, %v4590_v41, 0 }
0x2eca   : > { %v4588_v42 = vpop.permute.xlu1 %4587 }
0x2ed4   : > { %v9890_v22 = vpop.eup %9889 }
0x2ed5   : > { %v4488_v25 = vsel %vm816_vm5, %v9890_v22, 0.0 }
0x2ed6   : > { %4489 = vadd.xlane.f32.xlu0 %v4488_v25 }
0x2eec   : > { %4494 = vrot.lane.b32.xlu0 %v10626_v33, %s11396_s22  ;;  %s11408_s22 = smov 76  }
0x2ef0   : > { %v4424_v26 = vpop.f32.mrf.mxu0 }
0x2ef1   : > { %v4430_v62 = vadd.f32 %v4424_v26, %v4274_v50 }
0x2ef2   : > { %v9443_v32 = vpop.f32.mrf.mxu0 }
0x2ef4   : > { %v4427_v35 = vpop.f32.mrf.mxu0 }
0x2ef6   : > { %v9444_v37 = vpop.f32.mrf.mxu0 }
0x2f5f   : > { %v4490_v27 = vpop.xlane.xlu0 %4489 }
0x2f60   : > { %9891 = vrcp.f32 %v4490_v27 }
0x2f63   : > { %v4495_v28 = vpop.permute.xlu0 %4494 }
0x2f64   : > { %v4500_v14 = vsel %vm832_vm4, %v4495_v28, 0 }
0x2f65   : > { %9452 = vmatpush3.bf16.msra.mxu0 %v4500_v14 }
0x2f66   : > { %9463 = vmatprep.subr.bf16.mxu0 %v9944_v20 }
0x2f6d   : > { %v9892_v39 = vpop.eup %9891 }
0x2f6e   : > { %v4492_v40 = vmul.f32 %v9892_v39, %v9890_v22 }
0x2f70   : > { %v4493_v31 = vpack.c.bf16 %v4492_v40, %v4492_v40 }
0x2f72   : > { %9454 = vmatmul.mubr.msk.bf16.vlgmr.msra.gmra.mxu0 %vm816_vm5, %v4493_v31 }
0x2f73   : > { %9464 = vmatpush3.bf16.xpose.msra.mxu0 %v4595_v48  ;;  %9465 = vmatprep.mubr.msk.bf16.mxu0 %vm9945_vm2, %v9944_v20 }
0x2f74   : > { %9475 = vmatprep.subr.bf16.mxu0 %v9944_v20 }
0x2f7a   : > { %9466 = vmatmul.mubr.msk.bf16.vlgmr.msra.gmra.mxu0 %vm768_vm3, %v4588_v42 }
0x2f7b   : > { %9476 = vmatpush3.bf16.msra.mxu0 %v10419_v1  ;;  %9477 = vmatprep.mubr.msk.bf16.mxu0 %vm9945_vm2, %v9944_v20 }
0x2f7c   : > { %9487 = vmatprep.subr.bf16.mxu0 %v9944_v20 }
0x3032   : > { %v4536_v43 = vpop.f32.mrf.mxu0 }
0x3033   : > { %v4542_v11 = vpack.c.bf16 %v4536_v43, %v4536_v43 }
0x3034   : > { %v9455_v44 = vpop.f32.mrf.mxu0 }
0x3035   : > { %9460 = vmatmul.mubr.msk.bf16.vlgmr.msra.gmra.mxu1 %vm768_vm3, %v4542_v11 }
0x3036   : > { %v4539_v45 = vpop.f32.mrf.mxu0  ;;  %9471 = vmatprep.mubr.msk.bf16.mxu1 %vm9945_vm2, %v9944_v20 }
0x3038   : > { %v9456_v46 = vpop.f32.mrf.mxu0 }
0x303a   : > { %v4631_v47 = vpop.f32.mrf.mxu0 }
0x303b   : > { %v4637_v49 = vmul.f32 0.5, %v4631_v47 }
0x303c   : > { %v9467_v50 = vpop.f32.mrf.mxu0 }
0x303d   : > { %v4638_v1 = vsel %vm816_vm5, %v4637_v49, -inf }
0x303e   : > { %4639 = vmax.xlane.f32.xlu0 %v4638_v1  ;;  %v4634_v53 = vpop.f32.mrf.mxu0 }
0x3040   : > { %v9468_v54 = vpop.f32.mrf.mxu0 }
0x3054   : > { %4650 = vrot.lane.b32.xlu0 %v10626_v33, %s11399_s24  ;;  %s11411_s24 = scalar_lea.vmem %s11344_s5, %s10064_s15 }
0x3058   : > { %4743 = vrot.lane.b32.xlu0 %v10588_v55, %s11400_s28 }
0x30c7   : > { %v4640_v58 = vpop.xlane.xlu0 %4639 }
0x30c8   : > { %v4641_v59 = vsub.f32 %v4637_v49, %v4640_v58 }
0x30ca   : > { %v4642_v57 = vmul.f32 1.442695, %v4641_v59 }
0x30cb   : > { %v4651_v63 = vpop.permute.xlu0 %4650 }
0x30cc   : > { %9893 = vpow2.f32 %v4642_v57  ;;  %v4656_v60 = vsel %vm832_vm4, %v4651_v63, 0 }
0x30cd   : > { %9470 = vmatpush3.bf16.msra.mxu1 %v4656_v60 }
0x30ce   : > { %9481 = vmatprep.subr.bf16.mxu1 %v9944_v20 }
0x30cf   : > { %v4744_v16 = vpop.permute.xlu0 %4743 }
0x30d9   : > { %v9894_v29 = vpop.eup %9893 }
0x30da   : > { %v4644_v0 = vsel %vm816_vm5, %v9894_v29, 0.0 }
0x30db   : > { %4645 = vadd.xlane.f32.xlu1 %v4644_v0 }
0x30ec   : > { %4745 = vrot.lane.b32.xlu1 %v10588_v55, %s11401_s2  ;;  %s11412_s2 = scalar_lea.vmem %s11345_s6, %s10064_s15 }
0x30f5   : > { %v4580_v3 = vpop.f32.mrf.mxu1 }
0x30f6   : > { %v4586_v2 = vadd.f32 %v4580_v3, %v4430_v62 }
0x30f7   : > { %v9461_v4 = vpop.f32.mrf.mxu1 }
0x30f9   : > { %v4583_v56 = vpop.f32.mrf.mxu1 }
0x30fb   : > { %v9462_v5 = vpop.f32.mrf.mxu1 }
0x3164   : > { %v4646_v6 = vpop.xlane.xlu1 %4645 }
0x3165   : > { %9895 = vrcp.f32 %v4646_v6 }
0x3168   : > { %v4746_v12 = vpop.permute.xlu1 %4745 }
0x3169   : > { %v4751_v15 = vsel %vm768_vm3, %v4746_v12, 0 }
0x3172   : > { %v9896_v36 = vpop.eup %9895 }
0x3173   : > { %v4648_v10 = vmul.f32 %v9896_v36, %v9894_v29 }
0x3175   : > { %v4649_v24 = vpack.c.bf16 %v4648_v10, %v4648_v10 }
0x3177   : > { %9472 = vmatmul.mubr.msk.bf16.vlgmr.msra.gmra.mxu1 %vm816_vm5, %v4649_v24 }
0x3178   : > { %9482 = vmatpush3.bf16.xpose.msra.mxu1 %v4751_v15  ;;  %9483 = vmatprep.mubr.msk.bf16.mxu1 %vm9945_vm2, %v9944_v20 }
0x3179   : > { %9493 = vmatprep.subr.bf16.mxu1 %v9944_v20 }
0x317f   : > { %9484 = vmatmul.mubr.msk.bf16.vlgmr.msra.gmra.mxu1 %vm768_vm3, %v4744_v16 }
0x3180   : > { %9494 = vmatpush3.bf16.msra.mxu1 %v10445_v51  ;;  %9495 = vmatprep.mubr.msk.bf16.mxu1 %vm9945_vm2, %v9944_v20 }
0x3181   : > { %9505 = vmatprep.subr.bf16.mxu1 %v9944_v20 }
0x3237   : > { %v4692_v17 = vpop.f32.mrf.mxu1 }
0x3238   : > { %v4698_v23 = vpack.c.bf16 %v4692_v17, %v4692_v17 }
0x3239   : > { %v9473_v18 = vpop.f32.mrf.mxu1 }
0x323a   : > { %9478 = vmatmul.mubr.msk.bf16.vlgmr.msra.gmra.mxu0 %vm768_vm3, %v4698_v23 }
0x323b   : > { %v4695_v22 = vpop.f32.mrf.mxu1  ;;  %9489 = vmatprep.mubr.msk.bf16.mxu0 %vm9945_vm2, %v9944_v20 }
0x323d   : > { %v9474_v25 = vpop.f32.mrf.mxu1 }
0x323f   : > { %v4787_v26 = vpop.f32.mrf.mxu1 }
0x3240   : > { %v4793_v62 = vmul.f32 0.5, %v4787_v26 }
0x3241   : > { %v9485_v32 = vpop.f32.mrf.mxu1 }
0x3242   : > { %v4794_v51 = vsel %vm816_vm5, %v4793_v62, -inf }
0x3243   : > { %4795 = vmax.xlane.f32.xlu1 %v4794_v51  ;;  %v4790_v35 = vpop.f32.mrf.mxu1 }
0x3245   : > { %v9486_v37 = vpop.f32.mrf.mxu1 }
0x3254   : > { %4901 = vrot.lane.b32.xlu1 %v10588_v55, %s11402_s19 }
0x3258   : > { %4899 = vrot.lane.b32.xlu1 %v10588_v55, %s11403_s16 }
0x32cc   : > { %v4796_v27 = vpop.xlane.xlu1 %4795 }
0x32cd   : > { %v4797_v28 = vsub.f32 %v4793_v62, %v4796_v27 }
0x32cf   : > { %v4798_v14 = vmul.f32 1.442695, %v4797_v28 }
0x32d0   : > { %v4902_v49 = vpop.permute.xlu1 %4901 }
0x32d1   : > { %9897 = vpow2.f32 %v4798_v14  ;;  %v4907_v1 = vsel %vm768_vm3, %v4902_v49, 0 }
0x32d4   : > { %v4900_v53 = vpop.permute.xlu1 %4899 }
0x32de   : > { %v9898_v39 = vpop.eup %9897 }
0x32df   : > { %v4800_v40 = vsel %vm816_vm5, %v9898_v39, 0.0 }
0x32e0   : > { %4801 = vadd.xlane.f32.xlu0 %v4800_v40 }
0x32f6   : > { %4806 = vrot.lane.b32.xlu0 %v10626_v33, %s11400_s28 }
0x32fa   : > { %v4736_v41 = vpop.f32.mrf.mxu0 }
0x32fb   : > { %v4742_v31 = vadd.f32 %v4736_v41, %v4586_v2 }
0x32fc   : > { %v9479_v48 = vpop.f32.mrf.mxu0 }
0x32fe   : > { %v4739_v42 = vpop.f32.mrf.mxu0 }
0x3300   : > { %v9480_v43 = vpop.f32.mrf.mxu0 }
0x3369   : > { %v4802_v11 = vpop.xlane.xlu0 %4801 }
0x336a   : > { %9899 = vrcp.f32 %v4802_v11 }
0x336d   : > { %v4807_v44 = vpop.permute.xlu0 %4806 }
0x336e   : > { %v4812_v45 = vsel %vm832_vm4, %v4807_v44, 0 }
0x336f   : > { %9488 = vmatpush3.bf16.msra.mxu0 %v4812_v45 }
0x3370   : > { %9499 = vmatprep.subr.bf16.mxu0 %v9944_v20 }
0x3377   : > { %v9900_v46 = vpop.eup %9899 }
0x3378   : > { %v4804_v47 = vmul.f32 %v9900_v46, %v9898_v39 }
0x337a   : > { %v4805_v50 = vpack.c.bf16 %v4804_v47, %v4804_v47 }
0x337c   : > { %9490 = vmatmul.mubr.msk.bf16.vlgmr.msra.gmra.mxu0 %vm816_vm5, %v4805_v50 }
0x337d   : > { %9500 = vmatpush3.bf16.xpose.msra.mxu0 %v4907_v1  ;;  %9501 = vmatprep.mubr.msk.bf16.mxu0 %vm9945_vm2, %v9944_v20 }
0x337e   : > { %9511 = vmatprep.subr.bf16.mxu0 %v9944_v20 }
0x3384   : > { %9502 = vmatmul.mubr.msk.bf16.vlgmr.msra.gmra.mxu0 %vm768_vm3, %v4900_v53 }
0x3385   : > { %9512 = vmatpush3.bf16.msra.mxu0 %v10472_v34  ;;  %9513 = vmatprep.mubr.msk.bf16.mxu0 %vm9945_vm2, %v9944_v20 }
0x3386   : > { %9523 = vmatprep.subr.bf16.mxu0 %v9944_v20 }
0x343c   : > { %v4848_v54 = vpop.f32.mrf.mxu0 }
0x343d   : > { %v4854_v58 = vpack.c.bf16 %v4848_v54, %v4848_v54 }
0x343e   : > { %v9491_v59 = vpop.f32.mrf.mxu0 }
0x343f   : > { %9496 = vmatmul.mubr.msk.bf16.vlgmr.msra.gmra.mxu1 %vm768_vm3, %v4854_v58 }
0x3440   : > { %v4851_v57 = vpop.f32.mrf.mxu0  ;;  %9507 = vmatprep.mubr.msk.bf16.mxu1 %vm9945_vm2, %v9944_v20 }
0x3442   : > { %v9492_v63 = vpop.f32.mrf.mxu0 }
0x3444   : > { %v4943_v60 = vpop.f32.mrf.mxu0 }
0x3445   : > { %v4949_v29 = vmul.f32 0.5, %v4943_v60 }
0x3446   : > { %v9503_v0 = vpop.f32.mrf.mxu0 }
0x3447   : > { %v4950_v34 = vsel %vm816_vm5, %v4949_v29, -inf }
0x3448   : > { %4951 = vmax.xlane.f32.xlu0 %v4950_v34  ;;  %v4946_v3 = vpop.f32.mrf.mxu0 }
0x344a   : > { %v9504_v2 = vpop.f32.mrf.mxu0 }
0x345e   : > { %4962 = vrot.lane.b32.xlu0 %v10626_v33, %s11403_s16 }
0x3462   : > { %5055 = vrot.lane.b32.xlu0 %v10588_v55, %s11404_s4 }
0x34d1   : > { %v4952_v4 = vpop.xlane.xlu0 %4951 }
0x34d2   : > { %v4953_v56 = vsub.f32 %v4949_v29, %v4952_v4 }
0x34d4   : > { %v4954_v5 = vmul.f32 1.442695, %v4953_v56 }
0x34d5   : > { %v4963_v6 = vpop.permute.xlu0 %4962 }
0x34d6   : > { %9901 = vpow2.f32 %v4954_v5  ;;  %v4968_v36 = vsel %vm832_vm4, %v4963_v6, 0 }
0x34d7   : > { %9506 = vmatpush3.bf16.msra.mxu1 %v4968_v36 }
0x34d8   : > { %9517 = vmatprep.subr.bf16.mxu1 %v9944_v20 }
0x34d9   : > { %v5056_v51 = vpop.permute.xlu0 %5055 }
0x34e3   : > { %v9902_v10 = vpop.eup %9901 }
0x34e4   : > { %v4956_v12 = vsel %vm816_vm5, %v9902_v10, 0.0 }
0x34e5   : > { %4957 = vadd.xlane.f32.xlu1 %v4956_v12 }
0x34f6   : > { %5057 = vrot.lane.b32.xlu1 %v10588_v55, %s11405_s3 }
0x34ff   : > { %v4892_v24 = vpop.f32.mrf.mxu1 }
0x3500   : > { %v4898_v15 = vadd.f32 %v4892_v24, %v4742_v31 }
0x3501   : > { %v9497_v16 = vpop.f32.mrf.mxu1 }
0x3503   : > { %v4895_v17 = vpop.f32.mrf.mxu1 }
0x3505   : > { %v9498_v23 = vpop.f32.mrf.mxu1 }
0x356e   : > { %v4958_v18 = vpop.xlane.xlu1 %4957 }
0x356f   : > { %9903 = vrcp.f32 %v4958_v18 }
0x3572   : > { %v5058_v26 = vpop.permute.xlu1 %5057 }
0x3573   : > { %v5063_v32 = vsel %vm768_vm3, %v5058_v26, 0 }
0x357c   : > { %v9904_v22 = vpop.eup %9903 }
0x357d   : > { %v4960_v25 = vmul.f32 %v9904_v22, %v9902_v10 }
0x357f   : > { %v4961_v62 = vpack.c.bf16 %v4960_v25, %v4960_v25 }
0x3581   : > { %9508 = vmatmul.mubr.msk.bf16.vlgmr.msra.gmra.mxu1 %vm816_vm5, %v4961_v62 }
0x3582   : > { %9518 = vmatpush3.bf16.xpose.msra.mxu1 %v5063_v32  ;;  %9519 = vmatprep.mubr.msk.bf16.mxu1 %vm9945_vm2, %v9944_v20 }
0x3583   : > { %9529 = vmatprep.subr.bf16.mxu1 %v9944_v20 }
0x3589   : > { %9520 = vmatmul.mubr.msk.bf16.vlgmr.msra.gmra.mxu1 %vm768_vm3, %v5056_v51 }
0x358a   : > { %9530 = vmatpush3.bf16.msra.mxu1 %v10498_v13  ;;  %9531 = vmatprep.mubr.msk.bf16.mxu1 %vm9945_vm2, %v9944_v20 }
0x358b   : > { %9541 = vmatprep.subr.bf16.mxu1 %v9944_v20 }
0x3641   : > { %v5004_v35 = vpop.f32.mrf.mxu1 }
0x3642   : > { %v5010_v37 = vpack.c.bf16 %v5004_v35, %v5004_v35 }
0x3643   : > { %v9509_v27 = vpop.f32.mrf.mxu1 }
0x3644   : > { %9514 = vmatmul.mubr.msk.bf16.vlgmr.msra.gmra.mxu0 %vm768_vm3, %v5010_v37 }
0x3645   : > { %v5007_v28 = vpop.f32.mrf.mxu1  ;;  %9525 = vmatprep.mubr.msk.bf16.mxu0 %vm9945_vm2, %v9944_v20 }
0x3647   : > { %v9510_v14 = vpop.f32.mrf.mxu1 }
0x3649   : > { %v5099_v39 = vpop.f32.mrf.mxu1 }
0x364a   : > { %v5105_v40 = vmul.f32 0.5, %v5099_v39 }
0x364b   : > { %v9521_v41 = vpop.f32.mrf.mxu1 }
0x364c   : > { %v5106_v13 = vsel %vm816_vm5, %v5105_v40, -inf }
0x364d   : > { %5107 = vmax.xlane.f32.xlu1 %v5106_v13  ;;  %v5102_v31 = vpop.f32.mrf.mxu1 }
0x364f   : > { %v9522_v48 = vpop.f32.mrf.mxu1 }
0x365e   : > { %5213 = vrot.lane.b32.xlu1 %v10588_v55, %s11406_s14 }
0x3662   : > { %5211 = vrot.lane.b32.xlu1 %v10588_v55, %s11407_s20 }
0x36d6   : > { %v5108_v42 = vpop.xlane.xlu1 %5107 }
0x36d7   : > { %v5109_v43 = vsub.f32 %v5105_v40, %v5108_v42 }
0x36d9   : > { %v5110_v11 = vmul.f32 1.442695, %v5109_v43 }
0x36da   : > { %v5214_v63 = vpop.permute.xlu1 %5213 }
0x36db   : > { %9905 = vpow2.f32 %v5110_v11  ;;  %v5219_v29 = vsel %vm768_vm3, %v5214_v63, 0 }
0x36de   : > { %v5212_v0 = vpop.permute.xlu1 %5211 }
0x36e8   : > { %v9906_v44 = vpop.eup %9905 }
0x36e9   : > { %v5112_v45 = vsel %vm816_vm5, %v9906_v44, 0.0 }
0x36ea   : > { %5113 = vadd.xlane.f32.xlu0 %v5112_v45 }
0x3700   : > { %5118 = vrot.lane.b32.xlu0 %v10626_v33, %s11404_s4  ;;  %s11413_s4 = scalar_lea.vmem %s11346_s7, %s10064_s15 }
0x3704   : > { %v5048_v46 = vpop.f32.mrf.mxu0 }
0x3705   : > { %v5054_v47 = vadd.f32 %v5048_v46, %v4898_v15 }
0x3706   : > { %v9515_v49 = vpop.f32.mrf.mxu0 }
0x3708   : > { %v5051_v50 = vpop.f32.mrf.mxu0 }
0x370a   : > { %v9516_v1 = vpop.f32.mrf.mxu0 }
0x3773   : > { %v5114_v53 = vpop.xlane.xlu0 %5113 }
0x3774   : > { %9907 = vrcp.f32 %v5114_v53 }
0x3777   : > { %v5119_v54 = vpop.permute.xlu0 %5118 }
0x3778   : > { %v5124_v58 = vsel %vm832_vm4, %v5119_v54, 0 }
0x3779   : > { %9524 = vmatpush3.bf16.msra.mxu0 %v5124_v58 }
0x377a   : > { %9535 = vmatprep.subr.bf16.mxu0 %v9944_v20 }
0x3781   : > { %v9908_v59 = vpop.eup %9907 }
0x3782   : > { %v5116_v57 = vmul.f32 %v9908_v59, %v9906_v44 }
0x3784   : > { %v5117_v60 = vpack.c.bf16 %v5116_v57, %v5116_v57 }
0x3786   : > { %9526 = vmatmul.mubr.msk.bf16.vlgmr.msra.gmra.mxu0 %vm816_vm5, %v5117_v60 }
0x3787   : > { %9536 = vmatpush3.bf16.xpose.msra.mxu0 %v5219_v29  ;;  %9537 = vmatprep.mubr.msk.bf16.mxu0 %vm9945_vm2, %v9944_v20 }
0x3788   : > { %9547 = vmatprep.subr.bf16.mxu0 %v9944_v20 }
0x378e   : > { %9538 = vmatmul.mubr.msk.bf16.vlgmr.msra.gmra.mxu0 %vm768_vm3, %v5212_v0 }
0x378f   : > { %9548 = vmatpush3.bf16.msra.mxu0 %v10525_v61  ;;  %9549 = vmatprep.mubr.msk.bf16.mxu0 %vm9945_vm2, %v9944_v20 }
0x3790   : > { %9559 = vmatprep.subr.bf16.mxu0 %v9944_v20 }
0x3846   : > { %v5160_v34 = vpop.f32.mrf.mxu0 }
0x3847   : > { %v5166_v3 = vpack.c.bf16 %v5160_v34, %v5160_v34 }
0x3848   : > { %v9527_v2 = vpop.f32.mrf.mxu0 }
0x3849   : > { %9532 = vmatmul.mubr.msk.bf16.vlgmr.msra.gmra.mxu1 %vm768_vm3, %v5166_v3 }
0x384a   : > { %v5163_v4 = vpop.f32.mrf.mxu0  ;;  %9543 = vmatprep.mubr.msk.bf16.mxu1 %vm9945_vm2, %v9944_v20 }
0x384c   : > { %v9528_v56 = vpop.f32.mrf.mxu0 }
0x384e   : > { %v5255_v5 = vpop.f32.mrf.mxu0 }
0x384f   : > { %v5261_v6 = vmul.f32 0.5, %v5255_v5 }
0x3850   : > { %v9539_v36 = vpop.f32.mrf.mxu0 }
0x3851   : > { %v5262_v61 = vsel %vm816_vm5, %v5261_v6, -inf }
0x3852   : > { %5263 = vmax.xlane.f32.xlu0 %v5262_v61  ;;  %v5258_v10 = vpop.f32.mrf.mxu0 }
0x3854   : > { %v9540_v12 = vpop.f32.mrf.mxu0 }
0x3868   : > { %5274 = vrot.lane.b32.xlu0 %v10626_v33, %s11407_s20  ;;  %s11415_s20 = scalar_lea.vmem %s11351_s12, %s10064_s15 }
0x386c   : > { %5367 = vrot.lane.b32.xlu0 %v10588_v55, %s11408_s22 }
0x38db   : > { %v5264_v24 = vpop.xlane.xlu0 %5263 }
0x38dc   : > { %v5265_v15 = vsub.f32 %v5261_v6, %v5264_v24 }
0x38de   : > { %v5266_v16 = vmul.f32 1.442695, %v5265_v15 }
0x38df   : > { %v5275_v17 = vpop.permute.xlu0 %5274 }
0x38e0   : > { %9909 = vpow2.f32 %v5266_v16  ;;  %v5280_v23 = vsel %vm832_vm4, %v5275_v17, 0 }
0x38e1   : > { %9542 = vmatpush3.bf16.msra.mxu1 %v5280_v23 }
0x38e2   : > { %9553 = vmatprep.subr.bf16.mxu1 %v9944_v20 }
0x38e3   : > { %v5368_v40 = vpop.permute.xlu0 %5367 }
0x38ed   : > { %v9910_v18 = vpop.eup %9909 }
0x38ee   : > { %v5268_v22 = vsel %vm816_vm5, %v9910_v18, 0.0 }
0x38ef   : > { %5269 = vadd.xlane.f32.xlu1 %v5268_v22 }
0x3900   : > { %5369 = vrot.lane.b32.xlu1 %v10588_v55, %s11409_s25 }
0x3909   : > { %v5204_v25 = vpop.f32.mrf.mxu1 }
0x390a   : > { %v5210_v26 = vadd.f32 %v5204_v25, %v5054_v47 }
0x390b   : > { %v9533_v62 = vpop.f32.mrf.mxu1 }
0x390d   : > { %v5207_v32 = vpop.f32.mrf.mxu1 }
0x390f   : > { %v9534_v51 = vpop.f32.mrf.mxu1 }
0x3978   : > { %v5270_v35 = vpop.xlane.xlu1 %5269 }
0x3979   : > { %9911 = vrcp.f32 %v5270_v35 }
0x397c   : > { %v5370_v28 = vpop.permute.xlu1 %5369 }
0x397d   : > { %v5375_v39 = vsel %vm768_vm3, %v5370_v28, 0 }
0x3986   : > { %v9912_v37 = vpop.eup %9911 }
0x3987   : > { %v5272_v27 = vmul.f32 %v9912_v37, %v9910_v18 }
0x3989   : > { %v5273_v14 = vpack.c.bf16 %v5272_v27, %v5272_v27 }
0x398b   : > { %9544 = vmatmul.mubr.msk.bf16.vlgmr.msra.gmra.mxu1 %vm816_vm5, %v5273_v14 }
0x398c   : > { %9554 = vmatpush3.bf16.xpose.msra.mxu1 %v5375_v39  ;;  %9555 = vmatprep.mubr.msk.bf16.mxu1 %vm9945_vm2, %v9944_v20 }
0x398d   : > { %9565 = vmatprep.subr.bf16.mxu1 %v9944_v20 }
0x3993   : > { %9556 = vmatmul.mubr.msk.bf16.vlgmr.msra.gmra.mxu1 %vm768_vm3, %v5368_v40 }
0x3994   : > { %9566 = vmatpush3.bf16.msra.mxu1 %v10551_v52  ;;  %9567 = vmatprep.mubr.msk.bf16.mxu1 %vm9945_vm2, %v9944_v20 }
0x3995   : > { %9577 = vmatprep.subr.bf16.mxu1 %v9944_v20 }
0x3a4b   : > { %v5316_v41 = vpop.f32.mrf.mxu1 }
0x3a4c   : > { %v5322_v13 = vpack.c.bf16 %v5316_v41, %v5316_v41 }
0x3a4d   : > { %v9545_v31 = vpop.f32.mrf.mxu1 }
0x3a4e   : > { %9550 = vmatmul.mubr.msk.bf16.vlgmr.msra.gmra.mxu0 %vm768_vm3, %v5322_v13 }
0x3a4f   : > { %v5319_v48 = vpop.f32.mrf.mxu1  ;;  %9561 = vmatprep.mubr.msk.bf16.mxu0 %vm9945_vm2, %v9944_v20 }
0x3a51   : > { %v9546_v42 = vpop.f32.mrf.mxu1 }
0x3a53   : > { %v5411_v43 = vpop.f32.mrf.mxu1 }
0x3a54   : > { %v5417_v11 = vmul.f32 0.5, %v5411_v43 }
0x3a55   : > { %v9557_v44 = vpop.f32.mrf.mxu1 }
0x3a56   : > { %v5418_v52 = vsel %vm816_vm5, %v5417_v11, -inf  ;;  %v8450_v44 = vld [vmem:[%s11411_s24] ss:$0 sm:$0xff] }
0x3a57   : > { %5419 = vmax.xlane.f32.xlu1 %v5418_v52  ;;  %v5414_v45 = vpop.f32.mrf.mxu1 }
0x3a59   : > { %v9558_v46 = vpop.f32.mrf.mxu1 }
0x3a68   : > { %5525 = vrot.lane.b32.xlu1 %v10588_v55, %s11410_s26  ;;  %s11416_s26 = scalar_lea.vmem %s11352_s13, %s10064_s15 }
0x3a6c   : > { %5523 = vrot.lane.b32.xlu1 %v10588_v55, %s9974_s17 }
0x3ae0   : > { %v5420_v47 = vpop.xlane.xlu1 %5419 }
0x3ae1   : > { %v5421_v49 = vsub.f32 %v5417_v11, %v5420_v47 }
0x3ae3   : > { %v5422_v50 = vmul.f32 1.442695, %v5421_v49 }
0x3ae4   : > { %v5526_v2 = vpop.permute.xlu1 %5525 }
0x3ae5   : > { %9913 = vpow2.f32 %v5422_v50  ;;  %v5531_v56 = vsel %vm768_vm3, %v5526_v2, 0 }
0x3ae8   : > { %v5524_v5 = vpop.permute.xlu1 %5523 }
0x3af2   : > { %v9914_v1 = vpop.eup %9913 }
0x3af3   : > { %v5424_v53 = vsel %vm816_vm5, %v9914_v1, 0.0 }
0x3af4   : > { %5425 = vadd.xlane.f32.xlu0 %v5424_v53 }
0x3b0a   : > { %5430 = vrot.lane.b32.xlu0 %v10626_v33, %s11408_s22 }
0x3b0e   : > { %v5360_v54 = vpop.f32.mrf.mxu0 }
0x3b0f   : > { %v5366_v58 = vadd.f32 %v5360_v54, %v5210_v26 }
0x3b10   : > { %v9551_v59 = vpop.f32.mrf.mxu0 }
0x3b12   : > { %v5363_v57 = vpop.f32.mrf.mxu0 }
0x3b14   : > { %v9552_v63 = vpop.f32.mrf.mxu0 }
0x3b7d   : > { %v5426_v60 = vpop.xlane.xlu0 %5425 }
0x3b7e   : > { %9915 = vrcp.f32 %v5426_v60 }
0x3b81   : > { %v5431_v29 = vpop.permute.xlu0 %5430 }
0x3b82   : > { %v5436_v0 = vsel %vm832_vm4, %v5431_v29, 0 }
0x3b83   : > { %9560 = vmatpush3.bf16.msra.mxu0 %v5436_v0 }
0x3b84   : > { %9571 = vmatprep.subr.bf16.mxu0 %v9944_v20 }
0x3b8b   : > { %v9916_v34 = vpop.eup %9915 }
0x3b8c   : > { %v5428_v3 = vmul.f32 %v9916_v34, %v9914_v1  ;;  %v9933_v1 = vld [vmem:[#allocation2] sm:$0xff] }
0x3b8e   : > { %v5429_v4 = vpack.c.bf16 %v5428_v3, %v5428_v3 }
0x3b90   : > { %9562 = vmatmul.mubr.msk.bf16.vlgmr.msra.gmra.mxu0 %vm816_vm5, %v5429_v4 }
0x3b91   : > { %9572 = vmatpush3.bf16.xpose.msra.mxu0 %v5531_v56  ;;  %9573 = vmatprep.mubr.msk.bf16.mxu0 %vm9945_vm2, %v9944_v20 }
0x3b92   : > { %9583 = vmatprep.subr.bf16.mxu0 %v9944_v20 }
0x3b98   : > { %9574 = vmatmul.mubr.msk.bf16.vlgmr.msra.gmra.mxu0 %vm768_vm3, %v5524_v5 }
0x3b99   : > { %9584 = vmatpush3.bf16.msra.mxu0 %v10578_v38  ;;  %9585 = vmatprep.mubr.msk.bf16.mxu0 %vm9945_vm2, %v9944_v20 }
0x3b9a   : > { %9595 = vmatprep.subr.bf16.mxu0 %v9944_v20 }
0x3c50   : > { %v5472_v6 = vpop.f32.mrf.mxu0 }
0x3c51   : > { %v5478_v36 = vpack.c.bf16 %v5472_v6, %v5472_v6 }
0x3c52   : > { %v9563_v61 = vpop.f32.mrf.mxu0 }
0x3c53   : > { %9568 = vmatmul.mubr.msk.bf16.vlgmr.msra.gmra.mxu1 %vm768_vm3, %v5478_v36 }
0x3c54   : > { %v5475_v10 = vpop.f32.mrf.mxu0  ;;  %9579 = vmatprep.mubr.msk.bf16.mxu1 %vm9945_vm2, %v9944_v20 }
0x3c56   : > { %v9564_v12 = vpop.f32.mrf.mxu0 }
0x3c58   : > { %v5567_v24 = vpop.f32.mrf.mxu0 }
0x3c59   : > { %v5573_v15 = vmul.f32 0.5, %v5567_v24 }
0x3c5a   : > { %v9575_v16 = vpop.f32.mrf.mxu0 }
0x3c5b   : > { %v5574_v38 = vsel %vm816_vm5, %v5573_v15, -inf }
0x3c5c   : > { %5575 = vmax.xlane.f32.xlu0 %v5574_v38  ;;  %v5570_v17 = vpop.f32.mrf.mxu0 }
0x3c5e   : > { %v9576_v23 = vpop.f32.mrf.mxu0 }
0x3c72   : > { %5586 = vrot.lane.b32.xlu0 %v10626_v33, %s9974_s17 }
0x3c76   : > { %5679 = vrot.lane.b32.xlu0 %v10588_v55, %s9975_s21 }
0x3ce5   : > { %v5576_v18 = vpop.xlane.xlu0 %5575 }
0x3ce6   : > { %v5577_v22 = vsub.f32 %v5573_v15, %v5576_v18 }
0x3ce8   : > { %v5578_v25 = vmul.f32 1.442695, %v5577_v22 }
0x3ce9   : > { %v5587_v26 = vpop.permute.xlu0 %5586 }
0x3cea   : > { %9917 = vpow2.f32 %v5578_v25  ;;  %v5592_v62 = vsel %vm832_vm4, %v5587_v26, 0 }
0x3ceb   : > { %9578 = vmatpush3.bf16.msra.mxu1 %v5592_v62  ;;  %v9934_v62 = vld [vmem:[#allocation2 + $0x8] sm:$0xff] }
0x3cec   : > { %9589 = vmatprep.subr.bf16.mxu1 %v9944_v20 }
0x3cf7   : > { %v9918_v32 = vpop.eup %9917 }
0x3cf8   : > { %v5580_v51 = vsel %vm816_vm5, %v9918_v32, 0.0 }
0x3cf9   : > { %5581 = vadd.xlane.f32.xlu1 %v5580_v51 }
0x3d0a   : > { %5681 = vrot.lane.b32.xlu1 %v10588_v55, %s9976_s27  ;;  %v5680_v55 = vpop.permute.xlu0 %5679 }
0x3d13   : > { %v5516_v35 = vpop.f32.mrf.mxu1 }
0x3d14   : > { %v5522_v37 = vadd.f32 %v5516_v35, %v5366_v58 }
0x3d15   : > { %v9569_v27 = vpop.f32.mrf.mxu1 }
0x3d17   : > { %v5519_v28 = vpop.f32.mrf.mxu1 }
0x3d19   : > { %v9570_v14 = vpop.f32.mrf.mxu1 }
0x3d82   : > { %v5582_v39 = vpop.xlane.xlu1 %5581 }
0x3d83   : > { %9919 = vrcp.f32 %v5582_v39 }
0x3d86   : > { %v5682_v13 = vpop.permute.xlu1 %5681 }
0x3d87   : > { %v5687_v48 = vsel %vm768_vm3, %v5682_v13, 0  ;;  %v5904_v13 = vld [vmem:[%s10100_s23 + $0x180] sm:$0xff] }
0x3d90   : > { %v9920_v40 = vpop.eup %9919 }
0x3d91   : > { %v5584_v41 = vmul.f32 %v9920_v40, %v9918_v32 }
0x3d93   : > { %v5585_v31 = vpack.c.bf16 %v5584_v41, %v5584_v41 }
0x3d95   : > { %9580 = vmatmul.mubr.msk.bf16.vlgmr.msra.gmra.mxu1 %vm816_vm5, %v5585_v31  ;;  %v5906_v31 = vld [vmem:[%s10100_s23 + $0x1c0] sm:$0xff] }
0x3d96   : > { %9590 = vmatpush3.bf16.xpose.msra.mxu1 %v5687_v48  ;;  %9591 = vmatprep.mubr.msk.bf16.mxu1 %vm9945_vm2, %v9944_v20  ;;  %v5905_v48 = vld [vmem:[%s10100_s23 + $0x188] sm:$0xff] }
0x3d97   : > { %9601 = vmatprep.subr.bf16.mxu1 %v9944_v20 }
0x3d9d   : > { %9592 = vmatmul.mubr.msk.bf16.vlgmr.msra.gmra.mxu1 %vm768_vm3, %v5680_v55  ;;  %v8466_v55 = vcombine.high %v5904_v13, %v5906_v31 }
0x3d9e   : > { %9602 = vmatpush3.bf16.msra.mxu1 %v10602_v7  ;;  %9603 = vmatprep.mubr.msk.bf16.mxu1 %vm9945_vm2, %v9944_v20  ;;  %v5842_v7 = vadd.f32 %v8450_v44, %v10643_v9 }
0x3da0   : > { %v5844_v53 = vadd.f32 %v9933_v1, %v5842_v7  ;;  %v5901_v7 = vld [vmem:[%s10100_s23 + $0x108] sm:$0xff] }
0x3da2   : > { %v5848_v59 = vsel %vm708_vm1, %v5844_v53, 0.0 }
0x3e55   : > { %v5628_v42 = vpop.f32.mrf.mxu1 }
0x3e56   : > { %v5634_v43 = vpack.c.bf16 %v5628_v42, %v5628_v42  ;;  %v5907_v42 = vld [vmem:[%s10100_s23 + $0x1c8] sm:$0xff] }
0x3e57   : > { %v9581_v11 = vpop.f32.mrf.mxu1 }
0x3e58   : > { %9586 = vmatmul.mubr.msk.bf16.vlgmr.msra.gmra.mxu0 %vm768_vm3, %v5634_v43  ;;  %v8465_v43 = vcombine.low %v5904_v13, %v5906_v31  ;;  %v8467_v11 = vcombine.low %v5905_v48, %v5907_v42 }
0x3e59   : > { %v5631_v52 = vpop.f32.mrf.mxu1  ;;  %9597 = vmatprep.mubr.msk.bf16.mxu0 %vm9945_vm2, %v9944_v20 }
0x3e5a   : > { %v5900_v52 = vld [vmem:[%s10100_s23 + $0x100] sm:$0xff] }
0x3e5b   : > { %v9582_v45 = vpop.f32.mrf.mxu1 }
0x3e5c   : > { %v5902_v45 = vld [vmem:[%s10100_s23 + $0x140] sm:$0xff] }
0x3e5d   : > { %v5723_v46 = vpop.f32.mrf.mxu1 }
0x3e5e   : > { %v5729_v47 = vmul.f32 0.5, %v5723_v46  ;;  %v8462_v46 = vcombine.high %v5900_v52, %v5902_v45 }
0x3e5f   : > { %v9593_v49 = vpop.f32.mrf.mxu1 }
0x3e60   : > { %v5730_v50 = vsel %vm816_vm5, %v5729_v47, -inf  ;;  %v8461_v49 = vcombine.low %v5900_v52, %v5902_v45 }
0x3e61   : > { %5731 = vmax.xlane.f32.xlu1 %v5730_v50  ;;  %v5726_v54 = vpop.f32.mrf.mxu1 }
0x3e62   : > { %v5898_v54 = vld [vmem:[%s10100_s23 + $0xc0] sm:$0xff] }
0x3e63   : > { %v9594_v58 = vpop.f32.mrf.mxu1 }
0x3e64   : > { %v5897_v58 = vld [vmem:[%s10100_s23 + $0x88] sm:$0xff] }
0x3e65   : > { %5849 = vadd.xlane.f32.xlu1 %v5848_v59 }
0x3eea   : > { %v5732_v57 = vpop.xlane.xlu1 %5731 }
0x3eeb   : > { %v5733_v63 = vsub.f32 %v5729_v47, %v5732_v57  ;;  %v5903_v47 = vld [vmem:[%s10100_s23 + $0x148] sm:$0xff] }
0x3eec   : > { %v8463_v50 = vcombine.low %v5901_v7, %v5903_v47  ;;  %v8464_v1 = vcombine.high %v5901_v7, %v5903_v47  ;;  %v5899_v57 = vld [vmem:[%s10100_s23 + $0xc8] sm:$0xff]  ;;  %v6177_v47 = vld [vmem:[%s10100_s23 + $0x50] sm:$0xff] }
0x3eed   : > { %v5734_v60 = vmul.f32 1.442695, %v5733_v63 }
0x3eee   : > { %v5850_v16 = vpop.xlane.xlu1 %5849 }
0x3eef   : > { %9921 = vpow2.f32 %v5734_v60  ;;  %v5855_v38 = vmul.f32 0.015625, %v5850_v16  ;;  %v8459_v60 = vcombine.low %v5897_v58, %v5899_v57 }
0x3ef1   : > { %v10987_v22 = vsub.f32 %v5844_v53, %v5855_v38  ;;  %v5896_v53 = vld [vmem:[%s10100_s23 + $0x80] sm:$0xff] }
0x3ef2   : > { %v8458_v59 = vcombine.high %v5896_v53, %v5898_v54  ;;  %v8457_v63 = vcombine.low %v5896_v53, %v5898_v54 }
0x3efc   : > { %v9922_v20 = vpop.eup %9921 }
0x3efd   : > { %v5736_v9 = vsel %vm816_vm5, %v9922_v20, 0.0 }
0x3efe   : > { %5737 = vadd.xlane.f32.xlu0 %v5736_v9  ;;  %v5892_v9 = vld [vmem:[%s10100_s23] sm:$0xff] }
0x3f14   : > { %5742 = vrot.lane.b32.xlu0 %v10626_v33, %s9975_s21 }
0x3f18   : > { %v5672_v29 = vpop.f32.mrf.mxu0 }
0x3f19   : > { %v5678_v0 = vadd.f32 %v5672_v29, %v5522_v37  ;;  %v5859_v37 = vmul.f32 %v10987_v22, %v10987_v22  ;;  %v5894_v29 = vld [vmem:[%s10100_s23 + $0x40] sm:$0xff] }
0x3f1a   : > { %v9587_v34 = vpop.f32.mrf.mxu0 }
0x3f1b   : > { %v5861_v27 = vsel %vm708_vm1, %v5859_v37, 0.0  ;;  %v8454_v34 = vcombine.high %v5892_v9, %v5894_v29  ;;  %v8452_v37 = vld [vmem:[%s11413_s4] ss:$0 sm:$0xff] }
0x3f1c   : > { %v5675_v3 = vpop.f32.mrf.mxu0 }
0x3f1d   : > { %v5895_v3 = vld [vmem:[%s10100_s23 + $0x48] sm:$0xff] }
0x3f1e   : > { %v9588_v2 = vpop.f32.mrf.mxu0 }
0x3f1f   : > { %v8453_v2 = vcombine.low %v5892_v9, %v5894_v29  ;;  %v9672_v9 = vld [vmem:[%s10112_s18 + $0x1b8] sm:$0xff]   ;;  %v9673_v29 = vld [vmem:[%s10112_s18 + $0x170] sm:$0xff]  }
0x3f87   : > { %v5738_v4 = vpop.xlane.xlu0 %5737 }
0x3f88   : > { %9923 = vrcp.f32 %v5738_v4 }
0x3f8b   : > { %v5743_v56 = vpop.permute.xlu0 %5742 }
0x3f8c   : > { %v5748_v5 = vsel %vm832_vm4, %v5743_v56, 0 }
0x3f8d   : > { %9596 = vmatpush3.bf16.msra.mxu0 %v5748_v5  ;;  %v6187_v5 = vld [vmem:[%s10100_s23 + $0x190] sm:$0xff] }
0x3f8e   : > { %6021 = vmatprep.subr.bf16.mxu0 %v8466_v55  ;;  %v6179_v55 = vld [vmem:[%s10100_s23 + $0x90] sm:$0xff] }
0x3f95   : > { %v9924_v6 = vpop.eup %9923 }
0x3f96   : > { %v5740_v36 = vmul.f32 %v9924_v6, %v9922_v20  ;;  %v8460_v20 = vcombine.high %v5897_v58, %v5899_v57  ;;  %v6189_v6 = vld [vmem:[%s10100_s23 + $0x1d0] sm:$0xff] }
0x3f98   : > { %v5741_v61 = vpack.c.bf16 %v5740_v36, %v5740_v36  ;;  %v6188_v36 = vld [vmem:[%s10100_s23 + $0x198] sm:$0xff] }
0x3f9a   : > { %9598 = vmatmul.mubr.msk.bf16.vlgmr.msra.gmra.mxu0 %vm816_vm5, %v5741_v61  ;;  %v8483_v61 = vcombine.low %v6187_v5, %v6189_v6 }
0x3f9b   : > { %6045 = vmatprep.mubr.bf16.mxu0 %v9943_v8  ;;  %6022 = vmatpush1.bf16.msra.mxu0 %v8465_v43  ;;  %v6180_v43 = vld [vmem:[%s10100_s23 + $0x98] sm:$0xff] }
0x3f9c   : > { %6023 = vmatprep.subr.bf16.mxu0 %v8462_v46  ;;  %v6175_v46 = vld [vmem:[%s10100_s23 + $0x10] sm:$0xff] }
0x3f9d   : > { %v8472_v54 = vcombine.high %v6175_v46, %v6177_v47 }
0x3f9f   : > { %6024 = vmatpush1.bf16.msra.mxu0 %v8461_v49  ;;  %v6176_v49 = vld [vmem:[%s10100_s23 + $0x18] sm:$0xff] }
0x3fa0   : > { %6025 = vmatprep.subr.bf16.mxu0 %v8458_v59  ;;  %v8471_v59 = vcombine.low %v6175_v46, %v6177_v47 }
0x3fa3   : > { %6026 = vmatpush1.bf16.msra.mxu0 %v8457_v63  ;;  %v9669_v63 = vld [vmem:[%s10112_s18 + $0x178] sm:$0xff]  }
0x3fa4   : > { %6027 = vmatprep.subr.bf16.mxu0 %v8454_v34  ;;  %v9675_v34 = vld [vmem:[%s10112_s18 + $0x130] sm:$0xff]  }
0x3fa7   : > { %6028 = vmatpush1.bf16.msra.mxu0 %v8453_v2  ;;  %v9677_v2 = vld [vmem:[%s10112_s18 + $0x168] sm:$0xff]  }
0x405a   : > { %v5784_v10 = vpop.f32.mrf.mxu0 }
0x405b   : > { %v5790_v33 = vpack.c.bf16 %v5784_v10, %v5784_v10  ;;  %v8484_v10 = vcombine.high %v6187_v5, %v6189_v6  ;;  %v9680_v5 = vld [vmem:[%s10112_s18 + $0x1a8] sm:$0xff]   ;;  %v9681_v6 = vld [vmem:[%s10112_s18 + $0x160] sm:$0xff]  }
0x405c   : > { %v9599_v12 = vpop.f32.mrf.mxu0 }
0x405d   : > { %9604 = vmatmul.mubr.msk.bf16.vlgmr.msra.gmra.mxu1 %vm768_vm3, %v5790_v33  ;;  %v6190_v33 = vld [vmem:[%s10100_s23 + $0x1d8] sm:$0xff]  ;;  %6301 = vmatprep.subr.bf16.mxu0 %v8484_v10  ;;  %v9684_v10 = vld [vmem:[%s10112_s18 + $0x1a0] sm:$0xff]  }
0x405e   : > { %v5787_v24 = vpop.f32.mrf.mxu0  ;;  %6088 = vmatprep.mubr.bf16.mxu1 %v9943_v8  ;;  %v8485_v12 = vcombine.low %v6188_v36, %v6190_v33 }
0x405f   : > { %v8486_v24 = vcombine.high %v6188_v36, %v6190_v33  ;;  %v9682_v36 = vld [vmem:[%s10112_s18 + $0x1e0] sm:$0xff]   ;;  %v9685_v33 = vld [vmem:[%s10112_s18 + $0x158] sm:$0xff]  }
0x4060   : > { %v9600_v15 = vpop.f32.mrf.mxu0 }
0x411d   : > { %v5828_v17 = vpop.f32.mrf.mxu1 }
0x411e   : > { %v5834_v23 = vadd.f32 %v5828_v17, %v5678_v0  ;;  %v5893_v0 = vld [vmem:[%s10100_s23 + $0x8] sm:$0xff] }
0x411f   : > { %v9605_v18 = vpop.f32.mrf.mxu1  ;;  %v8455_v4 = vcombine.low %v5893_v0, %v5895_v3  ;;  %v8456_v56 = vcombine.high %v5893_v0, %v5895_v3  ;;  %v9674_v0 = vld [vmem:[%s10112_s18 + $0x1f0] sm:$0xff]  }
0x4120   : > { %v5843_v25 = vadd.f32 %v8450_v44, %v5834_v23  ;;  %v8468_v44 = vcombine.high %v5905_v48, %v5907_v42  ;;  %v6181_v42 = vld [vmem:[%s10100_s23 + $0xd0] sm:$0xff] }
0x4121   : > { %v5831_v26 = vpop.f32.mrf.mxu1  ;;  %v8476_v45 = vcombine.high %v6179_v55, %v6181_v42  ;;  %v9676_v3 = vld [vmem:[%s10112_s18 + $0x1b0] sm:$0xff]  }
0x4122   : > { %v5845_v32 = vadd.f32 %v9934_v62, %v5843_v25  ;;  %6064 = vmatprep.subr.bf16.mxu1 %v8468_v44  ;;  %v8451_v62 = vld [vmem:[%s11412_s2] ss:$0 sm:$0xff] }
0x4123   : > { %v9606_v51 = vpop.f32.mrf.mxu1  ;;  %6065 = vmatpush1.bf16.msra.mxu1 %v8467_v11  ;;  %v6182_v11 = vld [vmem:[%s10100_s23 + $0xd8] sm:$0xff] }
0x4124   : > { %v5851_v35 = vsel %vm708_vm1, %v5845_v32, 0.0  ;;  %6066 = vmatprep.subr.bf16.mxu1 %v8464_v1  ;;  %v8478_v7 = vcombine.high %v6180_v43, %v6182_v11  ;;  %v8475_v1 = vcombine.low %v6179_v55, %v6181_v42  ;;  %v8477_v53 = vcombine.low %v6180_v43, %v6182_v11 }
0x4125   : > { %5852 = vadd.xlane.f32.xlu1 %v5851_v35  ;;  %v11103_v11 = vsub.s32 3, %v10149_v19 }
0x4127   : > { %6067 = vmatpush1.bf16.msra.mxu1 %v8463_v50  ;;  %v6178_v50 = vld [vmem:[%s10100_s23 + $0x58] sm:$0xff] }
0x4128   : > { %6068 = vmatprep.subr.bf16.mxu1 %v8460_v20  ;;  %v8474_v58 = vcombine.high %v6176_v49, %v6178_v50  ;;  %v8473_v57 = vcombine.low %v6176_v49, %v6178_v50  ;;  %v9671_v20 = vld [vmem:[%s10112_s18 + $0x138] sm:$0xff]  }
0x4129   : > { %5862 = vadd.xlane.f32.xlu1 %v5861_v27 }
0x412b   : > { %6069 = vmatpush1.bf16.msra.mxu1 %v8459_v60  ;;  %v9670_v60 = vld [vmem:[%s10112_s18 + $0x1f8] sm:$0xff]  }
0x412c   : > { %6070 = vmatprep.subr.bf16.mxu1 %v8456_v56  ;;  %v9679_v56 = vld [vmem:[%s10112_s18 + $0x128] sm:$0xff]  }
0x412f   : > { %6071 = vmatpush1.bf16.msra.mxu1 %v8455_v4  ;;  %v9678_v4 = vld [vmem:[%s10112_s18 + $0x1e8] sm:$0xff]  }
0x4130   : > { %6344 = vmatprep.subr.bf16.mxu1 %v8486_v24  ;;  %v9687_v24 = vld [vmem:[%s10112_s18 + $0x118] sm:$0xff]  }
0x41ae   : > { %v5853_v28 = vpop.xlane.xlu1 %5852 }
0x41af   : > { %v5856_v14 = vmul.f32 0.015625, %v5853_v28  ;;  %v6185_v28 = vld [vmem:[%s10100_s23 + $0x150] sm:$0xff] }
0x41b1   : > { %v10993_v39 = vsub.f32 %v5845_v32, %v5856_v14  ;;  %v6184_v14 = vld [vmem:[%s10100_s23 + $0x118] sm:$0xff] }
0x41b2   : > { %v5863_v15 = vpop.xlane.xlu1 %5862 }
0x41b3   : > { %v5860_v40 = vmul.f32 %v10993_v39, %v10993_v39  ;;  %v5867_v16 = vmul.f32 0.015625, %v5863_v15  ;;  %v9688_v15 = vld [vmem:[%s10112_s18 + $0x198] sm:$0xff]  }
0x41b5   : > { %v5864_v41 = vsel %vm708_vm1, %v5860_v40, 0.0  ;;  %v5869_v38 = vadd.f32 1e-05, %v5867_v16  ;;  %v6186_v40 = vld [vmem:[%s10100_s23 + $0x158] sm:$0xff]  ;;  %v9689_v16 = vld [vmem:[%s10112_s18 + $0x150] sm:$0xff]  }
0x41b6   : > { %5865 = vadd.xlane.f32.xlu1 %v5864_v41  ;;  %v8481_v52 = vcombine.low %v6184_v14, %v6186_v40 }
0x41b7   : > { %9925 = vrsqrt.f32 %v5869_v38  ;;  %v9690_v38 = vld [vmem:[%s10112_s18 + $0x1d0] sm:$0xff]  }
0x41c4   : > { %v9926_v25 = vpop.eup %9925 }
0x41c5   : > { %v5873_v26 = vmul.f32 %v9926_v25, %v10987_v22  ;;  %v6183_v22 = vld [vmem:[%s10100_s23 + $0x110] sm:$0xff]  ;;  %v9694_v25 = vld [vmem:[%s10112_s18 + $0x1c8] sm:$0xff]  }
0x41c6   : > { %v8480_v48 = vcombine.high %v6183_v22, %v6185_v28  ;;  %v8479_v44 = vcombine.low %v6183_v22, %v6185_v28  ;;  %v9702_v22 = vld [vmem:[%s10112_s18 + $0xf8] sm:$0xff]  }
0x41c7   : > { %v5881_v51 = vmul.f32 %v8451_v62, %v5873_v26  ;;  %v9695_v26 = vld [vmem:[%s10112_s18 + $0x108] sm:$0xff]  }
0x41c9   : > { %v11034_v41 = vadd.f32 %v8452_v37, %v5881_v51  ;;  %v9698_v51 = vld [vmem:[%s10112_s18 + $0x1c0] sm:$0xff]  }
0x423f   : > { %v5866_v17 = vpop.xlane.xlu1 %5865 }
0x4240   : > { %v5868_v23 = vmul.f32 0.015625, %v5866_v17  ;;  %v9691_v17 = vld [vmem:[%s10112_s18 + $0x110] sm:$0xff]  }
0x4242   : > { %v5870_v18 = vadd.f32 1e-05, %v5868_v23  ;;  %v9692_v23 = vld [vmem:[%s10112_s18 + $0x190] sm:$0xff]  }
0x4244   : > { %9927 = vrsqrt.f32 %v5870_v18  ;;  %v9693_v18 = vld [vmem:[%s10112_s18 + $0x148] sm:$0xff]  }
0x4251   : > { %v9928_v32 = vpop.eup %9927 }
0x4252   : > { %v5874_v35 = vmul.f32 %v9928_v32, %v10993_v39  ;;  %v8482_v39 = vcombine.high %v6184_v14, %v6186_v40  ;;  %v9697_v32 = vld [vmem:[%s10112_s18 + $0x140] sm:$0xff]  }
0x4254   : > { %v5882_v27 = vmul.f32 %v8451_v62, %v5874_v35  ;;  %v9696_v62 = vld [vmem:[%s10112_s18 + $0x188] sm:$0xff]   ;;  %v9699_v35 = vld [vmem:[%s10112_s18 + $0x100] sm:$0xff]  }
0x4256   : > { %v11036_v13 = vadd.f32 %v8452_v37, %v5882_v27  ;;  %v9700_v37 = vld [vmem:[%s10112_s18 + $0x180] sm:$0xff]   ;;  %v9701_v27 = vld [vmem:[%s10112_s18 + $0x78] sm:$0xff]  }
0x4258   : > { %v11040_v31 = vpack.c.bf16 %v11036_v13, %v11034_v41 }
0x425a   : > { %8469 = vmatmul.mubr.msk.bf16.vlgmr.msra.gmra.mxu0 %vm708_vm1, %v11040_v31  ;;  %8470 = vmatmul.mubr.msk.bf16.vlgmr.msra.gmra.mxu1 %vm708_vm1, %v11040_v31 }
0x425b   : > { %6302 = vmatpush1.bf16.msra.mxu0 %v8483_v61  ;;  %6345 = vmatpush1.bf16.msra.mxu1 %v8485_v12  ;;  %v9683_v61 = vld [vmem:[%s10112_s18 + $0x120] sm:$0xff]   ;;  %v9686_v12 = vld [vmem:[%s10112_s18 + $0x1d8] sm:$0xff]  }
0x425c   : > { %6303 = vmatprep.subr.bf16.mxu0 %v8480_v48  ;;  %6346 = vmatprep.subr.bf16.mxu1 %v8482_v39 }
0x425d   : > { %6325 = vmatprep.mubr.bf16.mxu0 %v9943_v8  ;;  %6368 = vmatprep.mubr.bf16.mxu1 %v9943_v8 }
0x425f   : > { %6304 = vmatpush1.bf16.msra.mxu0 %v8479_v44  ;;  %6347 = vmatpush1.bf16.msra.mxu1 %v8481_v52  ;;  %v6191_v44 = vld [vmem:[%s10106_s29 + $0x4] sm:$0xf]  ;;  %v11107_v52 = vsub.s32 2, %v10149_v19 }
0x4260   : > { %6305 = vmatprep.subr.bf16.mxu0 %v8476_v45  ;;  %6348 = vmatprep.subr.bf16.mxu1 %v8478_v7  ;;  %v6200_v46 = vrot.slane %v6191_v44, %v10173_v30  ;;  %v6208_v47 = vrot.slane %v6191_v44, %v11103_v11  ;;  %v6196_v49 = vrot.slane %v6191_v44, %v10154_v21 }
0x4261   : > { %v6204_v50 = vrot.slane %v6191_v44, %v11107_v52  ;;  %v9709_v44 = vld [vmem:[%s10112_s18 + $0x68] sm:$0xff]  }
0x4263   : > { %6306 = vmatpush1.bf16.msra.mxu0 %v8475_v1  ;;  %6349 = vmatpush1.bf16.msra.mxu1 %v8477_v53 }
0x4264   : > { %6307 = vmatprep.subr.bf16.mxu0 %v8472_v54  ;;  %6350 = vmatprep.subr.bf16.mxu1 %v8474_v58  ;;  %v11114_v54 = vld [vmem:[%s10106_s29] sm:$0xf] }
0x4265   : > { %v5917_v58 = vrot.slane %v11114_v54, %v10173_v30  ;;  %v5925_v19 = vrot.slane %v11114_v54, %v11103_v11 }
0x4267   : > { %6308 = vmatpush1.bf16.msra.mxu0 %v8471_v59  ;;  %6351 = vmatpush1.bf16.msra.mxu1 %v8473_v57 }
0x4268   : > { %8855 = vmatprep.subr.bf16.mxu0 %v9669_v63  ;;  %8877 = vmatprep.subr.bf16.mxu1 %v9670_v60 }
0x426a   : > { %8487 = vmatmul.mubr.msk.bf16.vlgmr.msra.gmra.mxu0 %vm708_vm1, %v11040_v31  ;;  %8488 = vmatmul.mubr.msk.bf16.vlgmr.msra.gmra.mxu1 %vm708_vm1, %v11040_v31 }
0x426b   : > { %8856 = vmatpush3.bf16.msra.mxu0 %v9671_v20  ;;  %8878 = vmatpush3.bf16.msra.mxu1 %v9672_v9 }
0x426c   : > { %8857 = vmatprep.subr.bf16.mxu0 %v9673_v29  ;;  %8879 = vmatprep.subr.bf16.mxu1 %v9674_v0 }
0x426f   : > { %8858 = vmatpush3.bf16.msra.mxu0 %v9675_v34  ;;  %8880 = vmatpush3.bf16.msra.mxu1 %v9676_v3 }
0x4270   : > { %8859 = vmatprep.subr.bf16.mxu0 %v9677_v2  ;;  %8881 = vmatprep.subr.bf16.mxu1 %v9678_v4 }
0x4273   : > { %8860 = vmatpush3.bf16.msra.mxu0 %v9679_v56  ;;  %8882 = vmatpush3.bf16.msra.mxu1 %v9680_v5 }
0x4274   : > { %8861 = vmatprep.subr.bf16.mxu0 %v9681_v6  ;;  %8883 = vmatprep.subr.bf16.mxu1 %v9682_v36 }
0x4277   : > { %8862 = vmatpush3.bf16.msra.mxu0 %v9683_v61  ;;  %8884 = vmatpush3.bf16.msra.mxu1 %v9684_v10 }
0x4278   : > { %8863 = vmatprep.subr.bf16.mxu0 %v9685_v33  ;;  %8885 = vmatprep.subr.bf16.mxu1 %v9686_v12 }
0x427b   : > { %8864 = vmatpush3.bf16.msra.mxu0 %v9687_v24  ;;  %8886 = vmatpush3.bf16.msra.mxu1 %v9688_v15 }
0x427c   : > { %8865 = vmatprep.subr.bf16.mxu0 %v9689_v16  ;;  %8887 = vmatprep.subr.bf16.mxu1 %v9690_v38 }
0x427f   : > { %8866 = vmatpush3.bf16.msra.mxu0 %v9691_v17  ;;  %8888 = vmatpush3.bf16.msra.mxu1 %v9692_v23 }
0x4280   : > { %8867 = vmatprep.subr.bf16.mxu0 %v9693_v18  ;;  %8889 = vmatprep.subr.bf16.mxu1 %v9694_v25 }
0x4283   : > { %8868 = vmatpush3.bf16.msra.mxu0 %v9695_v26  ;;  %8890 = vmatpush3.bf16.msra.mxu1 %v9696_v62  ;;  %v9703_v26 = vld [vmem:[%s10112_s18 + $0x38] sm:$0xff]  }
0x4284   : > { %8869 = vmatprep.subr.bf16.mxu0 %v9697_v32  ;;  %8891 = vmatprep.subr.bf16.mxu1 %v9698_v51  ;;  %v9704_v62 = vld [vmem:[%s10112_s18 + $0xb8] sm:$0xff]  }
0x4287   : > { %8870 = vmatpush3.bf16.msra.mxu0 %v9699_v35  ;;  %8892 = vmatpush3.bf16.msra.mxu1 %v9700_v37 }
0x4288   : > { %8899 = vmatprep.subr.bf16.mxu0 %v9701_v27  ;;  %8921 = vmatprep.subr.bf16.mxu1 %v9702_v22  ;;  %v9705_v27 = vld [vmem:[%s10112_s18 + $0x70] sm:$0xff]  }
0x4289   : > { %v9706_v22 = vld [vmem:[%s10112_s18 + $0xf0] sm:$0xff]  }
0x431a   : > { %v11094_v28 = vpop.f32.mrf.mxu0  ;;  %v11096_v14 = vpop.f32.mrf.mxu1 }
0x431c   : > { %v6049_v40 = vpop.f32.mrf.mxu0  ;;  %v6092_v48 = vpop.f32.mrf.mxu1 }
0x431d   : > { %v6050_v6 = vadd.f32 %v6049_v40, %v5917_v58  ;;  %v6093_v36 = vadd.f32 %v6092_v48, %v5925_v19 }
0x431e   : > { %v11098_v39 = vpop.f32.mrf.mxu0  ;;  %v11100_v55 = vpop.f32.mrf.mxu1 }
0x431f   : > { %v6100_v32 = vmax.f32 %v6050_v6, 0.0  ;;  %v6102_v51 = vmax.f32 %v6093_v36, 0.0  ;;  %v9730_v6 = vld [vmem:[%s10112_s18 + $0xc0] sm:$0xff]  }
0x4320   : > { %v6053_v42 = vpop.f32.mrf.mxu0  ;;  %v6096_v43 = vpop.f32.mrf.mxu1  ;;  %v7015_v36 = vld [vmem:[%s10100_s23 + $0x1a0] sm:$0xff] }
0x4321   : > { %v6054_v29 = vadd.f32 %v6053_v42, %v5917_v58  ;;  %v6097_v0 = vadd.f32 %v6096_v43, %v5925_v19  ;;  %v9707_v42 = vld [vmem:[%s10112_s18 + $0x30] sm:$0xff]   ;;  %v9718_v58 = vld [vmem:[%s10112_s18 + $0xd8] sm:$0xff]  }
0x4322   : > { %v9708_v43 = vld [vmem:[%s10112_s18 + $0xb0] sm:$0xff]   ;;  %v9719_v19 = vld [vmem:[%s10112_s18 + $0x18] sm:$0xff]  }
0x4323   : > { %v6104_v16 = vmax.f32 %v6054_v29, 0.0  ;;  %v6106_v38 = vmax.f32 %v6097_v0, 0.0  ;;  %v9726_v29 = vld [vmem:[%s10112_s18 + $0xc8] sm:$0xff]   ;;  %v5913_v0 = vrot.slane %v11114_v54, %v10154_v21 }
0x4325   : > { %v6108_v40 = vpack.c.bf16 %v6104_v16, %v6100_v32  ;;  %v6110_v48 = vpack.c.bf16 %v6106_v38, %v6102_v51 }
0x432a   : > { %v6327_v45 = vpop.f32.mrf.mxu0  ;;  %v6370_v7 = vpop.f32.mrf.mxu1 }
0x432b   : > { %v6328_v34 = vadd.f32 %v6327_v45, %v6196_v49  ;;  %v6371_v3 = vadd.f32 %v6370_v7, %v6204_v50  ;;  %v9710_v45 = vld [vmem:[%s10112_s18 + $0xe8] sm:$0xff]  }
0x432c   : > { %v6329_v1 = vpop.f32.mrf.mxu0  ;;  %v6372_v53 = vpop.f32.mrf.mxu1  ;;  %v9711_v7 = vld [vmem:[%s10112_s18 + $0x28] sm:$0xff]  }
0x432d   : > { %v6330_v63 = vadd.f32 %v6329_v1, %v6200_v46  ;;  %v6373_v60 = vadd.f32 %v6372_v53, %v6208_v47  ;;  %v6379_v17 = vmax.f32 %v6328_v34, 0.0  ;;  %v6381_v23 = vmax.f32 %v6371_v3, 0.0  ;;  %v9716_v1 = vld [vmem:[%s10112_s18 + $0xa0] sm:$0xff]   ;;  %v9717_v53 = vld [vmem:[%s10112_s18 + $0x58] sm:$0xff]   ;;  %v9727_v3 = vld [vmem:[%s10112_s18 + $0x8] sm:$0xff]  }
0x432e   : > { %v6331_v59 = vpop.f32.mrf.mxu0  ;;  %v6374_v57 = vpop.f32.mrf.mxu1  ;;  %v5921_v34 = vrot.slane %v11114_v54, %v11107_v52  ;;  %v7018_v54 = vld [vmem:[%s10100_s23 + $0x1e8] sm:$0xff] }
0x432f   : > { %v6332_v20 = vadd.f32 %v6331_v59, %v6196_v49  ;;  %v6375_v9 = vadd.f32 %v6374_v57, %v6204_v50  ;;  %v6380_v33 = vmax.f32 %v6330_v63, 0.0  ;;  %v6382_v12 = vmax.f32 %v6373_v60, 0.0  ;;  %v9714_v49 = vld [vmem:[%s10112_s18 + $0xe0] sm:$0xff]   ;;  %v9720_v59 = vld [vmem:[%s10112_s18 + $0x98] sm:$0xff]   ;;  %v9721_v57 = vld [vmem:[%s10112_s18 + $0x50] sm:$0xff]  }
0x4330   : > { %v6333_v2 = vpop.f32.mrf.mxu0  ;;  %v6376_v4 = vpop.f32.mrf.mxu1  ;;  %v9715_v50 = vld [vmem:[%s10112_s18 + $0x20] sm:$0xff]   ;;  %v9722_v63 = vld [vmem:[%s10112_s18 + $0xd0] sm:$0xff]  }
0x4331   : > { %v6334_v56 = vadd.f32 %v6333_v2, %v6200_v46  ;;  %v6377_v5 = vadd.f32 %v6376_v4, %v6208_v47  ;;  %v6383_v61 = vmax.f32 %v6332_v20, 0.0  ;;  %v6385_v10 = vmax.f32 %v6375_v9, 0.0  ;;  %v9712_v46 = vld [vmem:[%s10112_s18 + $0xa8] sm:$0xff]   ;;  %v9713_v47 = vld [vmem:[%s10112_s18 + $0x60] sm:$0xff]   ;;  %v9723_v60 = vld [vmem:[%s10112_s18 + $0x10] sm:$0xff]  }
0x4332   : > { %v9724_v20 = vld [vmem:[%s10112_s18 + $0x90] sm:$0xff]   ;;  %v9725_v9 = vld [vmem:[%s10112_s18 + $0x48] sm:$0xff]   ;;  %v6052_v4 = vadd.f32 %v11098_v39, %v5913_v0  ;;  %v9731_v39 = vld [vmem:[%s10112_s18] sm:$0xff]  }
0x4333   : > { %v6384_v24 = vmax.f32 %v6334_v56, 0.0  ;;  %v6386_v15 = vmax.f32 %v6377_v5, 0.0  ;;  %v6387_v35 = vpack.c.bf16 %v6383_v61, %v6379_v17  ;;  %v6389_v37 = vpack.c.bf16 %v6385_v10, %v6381_v23  ;;  %v9728_v2 = vld [vmem:[%s10112_s18 + $0x88] sm:$0xff]   ;;  %v9729_v5 = vld [vmem:[%s10112_s18 + $0x40] sm:$0xff]  }
0x4334   : > { %v6095_v56 = vadd.f32 %v11100_v55, %v5921_v34  ;;  %v7017_v61 = vld [vmem:[%s10100_s23 + $0x1e0] sm:$0xff]  ;;  %v7016_v10 = vld [vmem:[%s10100_s23 + $0x1a8] sm:$0xff] }
0x4335   : > { %v6388_v18 = vpack.c.bf16 %v6384_v24, %v6380_v33  ;;  %v6390_v25 = vpack.c.bf16 %v6386_v15, %v6382_v12  ;;  %v6048_v33 = vadd.f32 %v11094_v28, %v5913_v0  ;;  %v6091_v12 = vadd.f32 %v11096_v14, %v5921_v34  ;;  %v9732_v55 = vld [vmem:[%s10112_s18 + $0x80] sm:$0xff]   ;;  %v9739_v0 = vld [vmem:[%s10112_s18 + $0x230] sm:$0xff]  }
0x4336   : > { %v6103_v24 = vmax.f32 %v6052_v4, 0.0  ;;  %v6105_v15 = vmax.f32 %v6095_v56, 0.0  ;;  %v8566_v16 = vcombine.high %v7015_v36, %v7017_v61  ;;  %v8568_v38 = vcombine.high %v7016_v10, %v7018_v54  ;;  %v7011_v17 = vld [vmem:[%s10100_s23 + $0x120] sm:$0xff]  ;;  %v9740_v34 = vld [vmem:[%s10112_s18 + $0x2b0] sm:$0xff]   ;;  %v9743_v4 = vld [vmem:[%s10112_s18 + $0x228] sm:$0xff]  }
0x4337   : > { %6679 = vmatprep.mubr.bf16.mxu0 %v6388_v18  ;;  %6720 = vmatprep.mubr.bf16.mxu1 %v6390_v25  ;;  %v7013_v23 = vld [vmem:[%s10100_s23 + $0x160] sm:$0xff]  ;;  %v7012_v18 = vld [vmem:[%s10100_s23 + $0x128] sm:$0xff]  ;;  %v6099_v28 = vmax.f32 %v6048_v33, 0.0  ;;  %v6101_v14 = vmax.f32 %v6091_v12, 0.0  ;;  %v9751_v33 = vld [vmem:[%s10112_s18 + $0x218] sm:$0xff]  }
0x4338   : > { %6680 = vmatmul.mubr.bf16.vlgmr.msra.gmra.mxu0 %v6387_v35  ;;  %6721 = vmatmul.mubr.bf16.vlgmr.msra.gmra.mxu1 %v6389_v37  ;;  %v7014_v25 = vld [vmem:[%s10100_s23 + $0x168] sm:$0xff]  ;;  %v8562_v32 = vcombine.high %v7011_v17, %v7013_v23  ;;  %v9752_v12 = vld [vmem:[%s10112_s18 + $0x298] sm:$0xff]  }
0x4339   : > { %8900 = vmatpush3.bf16.msra.mxu0 %v9703_v26  ;;  %8922 = vmatpush3.bf16.msra.mxu1 %v9704_v62  ;;  %v8565_v26 = vcombine.low %v7015_v36, %v7017_v61  ;;  %v8567_v62 = vcombine.low %v7016_v10, %v7018_v54  ;;  %v6107_v51 = vpack.c.bf16 %v6103_v24, %v6099_v28  ;;  %v9744_v56 = vld [vmem:[%s10112_s18 + $0x2a8] sm:$0xff]   ;;  %v9747_v36 = vld [vmem:[%s10112_s18 + $0x220] sm:$0xff]   ;;  %v9749_v10 = vld [vmem:[%s10112_s18 + $0x258] sm:$0xff]  }
0x433a   : > { %6953 = vmatprep.mubr.bf16.mxu0 %v6108_v40  ;;  %6994 = vmatprep.mubr.bf16.mxu1 %v6110_v48  ;;  %v6109_v35 = vpack.c.bf16 %v6105_v15, %v6101_v14  ;;  %v8564_v37 = vcombine.high %v7012_v18, %v7014_v25  ;;  %v7008_v40 = vld [vmem:[%s10100_s23 + $0xa8] sm:$0xff]  ;;  %v9748_v61 = vld [vmem:[%s10112_s18 + $0x2a0] sm:$0xff]   ;;  %v9750_v54 = vld [vmem:[%s10112_s18 + $0x2d8] sm:$0xff]  }
0x433b   : > { %8901 = vmatprep.subr.bf16.mxu0 %v9705_v27  ;;  %8923 = vmatprep.subr.bf16.mxu1 %v9706_v22  ;;  %v7007_v27 = vld [vmem:[%s10100_s23 + $0xa0] sm:$0xff]  ;;  %v7010_v48 = vld [vmem:[%s10100_s23 + $0xe8] sm:$0xff]  ;;  %v9755_v24 = vld [vmem:[%s10112_s18 + $0x210] sm:$0xff]  }
0x433c   : > { %v7009_v22 = vld [vmem:[%s10100_s23 + $0xe0] sm:$0xff]  ;;  %v9756_v15 = vld [vmem:[%s10112_s18 + $0x290] sm:$0xff]  }
0x433d   : > { %8902 = vmatpush3.bf16.msra.mxu0 %v9707_v42  ;;  %8924 = vmatpush3.bf16.msra.mxu1 %v9708_v43  ;;  %v8561_v42 = vcombine.low %v7011_v17, %v7013_v23  ;;  %v8563_v43 = vcombine.low %v7012_v18, %v7014_v25  ;;  %v9759_v17 = vld [vmem:[%s10112_s18 + $0x208] sm:$0xff]   ;;  %v9761_v18 = vld [vmem:[%s10112_s18 + $0x240] sm:$0xff]  }
0x433e   : > { %8903 = vmatprep.subr.bf16.mxu0 %v9709_v44  ;;  %8925 = vmatprep.subr.bf16.mxu1 %v9710_v45  ;;  %v8558_v44 = vcombine.high %v7007_v27, %v7009_v22  ;;  %v8560_v45 = vcombine.high %v7008_v40, %v7010_v48  ;;  %v9760_v23 = vld [vmem:[%s10112_s18 + $0x288] sm:$0xff]   ;;  %v9762_v25 = vld [vmem:[%s10112_s18 + $0x2c0] sm:$0xff]  }
0x433f   : > { %v9763_v28 = vld [vmem:[%s10112_s18 + $0x200] sm:$0xff]  }
0x4340   : > { %v9764_v14 = vld [vmem:[%s10112_s18 + $0x280] sm:$0xff]  }
0x4341   : > { %8904 = vmatpush3.bf16.msra.mxu0 %v9711_v7  ;;  %8926 = vmatpush3.bf16.msra.mxu1 %v9712_v46  ;;  %v7003_v7 = vld [vmem:[%s10100_s23 + $0x20] sm:$0xff] }
0x4342   : > { %8905 = vmatprep.subr.bf16.mxu0 %v9713_v47  ;;  %8927 = vmatprep.subr.bf16.mxu1 %v9714_v49  ;;  %v7005_v46 = vld [vmem:[%s10100_s23 + $0x60] sm:$0xff]  ;;  %v7004_v47 = vld [vmem:[%s10100_s23 + $0x28] sm:$0xff] }
0x4343   : > { %v7006_v49 = vld [vmem:[%s10100_s23 + $0x68] sm:$0xff] }
0x4345   : > { %8906 = vmatpush3.bf16.msra.mxu0 %v9715_v50  ;;  %8928 = vmatpush3.bf16.msra.mxu1 %v9716_v1  ;;  %v8557_v50 = vcombine.low %v7007_v27, %v7009_v22  ;;  %v8559_v1 = vcombine.low %v7008_v40, %v7010_v48 }
0x4346   : > { %8907 = vmatprep.subr.bf16.mxu0 %v9717_v53  ;;  %8929 = vmatprep.subr.bf16.mxu1 %v9718_v58  ;;  %v8554_v53 = vcombine.high %v7003_v7, %v7005_v46  ;;  %v8556_v58 = vcombine.high %v7004_v47, %v7006_v49 }
0x4349   : > { %8908 = vmatpush3.bf16.msra.mxu0 %v9719_v19  ;;  %8930 = vmatpush3.bf16.msra.mxu1 %v9720_v59  ;;  %v8553_v19 = vcombine.low %v7003_v7, %v7005_v46  ;;  %v8555_v59 = vcombine.low %v7004_v47, %v7006_v49 }
0x434a   : > { %8909 = vmatprep.subr.bf16.mxu0 %v9721_v57  ;;  %8931 = vmatprep.subr.bf16.mxu1 %v9722_v63  ;;  %v9733_v57 = vld [vmem:[%s10112_s18 + $0x278] sm:$0xff]  }
0x434b   : > { %v9734_v63 = vld [vmem:[%s10112_s18 + $0x2f8] sm:$0xff]  }
0x434d   : > { %8910 = vmatpush3.bf16.msra.mxu0 %v9723_v60  ;;  %8932 = vmatpush3.bf16.msra.mxu1 %v9724_v20  ;;  %v9735_v60 = vld [vmem:[%s10112_s18 + $0x238] sm:$0xff]  }
0x434e   : > { %8911 = vmatprep.subr.bf16.mxu0 %v9725_v9  ;;  %8933 = vmatprep.subr.bf16.mxu1 %v9726_v29  ;;  %v9736_v20 = vld [vmem:[%s10112_s18 + $0x2b8] sm:$0xff]   ;;  %v9737_v9 = vld [vmem:[%s10112_s18 + $0x270] sm:$0xff]  }
0x434f   : > { %v9738_v29 = vld [vmem:[%s10112_s18 + $0x2f0] sm:$0xff]  }
0x4351   : > { %8912 = vmatpush3.bf16.msra.mxu0 %v9727_v3  ;;  %8934 = vmatpush3.bf16.msra.mxu1 %v9728_v2  ;;  %v9741_v3 = vld [vmem:[%s10112_s18 + $0x268] sm:$0xff]  }
0x4352   : > { %8913 = vmatprep.subr.bf16.mxu0 %v9729_v5  ;;  %8935 = vmatprep.subr.bf16.mxu1 %v9730_v6  ;;  %v9742_v2 = vld [vmem:[%s10112_s18 + $0x2e8] sm:$0xff]   ;;  %v9745_v5 = vld [vmem:[%s10112_s18 + $0x260] sm:$0xff]  }
0x4353   : > { %v9746_v6 = vld [vmem:[%s10112_s18 + $0x2e0] sm:$0xff]  }
0x4355   : > { %8914 = vmatpush3.bf16.msra.mxu0 %v9731_v39  ;;  %8936 = vmatpush3.bf16.msra.mxu1 %v9732_v55  ;;  %v9753_v39 = vld [vmem:[%s10112_s18 + $0x250] sm:$0xff]  }
0x4356   : > { %7129 = vmatprep.subr.bf16.mxu0 %v8566_v16  ;;  %7172 = vmatprep.subr.bf16.mxu1 %v8568_v38  ;;  %v9754_v55 = vld [vmem:[%s10112_s18 + $0x2d0] sm:$0xff]   ;;  %v9757_v16 = vld [vmem:[%s10112_s18 + $0x248] sm:$0xff]  }
0x4357   : > { %v9758_v38 = vld [vmem:[%s10112_s18 + $0x2c8] sm:$0xff]  }
0x4358   : > { %6954 = vmatmul.mubr.bf16.vlgmr.msra.gmra.mxu0 %v6107_v51  ;;  %6995 = vmatmul.mubr.bf16.vlgmr.msra.gmra.mxu1 %v6109_v35  ;;  %v11224_v35 = vld [vmem:[%s10100_s23 + $0x1f8] sm:$0xff] }
0x4359   : > { %7130 = vmatpush1.bf16.msra.mxu0 %v8565_v26  ;;  %7173 = vmatpush1.bf16.msra.mxu1 %v8567_v62  ;;  %v11213_v26 = vld [vmem:[%s10100_s23 + $0x1b0] sm:$0xff] }
0x435a   : > { %7131 = vmatprep.subr.bf16.mxu0 %v8562_v32  ;;  %7174 = vmatprep.subr.bf16.mxu1 %v8564_v37  ;;  %v11216_v62 = vld [vmem:[%s10100_s23 + $0x1f0] sm:$0xff]  ;;  %v11219_v32 = vld [vmem:[%s10100_s23 + $0x1b8] sm:$0xff] }
0x435b   : > { %7153 = vmatprep.mubr.bf16.mxu0 %v9943_v8  ;;  %7196 = vmatprep.mubr.bf16.mxu1 %v9943_v8  ;;  %v8616_v51 = vcombine.high %v11213_v26, %v11216_v62  ;;  %v8615_v37 = vcombine.low %v11213_v26, %v11216_v62  ;;  %v8617_v27 = vcombine.low %v11219_v32, %v11224_v35 }
0x435c   : > { %v8618_v22 = vcombine.high %v11219_v32, %v11224_v35 }
0x435d   : > { %7132 = vmatpush1.bf16.msra.mxu0 %v8561_v42  ;;  %7175 = vmatpush1.bf16.msra.mxu1 %v8563_v43 }
0x435e   : > { %7133 = vmatprep.subr.bf16.mxu0 %v8558_v44  ;;  %7176 = vmatprep.subr.bf16.mxu1 %v8560_v45 }
0x4361   : > { %7134 = vmatpush1.bf16.msra.mxu0 %v8557_v50  ;;  %7177 = vmatpush1.bf16.msra.mxu1 %v8559_v1 }
0x4362   : > { %7135 = vmatprep.subr.bf16.mxu0 %v8554_v53  ;;  %7178 = vmatprep.subr.bf16.mxu1 %v8556_v58 }
0x4365   : > { %7136 = vmatpush1.bf16.msra.mxu0 %v8553_v19  ;;  %7179 = vmatpush1.bf16.msra.mxu1 %v8555_v59 }
0x4366   : > { %8943 = vmatprep.subr.bf16.mxu0 %v9733_v57  ;;  %8965 = vmatprep.subr.bf16.mxu1 %v9734_v63 }
0x4368   : > { %8569 = vmatmul.mubr.msk.bf16.vlgmr.msra.gmra.mxu0 %vm708_vm1, %v11040_v31  ;;  %8570 = vmatmul.mubr.msk.bf16.vlgmr.msra.gmra.mxu1 %vm708_vm1, %v11040_v31 }
0x4369   : > { %8944 = vmatpush3.bf16.msra.mxu0 %v9735_v60  ;;  %8966 = vmatpush3.bf16.msra.mxu1 %v9736_v20 }
0x436a   : > { %8945 = vmatprep.subr.bf16.mxu0 %v9737_v9  ;;  %8967 = vmatprep.subr.bf16.mxu1 %v9738_v29 }
0x436d   : > { %8946 = vmatpush3.bf16.msra.mxu0 %v9739_v0  ;;  %8968 = vmatpush3.bf16.msra.mxu1 %v9740_v34 }
0x436e   : > { %8947 = vmatprep.subr.bf16.mxu0 %v9741_v3  ;;  %8969 = vmatprep.subr.bf16.mxu1 %v9742_v2 }
0x4371   : > { %8948 = vmatpush3.bf16.msra.mxu0 %v9743_v4  ;;  %8970 = vmatpush3.bf16.msra.mxu1 %v9744_v56 }
0x4372   : > { %8949 = vmatprep.subr.bf16.mxu0 %v9745_v5  ;;  %8971 = vmatprep.subr.bf16.mxu1 %v9746_v6 }
0x4375   : > { %8950 = vmatpush3.bf16.msra.mxu0 %v9747_v36  ;;  %8972 = vmatpush3.bf16.msra.mxu1 %v9748_v61  ;;  %v7019_v36 = vld [vmem:[%s10106_s29 + $0x8] sm:$0xf] }
0x4376   : > { %8951 = vmatprep.subr.bf16.mxu0 %v9749_v10  ;;  %8973 = vmatprep.subr.bf16.mxu1 %v9750_v54  ;;  %v7028_v54 = vrot.slane %v7019_v36, %v10173_v30 }
0x4379   : > { %8952 = vmatpush3.bf16.msra.mxu0 %v9751_v33  ;;  %8974 = vmatpush3.bf16.msra.mxu1 %v9752_v12  ;;  %v7036_v33 = vrot.slane %v7019_v36, %v11103_v11  ;;  %v7024_v12 = vrot.slane %v7019_v36, %v10154_v21 }
0x437a   : > { %8953 = vmatprep.subr.bf16.mxu0 %v9753_v39  ;;  %8975 = vmatprep.subr.bf16.mxu1 %v9754_v55  ;;  %v7032_v39 = vrot.slane %v7019_v36, %v11107_v52  ;;  %v7561_v36 = vld [vmem:[%s10100_s23 + $0x70] sm:$0xff] }
0x437d   : > { %8954 = vmatpush3.bf16.msra.mxu0 %v9755_v24  ;;  %8976 = vmatpush3.bf16.msra.mxu1 %v9756_v15 }
0x437e   : > { %8955 = vmatprep.subr.bf16.mxu0 %v9757_v16  ;;  %8977 = vmatprep.subr.bf16.mxu1 %v9758_v38 }
0x4381   : > { %8956 = vmatpush3.bf16.msra.mxu0 %v9759_v17  ;;  %8978 = vmatpush3.bf16.msra.mxu1 %v9760_v23 }
0x4382   : > { %8957 = vmatprep.subr.bf16.mxu0 %v9761_v18  ;;  %8979 = vmatprep.subr.bf16.mxu1 %v9762_v25 }
0x4385   : > { %8958 = vmatpush3.bf16.msra.mxu0 %v9763_v28  ;;  %8980 = vmatpush3.bf16.msra.mxu1 %v9764_v14 }
0x4386   : > { %7685 = vmatprep.subr.bf16.mxu0 %v8616_v51  ;;  %7728 = vmatprep.subr.bf16.mxu1 %v8618_v22 }
0x43f8   : > { %v8871_v40 = vpop.f32.mrf.mxu0  ;;  %v8893_v48 = vpop.f32.mrf.mxu1 }
0x43fa   : > { %v8872_v42 = vpop.f32.mrf.mxu0  ;;  %v8894_v43 = vpop.f32.mrf.mxu1 }
0x43fb   : > { %v8873_v44 = vadd.f32 %v8872_v42, %v8871_v40  ;;  %v8895_v45 = vadd.f32 %v8894_v43, %v8893_v48  ;;  %v7567_v43 = vld [vmem:[%s10100_s23 + $0x130] sm:$0xff] }
0x43fc   : > { %v8874_v7 = vpop.f32.mrf.mxu0  ;;  %v8896_v46 = vpop.f32.mrf.mxu1 }
0x43fd   : > { %v6723_v47 = vadd.f32 %v8895_v45, %v8873_v44  ;;  %v7569_v44 = vld [vmem:[%s10100_s23 + $0x170] sm:$0xff] }
0x43fe   : > { %v8875_v49 = vpop.f32.mrf.mxu0  ;;  %v8897_v50 = vpop.f32.mrf.mxu1 }
0x43ff   : > { %v8876_v1 = vadd.f32 %v8875_v49, %v8874_v7  ;;  %v8898_v53 = vadd.f32 %v8897_v50, %v8896_v46  ;;  %v7568_v49 = vld [vmem:[%s10100_s23 + $0x138] sm:$0xff] }
0x4400   : > { %v7570_v50 = vld [vmem:[%s10100_s23 + $0x178] sm:$0xff] }
0x4401   : > { %v6726_v58 = vadd.f32 %v8898_v53, %v8876_v1 }
0x4418   : > { %v8915_v19 = vpop.f32.mrf.mxu0  ;;  %v8937_v59 = vpop.f32.mrf.mxu1 }
0x441a   : > { %v8916_v57 = vpop.f32.mrf.mxu0  ;;  %v8938_v63 = vpop.f32.mrf.mxu1 }
0x441b   : > { %v8917_v60 = vadd.f32 %v8916_v57, %v8915_v19  ;;  %v8939_v20 = vadd.f32 %v8938_v63, %v8937_v59  ;;  %v8612_v63 = vcombine.high %v7567_v43, %v7569_v44 }
0x441c   : > { %v8918_v9 = vpop.f32.mrf.mxu0  ;;  %v8940_v29 = vpop.f32.mrf.mxu1 }
0x441d   : > { %v6956_v0 = vadd.f32 %v8917_v60, %v6723_v47  ;;  %v8614_v60 = vcombine.high %v7568_v49, %v7570_v50 }
0x441e   : > { %v8919_v34 = vpop.f32.mrf.mxu0  ;;  %v8941_v3 = vpop.f32.mrf.mxu1 }
0x441f   : > { %v11232_v2 = vadd.f32 %v8939_v20, %v6956_v0  ;;  %v8920_v4 = vadd.f32 %v8919_v34, %v8918_v9  ;;  %v8942_v56 = vadd.f32 %v8941_v3, %v8940_v29  ;;  %v7563_v20 = vld [vmem:[%s10100_s23 + $0xb0] sm:$0xff]  ;;  %v7564_v29 = vld [vmem:[%s10100_s23 + $0xb8] sm:$0xff]  ;;  %v8611_v34 = vcombine.low %v7567_v43, %v7569_v44 }
0x4420   : > { %v7565_v9 = vld [vmem:[%s10100_s23 + $0xf0] sm:$0xff]  ;;  %v7566_v0 = vld [vmem:[%s10100_s23 + $0xf8] sm:$0xff]  ;;  %v8613_v3 = vcombine.low %v7568_v49, %v7570_v50  ;;  %v9793_v49 = vld [vmem:[%s10112_s18 + $0x340] sm:$0xff]  }
0x4421   : > { %v6959_v5 = vadd.f32 %v8920_v4, %v6726_v58  ;;  %v8608_v4 = vcombine.high %v7563_v20, %v7565_v9  ;;  %v8607_v26 = vcombine.low %v7563_v20, %v7565_v9  ;;  %v8609_v62 = vcombine.low %v7564_v29, %v7566_v0  ;;  %v9787_v43 = vld [vmem:[%s10112_s18 + $0x310] sm:$0xff]   ;;  %v9794_v50 = vld [vmem:[%s10112_s18 + $0x3c0] sm:$0xff]  }
0x4422   : > { %v9788_v44 = vld [vmem:[%s10112_s18 + $0x390] sm:$0xff]  }
0x4423   : > { %v11234_v6 = vadd.f32 %v8942_v56, %v6959_v5  ;;  %v8610_v56 = vcombine.high %v7564_v29, %v7566_v0  ;;  %v7559_v5 = vld [vmem:[%s10100_s23 + $0x30] sm:$0xff] }
0x4424   : > { %v8604_v32 = vcombine.high %v7559_v5, %v7561_v36 }
0x4428   : > { %v7155_v61 = vpop.f32.mrf.mxu0  ;;  %v7198_v10 = vpop.f32.mrf.mxu1 }
0x4429   : > { %v7156_v25 = vadd.f32 %v7155_v61, %v7024_v12  ;;  %v7199_v28 = vadd.f32 %v7198_v10, %v7032_v39  ;;  %v7560_v61 = vld [vmem:[%s10100_s23 + $0x38] sm:$0xff] }
0x442a   : > { %v7157_v55 = vpop.f32.mrf.mxu0  ;;  %v7200_v24 = vpop.f32.mrf.mxu1  ;;  %v7562_v10 = vld [vmem:[%s10100_s23 + $0x78] sm:$0xff] }
0x442b   : > { %v7158_v38 = vadd.f32 %v7157_v55, %v7028_v54  ;;  %v7201_v17 = vadd.f32 %v7200_v24, %v7036_v33  ;;  %v7207_v1 = vmax.f32 %v7156_v25, 0.0  ;;  %v7209_v53 = vmax.f32 %v7199_v28, 0.0  ;;  %v9770_v55 = vld [vmem:[%s10112_s18 + $0x3f0] sm:$0xff]   ;;  %v9779_v25 = vld [vmem:[%s10112_s18 + $0x320] sm:$0xff]  }
0x442c   : > { %v7159_v15 = vpop.f32.mrf.mxu0  ;;  %v7202_v16 = vpop.f32.mrf.mxu1  ;;  %v8606_v35 = vcombine.high %v7560_v61, %v7562_v10  ;;  %v9771_v24 = vld [vmem:[%s10112_s18 + $0x330] sm:$0xff]   ;;  %v9780_v28 = vld [vmem:[%s10112_s18 + $0x3a0] sm:$0xff]  }
0x442d   : > { %v7160_v23 = vadd.f32 %v7159_v15, %v7024_v12  ;;  %v7203_v18 = vadd.f32 %v7202_v16, %v7032_v39  ;;  %v7208_v45 = vmax.f32 %v7158_v38, 0.0  ;;  %v7210_v7 = vmax.f32 %v7201_v17, 0.0  ;;  %v9768_v12 = vld [vmem:[%s10112_s18 + $0x3b8] sm:$0xff]   ;;  %v9769_v39 = vld [vmem:[%s10112_s18 + $0x370] sm:$0xff]   ;;  %v9773_v16 = vld [vmem:[%s10112_s18 + $0x368] sm:$0xff]  }
0x442e   : > { %v7161_v14 = vpop.f32.mrf.mxu0  ;;  %v7204_v51 = vpop.f32.mrf.mxu1  ;;  %v9772_v15 = vld [vmem:[%s10112_s18 + $0x3b0] sm:$0xff]   ;;  %v9774_v38 = vld [vmem:[%s10112_s18 + $0x3e8] sm:$0xff]  }
0x442f   : > { %v7162_v22 = vadd.f32 %v7161_v14, %v7028_v54  ;;  %v7205_v40 = vadd.f32 %v7204_v51, %v7036_v33  ;;  %v7211_v48 = vmax.f32 %v7160_v23, 0.0  ;;  %v7213_v42 = vmax.f32 %v7203_v18, 0.0  ;;  %v9766_v54 = vld [vmem:[%s10112_s18 + $0x3f8] sm:$0xff]   ;;  %v9775_v17 = vld [vmem:[%s10112_s18 + $0x328] sm:$0xff]   ;;  %v9777_v23 = vld [vmem:[%s10112_s18 + $0x360] sm:$0xff]  }
0x4430   : > { %v9767_v33 = vld [vmem:[%s10112_s18 + $0x338] sm:$0xff]   ;;  %v9778_v18 = vld [vmem:[%s10112_s18 + $0x3e0] sm:$0xff]  }
0x4431   : > { %v7212_v46 = vmax.f32 %v7162_v22, 0.0  ;;  %v7214_v47 = vmax.f32 %v7205_v40, 0.0  ;;  %v7215_v59 = vpack.c.bf16 %v7211_v48, %v7207_v1  ;;  %v7217_v57 = vpack.c.bf16 %v7213_v42, %v7209_v53  ;;  %v9781_v14 = vld [vmem:[%s10112_s18 + $0x358] sm:$0xff]   ;;  %v9785_v48 = vld [vmem:[%s10112_s18 + $0x350] sm:$0xff]   ;;  %v9795_v1 = vld [vmem:[%s10112_s18 + $0x300] sm:$0xff]  }
0x4432   : > { %v9782_v51 = vld [vmem:[%s10112_s18 + $0x3d8] sm:$0xff]   ;;  %v9786_v42 = vld [vmem:[%s10112_s18 + $0x3d0] sm:$0xff]   ;;  %v9796_v53 = vld [vmem:[%s10112_s18 + $0x380] sm:$0xff]  }
0x4433   : > { %v7216_v58 = vpack.c.bf16 %v7212_v46, %v7208_v45  ;;  %v7218_v19 = vpack.c.bf16 %v7214_v47, %v7210_v7  ;;  %v9783_v22 = vld [vmem:[%s10112_s18 + $0x318] sm:$0xff]   ;;  %v9789_v45 = vld [vmem:[%s10112_s18 + $0x348] sm:$0xff]  }
0x4434   : > { %v9784_v40 = vld [vmem:[%s10112_s18 + $0x398] sm:$0xff]   ;;  %v9790_v7 = vld [vmem:[%s10112_s18 + $0x3c8] sm:$0xff]  }
0x4435   : > { %7507 = vmatprep.mubr.bf16.mxu0 %v7216_v58  ;;  %7548 = vmatprep.mubr.bf16.mxu1 %v7218_v19  ;;  %v9791_v46 = vld [vmem:[%s10112_s18 + $0x308] sm:$0xff]  }
0x4436   : > { %7508 = vmatmul.mubr.bf16.vlgmr.msra.gmra.mxu0 %v7215_v59  ;;  %7549 = vmatmul.mubr.bf16.vlgmr.msra.gmra.mxu1 %v7217_v57  ;;  %v9792_v47 = vld [vmem:[%s10112_s18 + $0x388] sm:$0xff]  }
0x4437   : > { %7686 = vmatpush1.bf16.msra.mxu0 %v8615_v37  ;;  %7729 = vmatpush1.bf16.msra.mxu1 %v8617_v27  ;;  %v8603_v37 = vcombine.low %v7559_v5, %v7561_v36  ;;  %v8605_v27 = vcombine.low %v7560_v61, %v7562_v10  ;;  %v7575_v61 = vld [vmem:[%s10106_s29 + $0xc] sm:$0xf] }
0x4438   : > { %7687 = vmatprep.subr.bf16.mxu0 %v8612_v63  ;;  %7730 = vmatprep.subr.bf16.mxu1 %v8614_v60 }
0x4439   : > { %7709 = vmatprep.mubr.bf16.mxu0 %v9943_v8  ;;  %7752 = vmatprep.mubr.bf16.mxu1 %v9943_v8  ;;  %v9765_v8 = vld [vmem:[%s10112_s18 + $0x378] sm:$0xff]  }
0x443b   : > { %7688 = vmatpush1.bf16.msra.mxu0 %v8611_v34  ;;  %7731 = vmatpush1.bf16.msra.mxu1 %v8613_v3 }
0x443c   : > { %7689 = vmatprep.subr.bf16.mxu0 %v8608_v4  ;;  %7732 = vmatprep.subr.bf16.mxu1 %v8610_v56 }
0x443f   : > { %7690 = vmatpush1.bf16.msra.mxu0 %v8607_v26  ;;  %7733 = vmatpush1.bf16.msra.mxu1 %v8609_v62  ;;  %v7584_v62 = vrot.slane %v7575_v61, %v10173_v30 }
0x4440   : > { %7691 = vmatprep.subr.bf16.mxu0 %v8604_v32  ;;  %7734 = vmatprep.subr.bf16.mxu1 %v8606_v35  ;;  %v7592_v32 = vrot.slane %v7575_v61, %v11103_v11  ;;  %v7580_v35 = vrot.slane %v7575_v61, %v10154_v21 }
0x4443   : > { %7692 = vmatpush1.bf16.msra.mxu0 %v8603_v37  ;;  %7735 = vmatpush1.bf16.msra.mxu1 %v8605_v27  ;;  %v7588_v37 = vrot.slane %v7575_v61, %v11107_v52 }
0x4444   : > { %8987 = vmatprep.subr.bf16.mxu0 %v9765_v8  ;;  %9009 = vmatprep.subr.bf16.mxu1 %v9766_v54 }
0x4446   : > { %8619 = vmatmul.mubr.msk.bf16.vlgmr.msra.gmra.mxu0 %vm708_vm1, %v11040_v31  ;;  %8620 = vmatmul.mubr.msk.bf16.vlgmr.msra.gmra.mxu1 %vm708_vm1, %v11040_v31  ;;  %v9776_v31 = vld [vmem:[%s10112_s18 + $0x3a8] sm:$0xff]   ;;  %s11414_s18 = scalar_lea.vmem %s11350_s11, %s10064_s15  ;;  %s11417_s15 = sld [smem:[#allocation9_spill]] (!%p8656_p5) }
0x4447   : > { %8988 = vmatpush3.bf16.msra.mxu0 %v9767_v33  ;;  %9010 = vmatpush3.bf16.msra.mxu1 %v9768_v12 }
0x4448   : > { %8989 = vmatprep.subr.bf16.mxu0 %v9769_v39  ;;  %9011 = vmatprep.subr.bf16.mxu1 %v9770_v55 }
0x444b   : > { %8990 = vmatpush3.bf16.msra.mxu0 %v9771_v24  ;;  %9012 = vmatpush3.bf16.msra.mxu1 %v9772_v15 }
0x444c   : > { %8991 = vmatprep.subr.bf16.mxu0 %v9773_v16  ;;  %9013 = vmatprep.subr.bf16.mxu1 %v9774_v38 }
0x444f   : > { %8992 = vmatpush3.bf16.msra.mxu0 %v9775_v17  ;;  %9014 = vmatpush3.bf16.msra.mxu1 %v9776_v31 }
0x4450   : > { %8993 = vmatprep.subr.bf16.mxu0 %v9777_v23  ;;  %9015 = vmatprep.subr.bf16.mxu1 %v9778_v18 }
0x4453   : > { %8994 = vmatpush3.bf16.msra.mxu0 %v9779_v25  ;;  %9016 = vmatpush3.bf16.msra.mxu1 %v9780_v28 }
0x4454   : > { %8995 = vmatprep.subr.bf16.mxu0 %v9781_v14  ;;  %9017 = vmatprep.subr.bf16.mxu1 %v9782_v51 }
0x4457   : > { %8996 = vmatpush3.bf16.msra.mxu0 %v9783_v22  ;;  %9018 = vmatpush3.bf16.msra.mxu1 %v9784_v40 }
0x4458   : > { %8997 = vmatprep.subr.bf16.mxu0 %v9785_v48  ;;  %9019 = vmatprep.subr.bf16.mxu1 %v9786_v42 }
0x445b   : > { %8998 = vmatpush3.bf16.msra.mxu0 %v9787_v43  ;;  %9020 = vmatpush3.bf16.msra.mxu1 %v9788_v44 }
0x445c   : > { %8999 = vmatprep.subr.bf16.mxu0 %v9789_v45  ;;  %9021 = vmatprep.subr.bf16.mxu1 %v9790_v7 }
0x445f   : > { %9000 = vmatpush3.bf16.msra.mxu0 %v9791_v46  ;;  %9022 = vmatpush3.bf16.msra.mxu1 %v9792_v47 }
0x4460   : > { %9001 = vmatprep.subr.bf16.mxu0 %v9793_v49  ;;  %9023 = vmatprep.subr.bf16.mxu1 %v9794_v50 }
0x4463   : > { %9002 = vmatpush3.bf16.msra.mxu0 %v9795_v1  ;;  %9024 = vmatpush3.bf16.msra.mxu1 %v9796_v53  ;;  %v8653_v1 = vld [vmem:[%s11414_s18] ss:$0 sm:$0xff] }
0x44f6   : > { %v8959_v58 = vpop.f32.mrf.mxu0  ;;  %v8981_v19 = vpop.f32.mrf.mxu1 }
0x44f8   : > { %v8960_v59 = vpop.f32.mrf.mxu0  ;;  %v8982_v57 = vpop.f32.mrf.mxu1 }
0x44f9   : > { %v8961_v63 = vadd.f32 %v8960_v59, %v8959_v58  ;;  %v8983_v60 = vadd.f32 %v8982_v57, %v8981_v19 }
0x44fa   : > { %v8962_v20 = vpop.f32.mrf.mxu0  ;;  %v8984_v9 = vpop.f32.mrf.mxu1 }
0x44fb   : > { %v7551_v29 = vadd.f32 %v8983_v60, %v8961_v63 }
0x44fc   : > { %v8963_v0 = vpop.f32.mrf.mxu0  ;;  %v8985_v34 = vpop.f32.mrf.mxu1 }
0x44fd   : > { %v7557_v3 = vadd.f32 %v7551_v29, %v11232_v2  ;;  %v8964_v4 = vadd.f32 %v8963_v0, %v8962_v20  ;;  %v8986_v56 = vadd.f32 %v8985_v34, %v8984_v9 }
0x44ff   : > { %v7554_v5 = vadd.f32 %v8986_v56, %v8964_v4 }
0x4501   : > { %v7558_v36 = vadd.f32 %v7554_v5, %v11234_v6 }
0x4506   : > { %v7711_v10 = vpop.f32.mrf.mxu0  ;;  %v7754_v26 = vpop.f32.mrf.mxu1 }
0x4507   : > { %v7712_v6 = vadd.f32 %v7711_v10, %v7580_v35  ;;  %v7755_v24 = vadd.f32 %v7754_v26, %v7588_v37 }
0x4508   : > { %v7713_v27 = vpop.f32.mrf.mxu0  ;;  %v7756_v8 = vpop.f32.mrf.mxu1 }
0x4509   : > { %v7714_v33 = vadd.f32 %v7713_v27, %v7584_v62  ;;  %v7757_v12 = vadd.f32 %v7756_v8, %v7592_v32  ;;  %v7763_v18 = vmax.f32 %v7712_v6, 0.0  ;;  %v7765_v25 = vmax.f32 %v7755_v24, 0.0 }
0x450a   : > { %v7715_v54 = vpop.f32.mrf.mxu0  ;;  %v7758_v2 = vpop.f32.mrf.mxu1 }
0x450b   : > { %v7716_v39 = vadd.f32 %v7715_v54, %v7580_v35  ;;  %v7759_v55 = vadd.f32 %v7758_v2, %v7588_v37  ;;  %v7764_v31 = vmax.f32 %v7714_v33, 0.0  ;;  %v7766_v21 = vmax.f32 %v7757_v12, 0.0  ;;  %v8654_v54 = vld [vmem:[%s11415_s20] ss:$0 sm:$0xff] }
0x450c   : > { %v7717_v15 = vpop.f32.mrf.mxu0  ;;  %v7760_v16 = vpop.f32.mrf.mxu1  ;;  %v8655_v33 = vld [vmem:[%s11416_s26] ss:$0 sm:$0xff] }
0x450d   : > { %v7718_v38 = vadd.f32 %v7717_v15, %v7584_v62  ;;  %v7761_v30 = vadd.f32 %v7760_v16, %v7592_v32  ;;  %v7767_v17 = vmax.f32 %v7716_v39, 0.0  ;;  %v7769_v11 = vmax.f32 %v7759_v55, 0.0 }
0x450f   : > { %v7768_v23 = vmax.f32 %v7718_v38, 0.0  ;;  %v7770_v52 = vmax.f32 %v7761_v30, 0.0  ;;  %v7771_v51 = vpack.c.bf16 %v7767_v17, %v7763_v18  ;;  %v7773_v22 = vpack.c.bf16 %v7769_v11, %v7765_v25 }
0x4511   : > { %v7772_v28 = vpack.c.bf16 %v7768_v23, %v7764_v31  ;;  %v7774_v14 = vpack.c.bf16 %v7770_v52, %v7766_v21 }
0x4513   : > { %8063 = vmatprep.mubr.bf16.mxu0 %v7772_v28  ;;  %8104 = vmatprep.mubr.bf16.mxu1 %v7774_v14 }
0x4514   : > { %8064 = vmatmul.mubr.bf16.vlgmr.msra.gmra.mxu0 %v7771_v51  ;;  %8105 = vmatmul.mubr.bf16.vlgmr.msra.gmra.mxu1 %v7773_v22 }
0x45d4   : > { %v9003_v40 = vpop.f32.mrf.mxu0  ;;  %v9025_v48 = vpop.f32.mrf.mxu1 }
0x45d6   : > { %v9004_v42 = vpop.f32.mrf.mxu0  ;;  %v9026_v43 = vpop.f32.mrf.mxu1 }
0x45d7   : > { %v9005_v44 = vadd.f32 %v9004_v42, %v9003_v40  ;;  %v9027_v45 = vadd.f32 %v9026_v43, %v9025_v48 }
0x45d8   : > { %v9006_v7 = vpop.f32.mrf.mxu0  ;;  %v9028_v46 = vpop.f32.mrf.mxu1 }
0x45d9   : > { %v8107_v47 = vadd.f32 %v9027_v45, %v9005_v44 }
0x45da   : > { %v9007_v49 = vpop.f32.mrf.mxu0  ;;  %v9029_v50 = vpop.f32.mrf.mxu1 }
0x45db   : > { %v8113_v53 = vadd.f32 %v8107_v47, %v7557_v3  ;;  %v9008_v58 = vadd.f32 %v9007_v49, %v9006_v7  ;;  %v9030_v19 = vadd.f32 %v9029_v50, %v9028_v46 }
0x45dd   : > { %v8110_v59 = vadd.f32 %v9030_v19, %v9008_v58  ;;  %v8122_v57 = vadd.f32 %v8653_v1, %v8113_v53 }
0x45df   : > { %v8114_v63 = vadd.f32 %v8110_v59, %v7558_v36  ;;  %v8124_v60 = vadd.f32 %v8122_v57, %v11034_v41 }
0x45e1   : > { %v8128_v20 = vsel %vm708_vm1, %v8124_v60, 0.0  ;;  %v8123_v9 = vadd.f32 %v8653_v1, %v8114_v63 }
0x45e2   : > { %8129 = vadd.xlane.f32.xlu1 %v8128_v20 }
0x45e3   : > { %v8125_v29 = vadd.f32 %v8123_v9, %v11036_v13 }
0x45e5   : > { %v8131_v0 = vsel %vm708_vm1, %v8125_v29, 0.0 }
0x45e6   : > { %8132 = vadd.xlane.f32.xlu1 %v8131_v0 }
0x466b   : > { %v8130_v34 = vpop.xlane.xlu1 %8129 }
0x466c   : > { %v8134_v4 = vmul.f32 0.015625, %v8130_v34 }
0x466e   : > { %v8136_v56 = vsub.f32 %v8124_v60, %v8134_v4 }
0x466f   : > { %v8133_v3 = vpop.xlane.xlu1 %8132 }
0x4670   : > { %v8135_v5 = vmul.f32 0.015625, %v8133_v3  ;;  %v8138_v61 = vmul.f32 %v8136_v56, %v8136_v56 }
0x4672   : > { %v8137_v10 = vsub.f32 %v8125_v29, %v8135_v5  ;;  %v8140_v36 = vsel %vm708_vm1, %v8138_v61, 0.0 }
0x4673   : > { %8141 = vadd.xlane.f32.xlu0 %v8140_v36 }
0x4674   : > { %v8139_v41 = vmul.f32 %v8137_v10, %v8137_v10 }
0x4676   : > { %v8143_v26 = vsel %vm708_vm1, %v8139_v41, 0.0 }
0x4677   : > { %8144 = vadd.xlane.f32.xlu1 %v8143_v26 }
0x46fc   : > { %v8142_v13 = vpop.xlane.xlu0 %8141 }
0x46fd   : > { %v8146_v62 = vmul.f32 0.015625, %v8142_v13 }
0x46ff   : > { %v8148_v32 = vadd.f32 1e-05, %v8146_v62 }
0x4700   : > { %v8145_v35 = vpop.xlane.xlu1 %8144 }
0x4701   : > { %9929 = vrsqrt.f32 %v8148_v32  ;;  %v8147_v37 = vmul.f32 0.015625, %v8145_v35 }
0x4703   : > { %v8149_v27 = vadd.f32 1e-05, %v8147_v37 }
0x4705   : > { %9931 = vrsqrt.f32 %v8149_v27 }
0x470e   : > { %v9930_v8 = vpop.eup %9929 }
0x470f   : > { %v8152_v2 = vmul.f32 %v9930_v8, %v8136_v56 }
0x4711   : > { %v8160_v12 = vmul.f32 %v8654_v54, %v8152_v2 }
0x4712   : > { %v9932_v39 = vpop.eup %9931 }
0x4713   : > { %v8168_v55 = vadd.f32 %v8655_v33, %v8160_v12  ;;  %v8153_v6 = vmul.f32 %v9932_v39, %v8137_v10 }
0x4715   : > { %8170 = vst.msk [vmem:[#allocation2] sm:$0xff] %vm708_vm1, %v8168_v55  ;;  %v8161_v24 = vmul.f32 %v8654_v54, %v8153_v6  ;;  %8175 = sbr.rel (%p8656_p5) target bundleno = 18210 (0x4722), region = 84 }
0x4717   : > { %v8169_v15 = vadd.f32 %v8655_v33, %v8161_v24 }
0x4719   : > { %8171 = vst.msk [vmem:[#allocation2 + $0x8] sm:$0xff] %vm708_vm1, %v8169_v15 }
0x471c   : > { %v8176_v16 = vld [vmem:[#allocation2] sm:$0xff] }
0x471d   : > { %8178 = vst.msk [vmem:[%s11417_s15] sm:$0xff] %vm708_vm1, %v8176_v16 }
0x4720   : > { %v8177_v38 = vld [vmem:[#allocation2 + $0x8] sm:$0xff] }
0x4721   : > { %8179 = vst.msk [vmem:[%s11417_s15 + $0x8] sm:$0xff] %vm708_vm1, %v8177_v38 }
0x4722 PF: > { %s11418_s28 = sld [smem:[#allocation3_spill]] }
0x4728   : > { %s24_s29 = sadd.s32 1, %s11418_s28  }
0x4729   : > { %p21_p6 = scmp.ge.s32.totalorder %s24_s29, 12  }
0x472b   :  { %23 = sbr.rel (!%p21_p6) target bundleno = 6 (0x6), region = 143 }

</bundles_post_ra>
